<compile_context>
chip_gen: v6e
topology: v6e:2x2x1
jax: 0.10.0
libtpu: 0.0.40
codegen_flags: <defaults>
</compile_context>

<pallas_src>
import jax
import jax.numpy as jnp
from jax.experimental import pallas as pl
from jax.experimental.pallas import tpu as pltpu


def _double_conv_kernel(x_ref, w1_ref, b1_ref, w2_ref, b2_ref, o_ref,
                        xpad_ref, mid_ref):
    """Fused (3x3 'same' conv + bias + ReLU) x 2 for one batch element.

    x_ref  : (1, H, W, Cin)        input tile (VMEM)
    w1_ref : (3, 3*Cin, Cmid)      conv1 weight, kw folded into the contraction axis
    b1_ref : (1, Cmid)             conv1 bias (f32)
    w2_ref : (3, 3*Cmid, Cout)     conv2 weight
    b2_ref : (1, Cout)             conv2 bias (f32)
    o_ref  : (1, H, W, Cout)       output tile (VMEM)
    xpad_ref : (H+2, W+2, Cin)  f32 scratch -- zero 'same' halo built in-kernel
    mid_ref  : (H+2, W+2, Cmid) f32 scratch -- padded intermediate, never touches HBM
    """
    _, H, W, Cout = o_ref.shape
    Cin = x_ref.shape[-1]
    Cmid = mid_ref.shape[-1]

    # In-kernel zero padding (no wrapper-side jnp.pad / extra HBM pass of the input).
    xpad_ref[...] = jnp.zeros_like(xpad_ref)
    xpad_ref[1:H + 1, 1:W + 1, :] = x_ref[0]
    mid_ref[...] = jnp.zeros_like(mid_ref)

    def conv3x3_bias_relu(src_ref, w_ref, b_ref, cin):
        """src_ref: (H+2, W+2, cin) padded; w_ref: (3, 3*cin, cout) -> (H*W, cout) f32."""
        cout = w_ref.shape[-1]
        acc = jnp.zeros((H * W, cout), dtype=jnp.float32)
        for kh in range(3):
            # Widen the contraction: concat the 3 kw taps on the channel (lane) axis
            # -> one K = 3*cin matmul per kh instead of three K = cin matmuls.
            taps = [src_ref[kh:kh + H, kw:kw + W, :].reshape(H * W, cin)
                    for kw in range(3)]
            patch = jnp.concatenate(taps, axis=-1).astype(w_ref.dtype)
            acc = acc + jnp.dot(patch, w_ref[kh],
                                preferred_element_type=jnp.float32)
        # Bias + ReLU in f32 on the VPU.
        return jnp.maximum(acc + b_ref[...], 0.0)

    # conv1 -> padded intermediate kept in VMEM (fused; no HBM write/read of `mid`).
    mid = conv3x3_bias_relu(xpad_ref, w1_ref, b1_ref, Cin)
    mid_ref[1:H + 1, 1:W + 1, :] = mid.reshape(H, W, Cmid)

    # conv2 straight out of the VMEM intermediate.
    out = conv3x3_bias_relu(mid_ref, w2_ref, b2_ref, Cmid)
    o_ref[...] = out.reshape(1, H, W, Cout).astype(o_ref.dtype)


def double_conv2d_nhwc(x_nhwc, params, matmul_dtype=jnp.bfloat16):
    """Fused DoubleConv2d (BN=False) on NHWC activations: (conv3x3 + bias -> ReLU) x 2.

    matmul_dtype: dtype fed to the MXU (accumulation is always f32). Use jnp.float32
    for bit-accurate f32 semantics; jnp.bfloat16 (default) for native MXU rate.
    """
    (w1, b1), (w2, b2) = params
    N, H, W, Cin = x_nhwc.shape
    Cmid = w1.shape[-1]
    Cout = w2.shape[-1]
    Hp, Wp = H + 2, W + 2

    # One-time weight prep (outside the kernel): fold kw into the contraction axis and
    # pre-cast to the MXU input dtype so the grid-invariant weight blocks stay
    # VMEM-resident in half the bytes. Bias stays f32.
    w1r = w1.reshape(3, 3 * Cin, Cmid).astype(matmul_dtype)
    w2r = w2.reshape(3, 3 * Cmid, Cout).astype(matmul_dtype)
    b1r = b1.reshape(1, Cmid).astype(jnp.float32)
    b2r = b2.reshape(1, Cout).astype(jnp.float32)

    return pl.pallas_call(
        _double_conv_kernel,
        out_shape=jax.ShapeDtypeStruct((N, H, W, Cout), x_nhwc.dtype),
        grid_spec=pltpu.PrefetchScalarGridSpec(
            num_scalar_prefetch=0,
            grid=(N,),
            in_specs=[
                pl.BlockSpec((1, H, W, Cin), lambda n: (n, 0, 0, 0)),
                # Grid-invariant index maps: weights/bias DMA'd once, stay resident.
                pl.BlockSpec((3, 3 * Cin, Cmid), lambda n: (0, 0, 0)),
                pl.BlockSpec((1, Cmid), lambda n: (0, 0)),
                pl.BlockSpec((3, 3 * Cmid, Cout), lambda n: (0, 0, 0)),
                pl.BlockSpec((1, Cout), lambda n: (0, 0)),
            ],
            out_specs=pl.BlockSpec((1, H, W, Cout), lambda n: (n, 0, 0, 0)),
            scratch_shapes=[
                pltpu.VMEM((Hp, Wp, Cin), jnp.float32),   # padded input
                pltpu.VMEM((Hp, Wp, Cmid), jnp.float32),  # padded fused intermediate
            ],
        ),
        compiler_params=pltpu.CompilerParams(
            dimension_semantics=("parallel",),
            vmem_limit_bytes=32 * 1024 * 1024,
        ),
    )(x_nhwc, w1r, b1r, w2r, b2r)


def double_conv2d(x_nchw, params, matmul_dtype=jnp.bfloat16):
    """PyTorch-layout entry point: (N, Cin, H, W) -> (N, Cout, H, W).

    In an NHWC end-to-end pipeline call double_conv2d_nhwc directly and drop both
    transposes (each is a whole-tensor HBM pass done by XLA outside the kernel).
    """
    x = jnp.transpose(x_nchw, (0, 2, 3, 1))       # NCHW -> NHWC
    y = double_conv2d_nhwc(x, params, matmul_dtype=matmul_dtype)
    return jnp.transpose(y, (0, 3, 1, 2))         # NHWC -> NCHW


def init_double_conv_params(key, in_channels, out_channels, mid_channels=None,
                            kernel_size=3):
    """Deterministic synthetic init mimicking PyTorch Conv2d default (kaiming-uniform-ish)."""
    if mid_channels is None:
        mid_channels = out_channels
    k1, k2, k3, k4 = jax.random.split(key, 4)

    def conv_init(kw, kb, cin, cout):
        fan_in = cin * kernel_size * kernel_size
        bound = 1.0 / jnp.sqrt(fan_in)
        # stored HWIO: (kh, kw, cin, cout)
        w = jax.random.uniform(kw, (kernel_size, kernel_size, cin, cout),
                               jnp.float32, -bound, bound)
        b = jax.random.uniform(kb, (cout,), jnp.float32, -bound, bound)
        return w, b

    w1, b1 = conv_init(k1, k2, in_channels, mid_channels)
    w2, b2 = conv_init(k3, k4, in_channels if False else mid_channels, out_channels)
    return (w1, b1), (w2, b2)


if __name__ == "__main__":
    key = jax.random.PRNGKey(0)
    kx, kp = jax.random.split(key)

    N, Cin, H, W = 2, 4, 16, 16
    Cout = 8
    x = jax.random.normal(kx, (N, Cin, H, W), dtype=jnp.float32)
    params = init_double_conv_params(kp, Cin, Cout)

    # Default (bf16-MXU, f32-accumulate) path.
    out = jax.block_until_ready(double_conv2d(x, params))
    assert out.shape == (N, Cout, H, W), out.shape
    assert out.dtype == jnp.float32
    assert bool(jnp.all(out >= 0.0))              # ReLU output must be non-negative

    # Pure-JAX f32 reference.
    (w1, b1), (w2, b2) = params
    xn = jnp.transpose(x, (0, 2, 3, 1))
    ref = jax.lax.conv_general_dilated(
        xn, w1, (1, 1), "SAME", dimension_numbers=("NHWC", "HWIO", "NHWC"),
        precision=jax.lax.Precision.HIGHEST)
    ref = jnp.maximum(ref + b1, 0.0)
    ref = jax.lax.conv_general_dilated(
        ref, w2, (1, 1), "SAME", dimension_numbers=("NHWC", "HWIO", "NHWC"),
        precision=jax.lax.Precision.HIGHEST)
    ref = jnp.maximum(ref + b2, 0.0)
    ref = jnp.transpose(ref, (0, 3, 1, 2))

    # bf16 MXU inputs with f32 accumulation -> loosened tolerance (per review note).
    assert bool(jnp.allclose(out, ref, atol=3e-2, rtol=3e-2))

    # Structural/exactness check: same fused kernel with f32 matmuls, tight tolerance.
    out_f32 = jax.block_until_ready(
        double_conv2d(x, params, matmul_dtype=jnp.float32))
    assert bool(jnp.allclose(out_f32, ref, atol=1e-4, rtol=1e-4))

    print("KERNEL_OK")
</pallas_src>

<mosaic_0001>
module attributes {stable_mosaic.version = 11 : i64} {
  func.func @_double_conv_kernel(%arg0: i32, %arg1: memref<1x16x16x4xf32, #tpu.memory_space<vmem>>, %arg2: memref<3x12x8xbf16, #tpu.memory_space<vmem>>, %arg3: memref<1x8xf32, #tpu.memory_space<vmem>>, %arg4: memref<3x24x8xbf16, #tpu.memory_space<vmem>>, %arg5: memref<1x8xf32, #tpu.memory_space<vmem>>, %arg6: memref<1x16x16x8xf32, #tpu.memory_space<vmem>>, %arg7: memref<18x18x4xf32, #tpu.memory_space<vmem>>, %arg8: memref<18x18x8xf32, #tpu.memory_space<vmem>>) attributes {dimension_semantics = [#tpu.dimension_semantics<parallel>], iteration_bounds = array<i64: 2>, scalar_prefetch = 0 : i64, scratch_operands = 2 : i64, tpu.core_type = #tpu.core_type<tc>, window_params = [{transform_indices = @transform_0, window_bounds = array<i64: 1, 16, 16, 4>}, {pipeline_mode = #tpu.pipeline_mode<synchronous>, transform_indices = @transform_1, window_bounds = array<i64: 3, 12, 8>}, {pipeline_mode = #tpu.pipeline_mode<synchronous>, transform_indices = @transform_2, window_bounds = array<i64: 1, 8>}, {pipeline_mode = #tpu.pipeline_mode<synchronous>, transform_indices = @transform_3, window_bounds = array<i64: 3, 24, 8>}, {pipeline_mode = #tpu.pipeline_mode<synchronous>, transform_indices = @transform_4, window_bounds = array<i64: 1, 8>}, {transform_indices = @transform_5, window_bounds = array<i64: 1, 16, 16, 8>}]} {
    %cst = arith.constant 0.000000e+00 : f32
    %0 = vector.broadcast %cst : f32 to vector<18x18x4xf32>
    %c0 = arith.constant 0 : index
    %c0_0 = arith.constant 0 : index
    %c0_1 = arith.constant 0 : index
    %1 = vector.load %arg7[%c0, %c0_0, %c0_1] : memref<18x18x4xf32, #tpu.memory_space<vmem>>, vector<18x18x4xf32>
    tpu.vector_store %arg7[%c0, %c0_0, %c0_1], %0 {strides = array<i32>} : memref<18x18x4xf32, #tpu.memory_space<vmem>>, vector<18x18x4xf32>,
    %c0_2 = arith.constant 0 : index
    %c0_3 = arith.constant 0 : index
    %c0_4 = arith.constant 0 : index
    %c0_5 = arith.constant 0 : index
    %2 = vector.load %arg1[%c0_2, %c0_3, %c0_4, %c0_5] : memref<1x16x16x4xf32, #tpu.memory_space<vmem>>, vector<1x16x16x4xf32>
    %3 = vector.shape_cast %2 : vector<1x16x16x4xf32> to vector<16x16x4xf32>
    %c1 = arith.constant 1 : index
    %c1_6 = arith.constant 1 : index
    %c0_7 = arith.constant 0 : index
    %4 = vector.load %arg7[%c1, %c1_6, %c0_7] : memref<18x18x4xf32, #tpu.memory_space<vmem>>, vector<16x16x4xf32>
    tpu.vector_store %arg7[%c1, %c1_6, %c0_7], %3 {strides = array<i32>} : memref<18x18x4xf32, #tpu.memory_space<vmem>>, vector<16x16x4xf32>,
    %cst_8 = arith.constant 0.000000e+00 : f32
    %5 = vector.broadcast %cst_8 : f32 to vector<18x18x8xf32>
    %c0_9 = arith.constant 0 : index
    %c0_10 = arith.constant 0 : index
    %c0_11 = arith.constant 0 : index
    %6 = vector.load %arg8[%c0_9, %c0_10, %c0_11] : memref<18x18x8xf32, #tpu.memory_space<vmem>>, vector<18x18x8xf32>
    tpu.vector_store %arg8[%c0_9, %c0_10, %c0_11], %5 {strides = array<i32>} : memref<18x18x8xf32, #tpu.memory_space<vmem>>, vector<18x18x8xf32>,
    %cst_12 = arith.constant 0.000000e+00 : f32
    %7 = vector.broadcast %cst_12 : f32 to vector<256x8xf32>
    %c0_13 = arith.constant 0 : index
    %c0_14 = arith.constant 0 : index
    %c0_15 = arith.constant 0 : index
    %8 = vector.load %arg7[%c0_13, %c0_14, %c0_15] : memref<18x18x4xf32, #tpu.memory_space<vmem>>, vector<16x16x4xf32>
    %9 = vector.shape_cast %8 : vector<16x16x4xf32> to vector<256x4xf32>
    %c0_16 = arith.constant 0 : index
    %c1_17 = arith.constant 1 : index
    %c0_18 = arith.constant 0 : index
    %10 = vector.load %arg7[%c0_16, %c1_17, %c0_18] : memref<18x18x4xf32, #tpu.memory_space<vmem>>, vector<16x16x4xf32>
    %11 = vector.shape_cast %10 : vector<16x16x4xf32> to vector<256x4xf32>
    %c0_19 = arith.constant 0 : index
    %c2 = arith.constant 2 : index
    %c0_20 = arith.constant 0 : index
    %12 = vector.load %arg7[%c0_19, %c2, %c0_20] : memref<18x18x4xf32, #tpu.memory_space<vmem>>, vector<16x16x4xf32>
    %13 = vector.shape_cast %12 : vector<16x16x4xf32> to vector<256x4xf32>
    %14 = tpu.concatenate %9, %11, %13 in 1 : vector<256x4xf32>, vector<256x4xf32>, vector<256x4xf32> -> vector<256x12xf32>
    %15 = arith.truncf %14 : vector<256x12xf32> to vector<256x12xbf16>
    %c0_21 = arith.constant 0 : index
    %c0_22 = arith.constant 0 : index
    %c0_23 = arith.constant 0 : index
    %16 = vector.load %arg2[%c0_21, %c0_22, %c0_23] : memref<3x12x8xbf16, #tpu.memory_space<vmem>>, vector<1x12x8xbf16>
    %17 = vector.shape_cast %16 : vector<1x12x8xbf16> to vector<12x8xbf16>
    %cst_24 = arith.constant dense<0.000000e+00> : vector<256x8xf32>
    %18 = tpu.matmul %15, %17, %cst_24 {dimension_numbers = #tpu.dot_dimension_numbers<[1], [0], [0], [1], [0, 0, 1, 1], [], []>} : vector<256x12xbf16>, vector<12x8xbf16>, vector<256x8xf32> -> vector<256x8xf32>
    %19 = arith.addf %7, %18 : vector<256x8xf32>
    %c1_25 = arith.constant 1 : index
    %c0_26 = arith.constant 0 : index
    %c0_27 = arith.constant 0 : index
    %20 = vector.load %arg7[%c1_25, %c0_26, %c0_27] : memref<18x18x4xf32, #tpu.memory_space<vmem>>, vector<16x16x4xf32>
    %21 = vector.shape_cast %20 : vector<16x16x4xf32> to vector<256x4xf32>
    %c1_28 = arith.constant 1 : index
    %c1_29 = arith.constant 1 : index
    %c0_30 = arith.constant 0 : index
    %22 = vector.load %arg7[%c1_28, %c1_29, %c0_30] : memref<18x18x4xf32, #tpu.memory_space<vmem>>, vector<16x16x4xf32>
    %23 = vector.shape_cast %22 : vector<16x16x4xf32> to vector<256x4xf32>
    %c1_31 = arith.constant 1 : index
    %c2_32 = arith.constant 2 : index
    %c0_33 = arith.constant 0 : index
    %24 = vector.load %arg7[%c1_31, %c2_32, %c0_33] : memref<18x18x4xf32, #tpu.memory_space<vmem>>, vector<16x16x4xf32>
    %25 = vector.shape_cast %24 : vector<16x16x4xf32> to vector<256x4xf32>
    %26 = tpu.concatenate %21, %23, %25 in 1 : vector<256x4xf32>, vector<256x4xf32>, vector<256x4xf32> -> vector<256x12xf32>
    %27 = arith.truncf %26 : vector<256x12xf32> to vector<256x12xbf16>
    %c1_34 = arith.constant 1 : index
    %c0_35 = arith.constant 0 : index
    %c0_36 = arith.constant 0 : index
    %28 = vector.load %arg2[%c1_34, %c0_35, %c0_36] : memref<3x12x8xbf16, #tpu.memory_space<vmem>>, vector<1x12x8xbf16>
    %29 = vector.shape_cast %28 : vector<1x12x8xbf16> to vector<12x8xbf16>
    %cst_37 = arith.constant dense<0.000000e+00> : vector<256x8xf32>
    %30 = tpu.matmul %27, %29, %cst_37 {dimension_numbers = #tpu.dot_dimension_numbers<[1], [0], [0], [1], [0, 0, 1, 1], [], []>} : vector<256x12xbf16>, vector<12x8xbf16>, vector<256x8xf32> -> vector<256x8xf32>
    %31 = arith.addf %19, %30 : vector<256x8xf32>
    %c2_38 = arith.constant 2 : index
    %c0_39 = arith.constant 0 : index
    %c0_40 = arith.constant 0 : index
    %32 = vector.load %arg7[%c2_38, %c0_39, %c0_40] : memref<18x18x4xf32, #tpu.memory_space<vmem>>, vector<16x16x4xf32>
    %33 = vector.shape_cast %32 : vector<16x16x4xf32> to vector<256x4xf32>
    %c2_41 = arith.constant 2 : index
    %c1_42 = arith.constant 1 : index
    %c0_43 = arith.constant 0 : index
    %34 = vector.load %arg7[%c2_41, %c1_42, %c0_43] : memref<18x18x4xf32, #tpu.memory_space<vmem>>, vector<16x16x4xf32>
    %35 = vector.shape_cast %34 : vector<16x16x4xf32> to vector<256x4xf32>
    %c2_44 = arith.constant 2 : index
    %c2_45 = arith.constant 2 : index
    %c0_46 = arith.constant 0 : index
    %36 = vector.load %arg7[%c2_44, %c2_45, %c0_46] : memref<18x18x4xf32, #tpu.memory_space<vmem>>, vector<16x16x4xf32>
    %37 = vector.shape_cast %36 : vector<16x16x4xf32> to vector<256x4xf32>
    %38 = tpu.concatenate %33, %35, %37 in 1 : vector<256x4xf32>, vector<256x4xf32>, vector<256x4xf32> -> vector<256x12xf32>
    %39 = arith.truncf %38 : vector<256x12xf32> to vector<256x12xbf16>
    %c2_47 = arith.constant 2 : index
    %c0_48 = arith.constant 0 : index
    %c0_49 = arith.constant 0 : index
    %40 = vector.load %arg2[%c2_47, %c0_48, %c0_49] : memref<3x12x8xbf16, #tpu.memory_space<vmem>>, vector<1x12x8xbf16>
    %41 = vector.shape_cast %40 : vector<1x12x8xbf16> to vector<12x8xbf16>
    %cst_50 = arith.constant dense<0.000000e+00> : vector<256x8xf32>
    %42 = tpu.matmul %39, %41, %cst_50 {dimension_numbers = #tpu.dot_dimension_numbers<[1], [0], [0], [1], [0, 0, 1, 1], [], []>} : vector<256x12xbf16>, vector<12x8xbf16>, vector<256x8xf32> -> vector<256x8xf32>
    %43 = arith.addf %31, %42 : vector<256x8xf32>
    %c0_51 = arith.constant 0 : index
    %c0_52 = arith.constant 0 : index
    %44 = vector.load %arg3[%c0_51, %c0_52] : memref<1x8xf32, #tpu.memory_space<vmem>>, vector<1x8xf32>
    %45 = vector.broadcast %44 : vector<1x8xf32> to vector<256x8xf32>
    %46 = arith.addf %43, %45 : vector<256x8xf32>
    %cst_53 = arith.constant 0.000000e+00 : f32
    %47 = vector.broadcast %cst_53 : f32 to vector<256x8xf32>
    %48 = arith.maximumf %46, %47 : vector<256x8xf32>
    %49 = vector.shape_cast %48 : vector<256x8xf32> to vector<16x16x8xf32>
    %c1_54 = arith.constant 1 : index
    %c1_55 = arith.constant 1 : index
    %c0_56 = arith.constant 0 : index
    %50 = vector.load %arg8[%c1_54, %c1_55, %c0_56] : memref<18x18x8xf32, #tpu.memory_space<vmem>>, vector<16x16x8xf32>
    tpu.vector_store %arg8[%c1_54, %c1_55, %c0_56], %49 {strides = array<i32>} : memref<18x18x8xf32, #tpu.memory_space<vmem>>, vector<16x16x8xf32>,
    %cst_57 = arith.constant 0.000000e+00 : f32
    %51 = vector.broadcast %cst_57 : f32 to vector<256x8xf32>
    %c0_58 = arith.constant 0 : index
    %c0_59 = arith.constant 0 : index
    %c0_60 = arith.constant 0 : index
    %52 = vector.load %arg8[%c0_58, %c0_59, %c0_60] : memref<18x18x8xf32, #tpu.memory_space<vmem>>, vector<16x16x8xf32>
    %53 = vector.shape_cast %52 : vector<16x16x8xf32> to vector<256x8xf32>
    %c0_61 = arith.constant 0 : index
    %c1_62 = arith.constant 1 : index
    %c0_63 = arith.constant 0 : index
    %54 = vector.load %arg8[%c0_61, %c1_62, %c0_63] : memref<18x18x8xf32, #tpu.memory_space<vmem>>, vector<16x16x8xf32>
    %55 = vector.shape_cast %54 : vector<16x16x8xf32> to vector<256x8xf32>
    %c0_64 = arith.constant 0 : index
    %c2_65 = arith.constant 2 : index
    %c0_66 = arith.constant 0 : index
    %56 = vector.load %arg8[%c0_64, %c2_65, %c0_66] : memref<18x18x8xf32, #tpu.memory_space<vmem>>, vector<16x16x8xf32>
    %57 = vector.shape_cast %56 : vector<16x16x8xf32> to vector<256x8xf32>
    %58 = tpu.concatenate %53, %55, %57 in 1 : vector<256x8xf32>, vector<256x8xf32>, vector<256x8xf32> -> vector<256x24xf32>
    %59 = arith.truncf %58 : vector<256x24xf32> to vector<256x24xbf16>
    %c0_67 = arith.constant 0 : index
    %c0_68 = arith.constant 0 : index
    %c0_69 = arith.constant 0 : index
    %60 = vector.load %arg4[%c0_67, %c0_68, %c0_69] : memref<3x24x8xbf16, #tpu.memory_space<vmem>>, vector<1x24x8xbf16>
    %61 = vector.shape_cast %60 : vector<1x24x8xbf16> to vector<24x8xbf16>
    %cst_70 = arith.constant dense<0.000000e+00> : vector<256x8xf32>
    %62 = tpu.matmul %59, %61, %cst_70 {dimension_numbers = #tpu.dot_dimension_numbers<[1], [0], [0], [1], [0, 0, 1, 1], [], []>} : vector<256x24xbf16>, vector<24x8xbf16>, vector<256x8xf32> -> vector<256x8xf32>
    %63 = arith.addf %51, %62 : vector<256x8xf32>
    %c1_71 = arith.constant 1 : index
    %c0_72 = arith.constant 0 : index
    %c0_73 = arith.constant 0 : index
    %64 = vector.load %arg8[%c1_71, %c0_72, %c0_73] : memref<18x18x8xf32, #tpu.memory_space<vmem>>, vector<16x16x8xf32>
    %65 = vector.shape_cast %64 : vector<16x16x8xf32> to vector<256x8xf32>
    %c1_74 = arith.constant 1 : index
    %c1_75 = arith.constant 1 : index
    %c0_76 = arith.constant 0 : index
    %66 = vector.load %arg8[%c1_74, %c1_75, %c0_76] : memref<18x18x8xf32, #tpu.memory_space<vmem>>, vector<16x16x8xf32>
    %67 = vector.shape_cast %66 : vector<16x16x8xf32> to vector<256x8xf32>
    %c1_77 = arith.constant 1 : index
    %c2_78 = arith.constant 2 : index
    %c0_79 = arith.constant 0 : index
    %68 = vector.load %arg8[%c1_77, %c2_78, %c0_79] : memref<18x18x8xf32, #tpu.memory_space<vmem>>, vector<16x16x8xf32>
    %69 = vector.shape_cast %68 : vector<16x16x8xf32> to vector<256x8xf32>
    %70 = tpu.concatenate %65, %67, %69 in 1 : vector<256x8xf32>, vector<256x8xf32>, vector<256x8xf32> -> vector<256x24xf32>
    %71 = arith.truncf %70 : vector<256x24xf32> to vector<256x24xbf16>
    %c1_80 = arith.constant 1 : index
    %c0_81 = arith.constant 0 : index
    %c0_82 = arith.constant 0 : index
    %72 = vector.load %arg4[%c1_80, %c0_81, %c0_82] : memref<3x24x8xbf16, #tpu.memory_space<vmem>>, vector<1x24x8xbf16>
    %73 = vector.shape_cast %72 : vector<1x24x8xbf16> to vector<24x8xbf16>
    %cst_83 = arith.constant dense<0.000000e+00> : vector<256x8xf32>
    %74 = tpu.matmul %71, %73, %cst_83 {dimension_numbers = #tpu.dot_dimension_numbers<[1], [0], [0], [1], [0, 0, 1, 1], [], []>} : vector<256x24xbf16>, vector<24x8xbf16>, vector<256x8xf32> -> vector<256x8xf32>
    %75 = arith.addf %63, %74 : vector<256x8xf32>
    %c2_84 = arith.constant 2 : index
    %c0_85 = arith.constant 0 : index
    %c0_86 = arith.constant 0 : index
    %76 = vector.load %arg8[%c2_84, %c0_85, %c0_86] : memref<18x18x8xf32, #tpu.memory_space<vmem>>, vector<16x16x8xf32>
    %77 = vector.shape_cast %76 : vector<16x16x8xf32> to vector<256x8xf32>
    %c2_87 = arith.constant 2 : index
    %c1_88 = arith.constant 1 : index
    %c0_89 = arith.constant 0 : index
    %78 = vector.load %arg8[%c2_87, %c1_88, %c0_89] : memref<18x18x8xf32, #tpu.memory_space<vmem>>, vector<16x16x8xf32>
    %79 = vector.shape_cast %78 : vector<16x16x8xf32> to vector<256x8xf32>
    %c2_90 = arith.constant 2 : index
    %c2_91 = arith.constant 2 : index
    %c0_92 = arith.constant 0 : index
    %80 = vector.load %arg8[%c2_90, %c2_91, %c0_92] : memref<18x18x8xf32, #tpu.memory_space<vmem>>, vector<16x16x8xf32>
    %81 = vector.shape_cast %80 : vector<16x16x8xf32> to vector<256x8xf32>
    %82 = tpu.concatenate %77, %79, %81 in 1 : vector<256x8xf32>, vector<256x8xf32>, vector<256x8xf32> -> vector<256x24xf32>
    %83 = arith.truncf %82 : vector<256x24xf32> to vector<256x24xbf16>
    %c2_93 = arith.constant 2 : index
    %c0_94 = arith.constant 0 : index
    %c0_95 = arith.constant 0 : index
    %84 = vector.load %arg4[%c2_93, %c0_94, %c0_95] : memref<3x24x8xbf16, #tpu.memory_space<vmem>>, vector<1x24x8xbf16>
    %85 = vector.shape_cast %84 : vector<1x24x8xbf16> to vector<24x8xbf16>
    %cst_96 = arith.constant dense<0.000000e+00> : vector<256x8xf32>
    %86 = tpu.matmul %83, %85, %cst_96 {dimension_numbers = #tpu.dot_dimension_numbers<[1], [0], [0], [1], [0, 0, 1, 1], [], []>} : vector<256x24xbf16>, vector<24x8xbf16>, vector<256x8xf32> -> vector<256x8xf32>
    %87 = arith.addf %75, %86 : vector<256x8xf32>
    %c0_97 = arith.constant 0 : index
    %c0_98 = arith.constant 0 : index
    %88 = vector.load %arg5[%c0_97, %c0_98] : memref<1x8xf32, #tpu.memory_space<vmem>>, vector<1x8xf32>
    %89 = vector.broadcast %88 : vector<1x8xf32> to vector<256x8xf32>
    %90 = arith.addf %87, %89 : vector<256x8xf32>
    %cst_99 = arith.constant 0.000000e+00 : f32
    %91 = vector.broadcast %cst_99 : f32 to vector<256x8xf32>
    %92 = arith.maximumf %90, %91 : vector<256x8xf32>
    %93 = vector.shape_cast %92 : vector<256x8xf32> to vector<1x16x16x8xf32>
    %c0_100 = arith.constant 0 : index
    %c0_101 = arith.constant 0 : index
    %c0_102 = arith.constant 0 : index
    %c0_103 = arith.constant 0 : index
    %94 = vector.load %arg6[%c0_100, %c0_101, %c0_102, %c0_103] : memref<1x16x16x8xf32, #tpu.memory_space<vmem>>, vector<1x16x16x8xf32>
    tpu.vector_store %arg6[%c0_100, %c0_101, %c0_102, %c0_103], %93 {strides = array<i32>} : memref<1x16x16x8xf32, #tpu.memory_space<vmem>>, vector<1x16x16x8xf32>,
    return
  }
  func.func @transform_0(%arg0: i32) -> (i32, i32, i32, i32) {
    %c0_i32 = arith.constant 0 : i32
    %c0_i32_0 = arith.constant 0 : i32
    %c0_i32_1 = arith.constant 0 : i32
    %c0_i32_2 = arith.constant 0 : i32
    return %arg0, %c0_i32, %c0_i32_0, %c0_i32_1 : i32, i32, i32, i32
  }
  func.func @transform_1(%arg0: i32) -> (i32, i32, i32) {
    %c0_i32 = arith.constant 0 : i32
    %c0_i32_0 = arith.constant 0 : i32
    %c0_i32_1 = arith.constant 0 : i32
    %c0_i32_2 = arith.constant 0 : i32
    return %c0_i32, %c0_i32_0, %c0_i32_1 : i32, i32, i32
  }
  func.func @transform_2(%arg0: i32) -> (i32, i32) {
    %c0_i32 = arith.constant 0 : i32
    %c0_i32_0 = arith.constant 0 : i32
    %c0_i32_1 = arith.constant 0 : i32
    return %c0_i32, %c0_i32_0 : i32, i32
  }
  func.func @transform_3(%arg0: i32) -> (i32, i32, i32) {
    %c0_i32 = arith.constant 0 : i32
    %c0_i32_0 = arith.constant 0 : i32
    %c0_i32_1 = arith.constant 0 : i32
    %c0_i32_2 = arith.constant 0 : i32
    return %c0_i32, %c0_i32_0, %c0_i32_1 : i32, i32, i32
  }
  func.func @transform_4(%arg0: i32) -> (i32, i32) {
    %c0_i32 = arith.constant 0 : i32
    %c0_i32_0 = arith.constant 0 : i32
    %c0_i32_1 = arith.constant 0 : i32
    return %c0_i32, %c0_i32_0 : i32, i32
  }
  func.func @transform_5(%arg0: i32) -> (i32, i32, i32, i32) {
    %c0_i32 = arith.constant 0 : i32
    %c0_i32_0 = arith.constant 0 : i32
    %c0_i32_1 = arith.constant 0 : i32
    %c0_i32_2 = arith.constant 0 : i32
    return %arg0, %c0_i32, %c0_i32_0, %c0_i32_1 : i32, i32, i32, i32
  }
}

</mosaic_0001>

<bundles_post_ra>
// kernel: tpu_custom_call.1
= control target key start
LH: loop header
LB: loop body
LE: loop exit
PB: predicated region body
PF: predicated region fallthrough
CT: control target
= control target key end

     0   :  { %s6135_s18 = smov 0   ;;  %s8207_s0 = inlined_call_operand.vmem [shape: f32[2,16,16,4], index: 0, kind: input, shape index: {}]   ;;  %s8208_s1 = inlined_call_operand.vmem [shape: bf16[3,12,8], index: 1, kind: input, shape index: {}]   ;;  %s8209_s2 = inlined_call_operand.vmem [shape: f32[1,8], index: 2, kind: input, shape index: {}]   ;;  %s8210_s3 = inlined_call_operand.vmem [shape: bf16[3,24,8], index: 3, kind: input, shape index: {}]   ;;  %s8211_s4 = inlined_call_operand.vmem [shape: f32[1,8], index: 4, kind: input, shape index: {}]   ;;  %s8212_s5 = inlined_call_operand.vmem [shape: f32[2,16,16,8], index: 5, kind: output, shape index: {}]  }
   0x1 LB: > { %s4661_s19 = sadd.s32 4294967295, %s6099_s18   ;;  %p4665_p0 = scmp.ge.s32.totalorder %s6099_s18, 1  ;;  %s6099_s18 = sphi %s6135_s18, %s15_s18  }
   0x2   : > { %p187_p1 = scmp.lt.s32.totalorder %s6099_s18, 3 }
   0x4   : > { %p188_p2 = pnand %p4665_p0, %p187_p1 }
   0x6   : > { %191 = sbr.rel (%p188_p2) target bundleno = 989 (0x3dd), region = 40 }
   0xb   : > { %vm226_vm0 = vcmask 31744   ;;  %vm229_vm1 = vcmask 25600   ;;  %p6145_p3 = scmp.lt.s32.totalorder %s4661_s19, 1  ;;  %v8213_v0 = vmov 0.0   ;;  %s6102_s25 = smov 4   ;;  %vm347_vm2 = vcmask 64512  }
   0xc   : > { %227 = vst.msk [vmem:[#allocation2] sm:$0xff] %vm226_vm0, %v8213_v0  ;;  %228 = vst.msk [vmem:[#allocation2 + $0x8] sm:$0xff] %vm226_vm0, %v8213_v0  ;;  %s6103_s26 = smov 8   ;;  %vm1326_vm3 = vcmask 1045504   ;;  %vm1277_vm4 = vcmask 97280   ;;  %vm350_vm5 = vcmask 58368  }
   0xd   : > { %230 = vst.msk [vmem:[#allocation2 + $0x10] sm:$0x3] %vm229_vm1, %v8213_v0  ;;  %233 = vst.msk [vmem:[#allocation2 + $0x28] sm:$0x3] %vm229_vm1, %v8213_v0  ;;  %s8221_s19 = smov (!%p6145_p3, %s4661_s19), 1  ;;  %s6104_s8 = smov 16  }
   0xe   : > { %231 = vst.msk [vmem:[#allocation2 + $0x18] sm:$0xff] %vm226_vm0, %v8213_v0  ;;  %232 = vst.msk [vmem:[#allocation2 + $0x20] sm:$0xff] %vm226_vm0, %v8213_v0  ;;  %s4789_s21 = sshll.u32 %s8221_s19, 8  ;;  %vm2881_vm6 = vcmask 130048   ;;  %vm3378_vm7 = vcmask 195584   ;;  %vm3427_vm8 = vcmask 1043456  }
   0xf   : > { %234 = vst.msk [vmem:[#allocation2 + $0x30] sm:$0xff] %vm226_vm0, %v8213_v0  ;;  %235 = vst.msk [vmem:[#allocation2 + $0x38] sm:$0xff] %vm226_vm0, %v8213_v0  ;;  %s6269_s24 = scalar_lea.vmem %s8207_s0, %s4789_s21  ;;  %s8069_s30 = scalar_lea.vmem %s8212_s5, %s4789_s21 }
  0x10   : > { %236 = vst.msk [vmem:[#allocation2 + $0x40] sm:$0x3] %vm229_vm1, %v8213_v0  ;;  %239 = vst.msk [vmem:[#allocation2 + $0x58] sm:$0x3] %vm229_vm1, %v8213_v0  ;;  %v284_v1 = vld [vmem:[%s6269_s24 + $0x10] sm:$0xff]  ;;  %v285_v2 = vld [vmem:[%s6269_s24 + $0x18] sm:$0xff] }
  0x11   : > { %237 = vst.msk [vmem:[#allocation2 + $0x48] sm:$0xff] %vm226_vm0, %v8213_v0  ;;  %238 = vst.msk [vmem:[#allocation2 + $0x50] sm:$0xff] %vm226_vm0, %v8213_v0  ;;  %v282_v3 = vld [vmem:[%s6269_s24] sm:$0xff]  ;;  %v283_v4 = vld [vmem:[%s6269_s24 + $0x8] sm:$0xff] }
  0x12   : > { %240 = vst.msk [vmem:[#allocation2 + $0x60] sm:$0xff] %vm226_vm0, %v8213_v0  ;;  %241 = vst.msk [vmem:[#allocation2 + $0x68] sm:$0xff] %vm226_vm0, %v8213_v0  ;;  %v286_v5 = vld [vmem:[%s6269_s24 + $0x20] sm:$0xff]  ;;  %v287_v6 = vld [vmem:[%s6269_s24 + $0x28] sm:$0xff] }
  0x13   : > { %242 = vst.msk [vmem:[#allocation2 + $0x70] sm:$0x3] %vm229_vm1, %v8213_v0  ;;  %245 = vst.msk [vmem:[#allocation2 + $0x88] sm:$0x3] %vm229_vm1, %v8213_v0  ;;  %v435_v7 = vld [vmem:[#allocation2 + $0x1] sm:$0xff]  ;;  %v288_v9 = vld [vmem:[%s6269_s24 + $0x30] sm:$0xff] }
  0x14   : > { %243 = vst.msk [vmem:[#allocation2 + $0x78] sm:$0xff] %vm226_vm0, %v8213_v0  ;;  %244 = vst.msk [vmem:[#allocation2 + $0x80] sm:$0xff] %vm226_vm0, %v8213_v0  ;;  %v436_v8 = vld [vmem:[#allocation2 + $0x9] sm:$0xff]  ;;  %v289_v11 = vld [vmem:[%s6269_s24 + $0x38] sm:$0xff] }
  0x15   : > { %246 = vst.msk [vmem:[#allocation2 + $0x90] sm:$0xff] %vm226_vm0, %v8213_v0  ;;  %247 = vst.msk [vmem:[#allocation2 + $0x98] sm:$0xff] %vm226_vm0, %v8213_v0  ;;  %v5124_v10 = vpack.i.bf16 %v436_v8, %v435_v7  ;;  %v290_v12 = vld [vmem:[%s6269_s24 + $0x40] sm:$0xff]  ;;  %v291_v13 = vld [vmem:[%s6269_s24 + $0x48] sm:$0xff] }
  0x16   : > { %248 = vst.msk [vmem:[#allocation2 + $0xa0] sm:$0x3] %vm229_vm1, %v8213_v0  ;;  %251 = vst.msk [vmem:[#allocation2 + $0xb8] sm:$0x3] %vm229_vm1, %v8213_v0  ;;  %v292_v14 = vld [vmem:[%s6269_s24 + $0x50] sm:$0xff]  ;;  %v293_v15 = vld [vmem:[%s6269_s24 + $0x58] sm:$0xff] }
  0x17   : > { %249 = vst.msk [vmem:[#allocation2 + $0xa8] sm:$0xff] %vm226_vm0, %v8213_v0  ;;  %250 = vst.msk [vmem:[#allocation2 + $0xb0] sm:$0xff] %vm226_vm0, %v8213_v0  ;;  %v294_v16 = vld [vmem:[%s6269_s24 + $0x60] sm:$0xff]  ;;  %5125 = vrot.lane.b32.xlu0 %v5124_v10, %s6102_s25  ;;  %v295_v17 = vld [vmem:[%s6269_s24 + $0x68] sm:$0xff] }
  0x18   : > { %252 = vst.msk [vmem:[#allocation2 + $0xc0] sm:$0xff] %vm226_vm0, %v8213_v0  ;;  %253 = vst.msk [vmem:[#allocation2 + $0xc8] sm:$0xff] %vm226_vm0, %v8213_v0  ;;  %v296_v18 = vld [vmem:[%s6269_s24 + $0x70] sm:$0xff]  ;;  %v297_v19 = vld [vmem:[%s6269_s24 + $0x78] sm:$0xff] }
  0x19   : > { %254 = vst.msk [vmem:[#allocation2 + $0xd0] sm:$0x3] %vm229_vm1, %v8213_v0  ;;  %257 = vst.msk [vmem:[#allocation2 + $0xe8] sm:$0x3] %vm229_vm1, %v8213_v0  ;;  %v298_v20 = vld [vmem:[%s6269_s24 + $0x80] sm:$0xff]  ;;  %v299_v21 = vld [vmem:[%s6269_s24 + $0x88] sm:$0xff] }
  0x1a   : > { %255 = vst.msk [vmem:[#allocation2 + $0xd8] sm:$0xff] %vm226_vm0, %v8213_v0  ;;  %256 = vst.msk [vmem:[#allocation2 + $0xe0] sm:$0xff] %vm226_vm0, %v8213_v0  ;;  %v300_v22 = vld [vmem:[%s6269_s24 + $0x90] sm:$0xff]  ;;  %v301_v23 = vld [vmem:[%s6269_s24 + $0x98] sm:$0xff] }
  0x1b   : > { %258 = vst.msk [vmem:[#allocation2 + $0xf0] sm:$0xff] %vm226_vm0, %v8213_v0  ;;  %259 = vst.msk [vmem:[#allocation2 + $0xf8] sm:$0xff] %vm226_vm0, %v8213_v0  ;;  %v302_v24 = vld [vmem:[%s6269_s24 + $0xa0] sm:$0xff]  ;;  %v303_v25 = vld [vmem:[%s6269_s24 + $0xa8] sm:$0xff] }
  0x1c   : > { %260 = vst.msk [vmem:[#allocation2 + $0x100] sm:$0x3] %vm229_vm1, %v8213_v0  ;;  %263 = vst.msk [vmem:[#allocation2 + $0x118] sm:$0x3] %vm229_vm1, %v8213_v0  ;;  %v304_v52 = vld [vmem:[%s6269_s24 + $0xb0] sm:$0xff]  ;;  %v305_v53 = vld [vmem:[%s6269_s24 + $0xb8] sm:$0xff] }
  0x1d   : > { %261 = vst.msk [vmem:[#allocation2 + $0x108] sm:$0xff] %vm226_vm0, %v8213_v0  ;;  %262 = vst.msk [vmem:[#allocation2 + $0x110] sm:$0xff] %vm226_vm0, %v8213_v0  ;;  %v306_v57 = vld [vmem:[%s6269_s24 + $0xc0] sm:$0xff]  ;;  %v307_v58 = vld [vmem:[%s6269_s24 + $0xc8] sm:$0xff] }
  0x1e   : > { %264 = vst.msk [vmem:[#allocation2 + $0x120] sm:$0xff] %vm226_vm0, %v8213_v0  ;;  %265 = vst.msk [vmem:[#allocation2 + $0x128] sm:$0xff] %vm226_vm0, %v8213_v0  ;;  %v308_v59 = vld [vmem:[%s6269_s24 + $0xd0] sm:$0xff]  ;;  %v309_v60 = vld [vmem:[%s6269_s24 + $0xd8] sm:$0xff] }
  0x1f   : > { %266 = vst.msk [vmem:[#allocation2 + $0x130] sm:$0x3] %vm229_vm1, %v8213_v0  ;;  %269 = vst.msk [vmem:[#allocation2 + $0x148] sm:$0x3] %vm229_vm1, %v8213_v0  ;;  %v310_v61 = vld [vmem:[%s6269_s24 + $0xe0] sm:$0xff]  ;;  %v311_v62 = vld [vmem:[%s6269_s24 + $0xe8] sm:$0xff] }
  0x20   : > { %267 = vst.msk [vmem:[#allocation2 + $0x138] sm:$0xff] %vm226_vm0, %v8213_v0  ;;  %268 = vst.msk [vmem:[#allocation2 + $0x140] sm:$0xff] %vm226_vm0, %v8213_v0  ;;  %v312_v63 = vld [vmem:[%s6269_s24 + $0xf0] sm:$0xff] }
  0x21   : > { %270 = vst.msk [vmem:[#allocation2 + $0x150] sm:$0xff] %vm226_vm0, %v8213_v0  ;;  %271 = vst.msk [vmem:[#allocation2 + $0x158] sm:$0xff] %vm226_vm0, %v8213_v0 }
  0x22   : > { %272 = vst.msk [vmem:[#allocation2 + $0x160] sm:$0x3] %vm229_vm1, %v8213_v0  ;;  %275 = vst.msk [vmem:[#allocation2 + $0x178] sm:$0x3] %vm229_vm1, %v8213_v0 }
  0x23   : > { %273 = vst.msk [vmem:[#allocation2 + $0x168] sm:$0xff] %vm226_vm0, %v8213_v0  ;;  %274 = vst.msk [vmem:[#allocation2 + $0x170] sm:$0xff] %vm226_vm0, %v8213_v0 }
  0x24   : > { %276 = vst.msk [vmem:[#allocation2 + $0x180] sm:$0xff] %vm226_vm0, %v8213_v0  ;;  %277 = vst.msk [vmem:[#allocation2 + $0x188] sm:$0xff] %vm226_vm0, %v8213_v0 }
  0x25   : > { %278 = vst.msk [vmem:[#allocation2 + $0x190] sm:$0x3] %vm229_vm1, %v8213_v0  ;;  %281 = vst.msk [vmem:[#allocation2 + $0x1a8] sm:$0x3] %vm229_vm1, %v8213_v0 }
  0x26   : > { %279 = vst.msk [vmem:[#allocation2 + $0x198] sm:$0xff] %vm226_vm0, %v8213_v0  ;;  %280 = vst.msk [vmem:[#allocation2 + $0x1a0] sm:$0xff] %vm226_vm0, %v8213_v0 }
  0x27   : > { %317 = vst.msk [vmem:[#allocation2 + $0x31] sm:$0xff] %vm226_vm0, %v284_v1  ;;  %318 = vst.msk [vmem:[#allocation2 + $0x39] sm:$0xff] %vm226_vm0, %v285_v2  ;;  %v313_v1 = vld [vmem:[%s6269_s24 + $0xf8] sm:$0xff] }
  0x28   : > { %315 = vst.msk [vmem:[#allocation2 + $0x19] sm:$0xff] %vm226_vm0, %v282_v3  ;;  %316 = vst.msk [vmem:[#allocation2 + $0x21] sm:$0xff] %vm226_vm0, %v283_v4 }
  0x29   : > { %319 = vst.msk [vmem:[#allocation2 + $0x49] sm:$0xff] %vm226_vm0, %v286_v5  ;;  %320 = vst.msk [vmem:[#allocation2 + $0x51] sm:$0xff] %vm226_vm0, %v287_v6 }
  0x2a   : > { %321 = vst.msk [vmem:[#allocation2 + $0x61] sm:$0xff] %vm226_vm0, %v288_v9  ;;  %322 = vst.msk [vmem:[#allocation2 + $0x69] sm:$0xff] %vm226_vm0, %v289_v11 }
  0x2b   : > { %323 = vst.msk [vmem:[#allocation2 + $0x79] sm:$0xff] %vm226_vm0, %v290_v12  ;;  %324 = vst.msk [vmem:[#allocation2 + $0x81] sm:$0xff] %vm226_vm0, %v291_v13  ;;  %v6084_v12 = vld [vmem:[%s8208_s1 + $0x8] sm:$0x3f]   ;;  %v6085_v13 = vld [vmem:[%s8208_s1 + $0x10] sm:$0x3f]  }
  0x2c   : > { %325 = vst.msk [vmem:[#allocation2 + $0x91] sm:$0xff] %vm226_vm0, %v292_v14  ;;  %326 = vst.msk [vmem:[#allocation2 + $0x99] sm:$0xff] %vm226_vm0, %v293_v15  ;;  %5106 = vmatprep.subr.msk.bf16.mxu0 %vm1326_vm3, %v6084_v12 }
  0x2d   : > { %327 = vst.msk [vmem:[#allocation2 + $0xa9] sm:$0xff] %vm226_vm0, %v294_v16  ;;  %328 = vst.msk [vmem:[#allocation2 + $0xb1] sm:$0xff] %vm226_vm0, %v295_v17  ;;  %v1328_v16 = vsel %vm1326_vm3, %v6084_v12, 0  ;;  %v6475_v17 = vsel %vm1326_vm3, %v6085_v13, 0 }
  0x2e   : > { %329 = vst.msk [vmem:[#allocation2 + $0xc1] sm:$0xff] %vm226_vm0, %v296_v18  ;;  %330 = vst.msk [vmem:[#allocation2 + $0xc9] sm:$0xff] %vm226_vm0, %v297_v19  ;;  %v439_v26 = vld [vmem:[#allocation2 + $0x31] sm:$0xff]  ;;  %v440_v27 = vld [vmem:[#allocation2 + $0x39] sm:$0xff]  ;;  %4897 = vmatpush3.bf16.msra.mxu0 %v1328_v16 }
  0x2f   : > { %331 = vst.msk [vmem:[#allocation2 + $0xd9] sm:$0xff] %vm226_vm0, %v298_v20  ;;  %332 = vst.msk [vmem:[#allocation2 + $0xe1] sm:$0xff] %vm226_vm0, %v299_v21  ;;  %v437_v28 = vld [vmem:[#allocation2 + $0x19] sm:$0xff]  ;;  %v6316_v29 = vpack.i.bf16 %v440_v27, %v439_v26  ;;  %v438_v30 = vld [vmem:[#allocation2 + $0x21] sm:$0xff]  ;;  %5108 = vmatprep.subr.msk.bf16.mxu0 %vm1326_vm3, %v6085_v13 }
  0x30   : > { %333 = vst.msk [vmem:[#allocation2 + $0xf1] sm:$0xff] %vm226_vm0, %v300_v22  ;;  %334 = vst.msk [vmem:[#allocation2 + $0xf9] sm:$0xff] %vm226_vm0, %v301_v23  ;;  %v441_v31 = vld [vmem:[#allocation2 + $0x49] sm:$0xff]  ;;  %v442_v32 = vld [vmem:[#allocation2 + $0x51] sm:$0xff]  ;;  %v6318_v33 = vpack.i.bf16 %v438_v30, %v437_v28 }
  0x31   : > { %335 = vst.msk [vmem:[#allocation2 + $0x109] sm:$0xff] %vm226_vm0, %v302_v24  ;;  %336 = vst.msk [vmem:[#allocation2 + $0x111] sm:$0xff] %vm226_vm0, %v303_v25  ;;  %v443_v34 = vld [vmem:[#allocation2 + $0x61] sm:$0xff]  ;;  %5135 = vrot.lane.b32.xlu1 %v6316_v29, %s6102_s25  ;;  %v6322_v35 = vpack.i.bf16 %v442_v32, %v441_v31  ;;  %v444_v36 = vld [vmem:[#allocation2 + $0x69] sm:$0xff] }
  0x32   : > { %5130 = vrot.lane.b32.xlu0 %v6318_v33, %s6102_s25  ;;  %v6326_v37 = vpack.i.bf16 %v444_v36, %v443_v34  ;;  %v445_v38 = vld [vmem:[#allocation2 + $0x79] sm:$0xff]  ;;  %v446_v39 = vld [vmem:[#allocation2 + $0x81] sm:$0xff]  ;;  %348 = vst.msk [vmem:[#allocation3] sm:$0xff] %vm347_vm2, %v8213_v0  ;;  %349 = vst.msk [vmem:[#allocation3 + $0x8] sm:$0xff] %vm347_vm2, %v8213_v0 }
  0x33   : > { %v447_v40 = vld [vmem:[#allocation2 + $0x91] sm:$0xff]  ;;  %v448_v41 = vld [vmem:[#allocation2 + $0x99] sm:$0xff]  ;;  %v6330_v42 = vpack.i.bf16 %v446_v39, %v445_v38  ;;  %352 = vst.msk [vmem:[#allocation3 + $0x18] sm:$0xff] %vm347_vm2, %v8213_v0  ;;  %353 = vst.msk [vmem:[#allocation3 + $0x20] sm:$0xff] %vm347_vm2, %v8213_v0 }
  0x34   : > { %v6334_v43 = vpack.i.bf16 %v448_v41, %v447_v40  ;;  %v449_v44 = vld [vmem:[#allocation2 + $0xa9] sm:$0xff]  ;;  %v450_v45 = vld [vmem:[#allocation2 + $0xb1] sm:$0xff]  ;;  %355 = vst.msk [vmem:[#allocation3 + $0x30] sm:$0xff] %vm347_vm2, %v8213_v0  ;;  %356 = vst.msk [vmem:[#allocation3 + $0x38] sm:$0xff] %vm347_vm2, %v8213_v0 }
  0x35   : > { %5140 = vrot.lane.b32.xlu1 %v6322_v35, %s6102_s25  ;;  %v451_v46 = vld [vmem:[#allocation2 + $0xc1] sm:$0xff]  ;;  %v452_v47 = vld [vmem:[#allocation2 + $0xc9] sm:$0xff]  ;;  %v6338_v48 = vpack.i.bf16 %v450_v45, %v449_v44  ;;  %358 = vst.msk [vmem:[#allocation3 + $0x48] sm:$0xff] %vm347_vm2, %v8213_v0  ;;  %359 = vst.msk [vmem:[#allocation3 + $0x50] sm:$0xff] %vm347_vm2, %v8213_v0 }
  0x36   : > { %5145 = vrot.lane.b32.xlu0 %v6326_v37, %s6102_s25  ;;  %v6342_v49 = vpack.i.bf16 %v452_v47, %v451_v46  ;;  %v453_v50 = vld [vmem:[#allocation2 + $0xd9] sm:$0xff]  ;;  %v454_v51 = vld [vmem:[#allocation2 + $0xe1] sm:$0xff]  ;;  %361 = vst.msk [vmem:[#allocation3 + $0x60] sm:$0xff] %vm347_vm2, %v8213_v0  ;;  %362 = vst.msk [vmem:[#allocation3 + $0x68] sm:$0xff] %vm347_vm2, %v8213_v0 }
  0x37   : > { %364 = vst.msk [vmem:[#allocation3 + $0x78] sm:$0xff] %vm347_vm2, %v8213_v0  ;;  %365 = vst.msk [vmem:[#allocation3 + $0x80] sm:$0xff] %vm347_vm2, %v8213_v0  ;;  %v6420_v54 = vpack.i.bf16 %v454_v51, %v453_v50  ;;  %v901_v55 = vld [vmem:[#allocation2 + $0x1a] sm:$0xff]  ;;  %v902_v56 = vld [vmem:[#allocation2 + $0x22] sm:$0xff] }
  0x38   : > { %367 = vst.msk [vmem:[#allocation3 + $0x90] sm:$0xff] %vm347_vm2, %v8213_v0  ;;  %368 = vst.msk [vmem:[#allocation3 + $0x98] sm:$0xff] %vm347_vm2, %v8213_v0  ;;  %v6446_v2 = vpack.i.bf16 %v902_v56, %v901_v55  ;;  %v903_v3 = vld [vmem:[#allocation2 + $0x32] sm:$0xff]  ;;  %v904_v4 = vld [vmem:[#allocation2 + $0x3a] sm:$0xff] }
  0x39   : > { %5150 = vrot.lane.b32.xlu1 %v6330_v42, %s6102_s25  ;;  %370 = vst.msk [vmem:[#allocation3 + $0xa8] sm:$0xff] %vm347_vm2, %v8213_v0  ;;  %371 = vst.msk [vmem:[#allocation3 + $0xb0] sm:$0xff] %vm347_vm2, %v8213_v0  ;;  %v6450_v5 = vpack.i.bf16 %v904_v4, %v903_v3  ;;  %v905_v6 = vld [vmem:[#allocation2 + $0x4a] sm:$0xff]  ;;  %v906_v7 = vld [vmem:[#allocation2 + $0x52] sm:$0xff] }
  0x3a   : > { %5155 = vrot.lane.b32.xlu0 %v6334_v43, %s6102_s25  ;;  %373 = vst.msk [vmem:[#allocation3 + $0xc0] sm:$0xff] %vm347_vm2, %v8213_v0  ;;  %374 = vst.msk [vmem:[#allocation3 + $0xc8] sm:$0xff] %vm347_vm2, %v8213_v0  ;;  %v6458_v8 = vpack.i.bf16 %v906_v7, %v905_v6  ;;  %v907_v9 = vld [vmem:[#allocation2 + $0x62] sm:$0xff]  ;;  %v908_v10 = vld [vmem:[#allocation2 + $0x6a] sm:$0xff] }
  0x3b   : > { %376 = vst.msk [vmem:[#allocation3 + $0xd8] sm:$0xff] %vm347_vm2, %v8213_v0  ;;  %377 = vst.msk [vmem:[#allocation3 + $0xe0] sm:$0xff] %vm347_vm2, %v8213_v0  ;;  %v6462_v11 = vpack.i.bf16 %v908_v10, %v907_v9  ;;  %v909_v14 = vld [vmem:[#allocation2 + $0x7a] sm:$0xff]  ;;  %v910_v15 = vld [vmem:[#allocation2 + $0x82] sm:$0xff] }
  0x3c   : > { %379 = vst.msk [vmem:[#allocation3 + $0xf0] sm:$0xff] %vm347_vm2, %v8213_v0  ;;  %380 = vst.msk [vmem:[#allocation3 + $0xf8] sm:$0xff] %vm347_vm2, %v8213_v0  ;;  %v6482_v18 = vpack.i.bf16 %v910_v15, %v909_v14  ;;  %v911_v19 = vld [vmem:[#allocation2 + $0x92] sm:$0xff]  ;;  %v912_v20 = vld [vmem:[#allocation2 + $0x9a] sm:$0xff] }
  0x3d   : > { %382 = vst.msk [vmem:[#allocation3 + $0x108] sm:$0xff] %vm347_vm2, %v8213_v0  ;;  %383 = vst.msk [vmem:[#allocation3 + $0x110] sm:$0xff] %vm347_vm2, %v8213_v0  ;;  %5160 = vrot.lane.b32.xlu1 %v6338_v48, %s6102_s25  ;;  %v6486_v21 = vpack.i.bf16 %v912_v20, %v911_v19  ;;  %v913_v22 = vld [vmem:[#allocation2 + $0xaa] sm:$0xff]  ;;  %v914_v23 = vld [vmem:[#allocation2 + $0xb2] sm:$0xff] }
  0x3e   : > { %385 = vst.msk [vmem:[#allocation3 + $0x120] sm:$0xff] %vm347_vm2, %v8213_v0  ;;  %386 = vst.msk [vmem:[#allocation3 + $0x128] sm:$0xff] %vm347_vm2, %v8213_v0  ;;  %5165 = vrot.lane.b32.xlu0 %v6342_v49, %s6102_s25  ;;  %v6494_v24 = vpack.i.bf16 %v914_v23, %v913_v22  ;;  %v915_v25 = vld [vmem:[#allocation2 + $0xc2] sm:$0xff]  ;;  %v916_v26 = vld [vmem:[#allocation2 + $0xca] sm:$0xff] }
  0x3f   : > { %388 = vst.msk [vmem:[#allocation3 + $0x138] sm:$0xff] %vm347_vm2, %v8213_v0  ;;  %389 = vst.msk [vmem:[#allocation3 + $0x140] sm:$0xff] %vm347_vm2, %v8213_v0  ;;  %v6498_v27 = vpack.i.bf16 %v916_v26, %v915_v25  ;;  %v887_v28 = vld [vmem:[#allocation2 + $0xf1] sm:$0xff]  ;;  %v888_v30 = vld [vmem:[#allocation2 + $0xf9] sm:$0xff] }
  0x40   : > { %391 = vst.msk [vmem:[#allocation3 + $0x150] sm:$0xff] %vm347_vm2, %v8213_v0  ;;  %392 = vst.msk [vmem:[#allocation3 + $0x158] sm:$0xff] %vm347_vm2, %v8213_v0  ;;  %v917_v31 = vld [vmem:[#allocation2 + $0xda] sm:$0xff]  ;;  %v918_v32 = vld [vmem:[#allocation2 + $0xe2] sm:$0xff] }
  0x41   : > { %394 = vst.msk [vmem:[#allocation3 + $0x168] sm:$0xff] %vm347_vm2, %v8213_v0  ;;  %395 = vst.msk [vmem:[#allocation3 + $0x170] sm:$0xff] %vm347_vm2, %v8213_v0  ;;  %5170 = vrot.lane.b32.xlu1 %v6420_v54, %s6102_s25  ;;  %v6508_v34 = vpack.i.bf16 %v918_v32, %v917_v31  ;;  %v919_v36 = vld [vmem:[#allocation2 + $0xf2] sm:$0xff]  ;;  %v920_v38 = vld [vmem:[#allocation2 + $0xfa] sm:$0xff] }
  0x42   : > { %397 = vst.msk [vmem:[#allocation3 + $0x180] sm:$0xff] %vm347_vm2, %v8213_v0  ;;  %398 = vst.msk [vmem:[#allocation3 + $0x188] sm:$0xff] %vm347_vm2, %v8213_v0  ;;  %5175 = vrot.lane.b32.xlu0 %v6318_v33, %s6102_s25  ;;  %v6504_v33 = vpack.i.bf16 %v888_v30, %v887_v28  ;;  %v889_v39 = vld [vmem:[#allocation2 + $0x109] sm:$0xff]  ;;  %v890_v40 = vld [vmem:[#allocation2 + $0x111] sm:$0xff]  ;;  %v6512_v41 = vpack.i.bf16 %v920_v38, %v919_v36 }
  0x43   : > { %400 = vst.msk [vmem:[#allocation3 + $0x198] sm:$0xff] %vm347_vm2, %v8213_v0  ;;  %401 = vst.msk [vmem:[#allocation3 + $0x1a0] sm:$0xff] %vm347_vm2, %v8213_v0  ;;  %v6516_v44 = vpack.i.bf16 %v890_v40, %v889_v39  ;;  %v921_v47 = vld [vmem:[#allocation2 + $0x10a] sm:$0xff]  ;;  %v922_v50 = vld [vmem:[#allocation2 + $0x112] sm:$0xff] }
  0x44   : > { %337 = vst.msk [vmem:[#allocation2 + $0x121] sm:$0xff] %vm226_vm0, %v304_v52  ;;  %338 = vst.msk [vmem:[#allocation2 + $0x129] sm:$0xff] %vm226_vm0, %v305_v53  ;;  %v6524_v52 = vpack.i.bf16 %v922_v50, %v921_v47  ;;  %v6086_v19 = vld [vmem:[%s8208_s1] sm:$0x3f]   ;;  %v468_v30 = vld [vmem:[#allocation2 + $0xa] sm:$0xff] }
  0x45   : > { %339 = vst.msk [vmem:[#allocation2 + $0x139] sm:$0xff] %vm226_vm0, %v306_v57  ;;  %340 = vst.msk [vmem:[#allocation2 + $0x141] sm:$0xff] %vm226_vm0, %v307_v58  ;;  %5180 = vrot.lane.b32.xlu1 %v6316_v29, %s6102_s25  ;;  %5107 = vmatprep.subr.msk.bf16.mxu1 %vm1326_vm3, %v6086_v19  ;;  %v1545_v26 = vsel %vm1326_vm3, %v6086_v19, 0  ;;  %v467_v28 = vld [vmem:[#allocation2 + $0x2] sm:$0xff] }
  0x46   : > { %341 = vst.msk [vmem:[#allocation2 + $0x151] sm:$0xff] %vm226_vm0, %v308_v59  ;;  %342 = vst.msk [vmem:[#allocation2 + $0x159] sm:$0xff] %vm226_vm0, %v309_v60  ;;  %5185 = vrot.lane.b32.xlu0 %v6446_v2, %s6103_s26  ;;  %4931 = vmatpush3.bf16.msra.mxu1 %v1545_v26  ;;  %v5334_v32 = vpack.i.bf16 %v468_v30, %v467_v28 }
  0x47   : > { %343 = vst.msk [vmem:[#allocation2 + $0x169] sm:$0xff] %vm226_vm0, %v310_v61  ;;  %344 = vst.msk [vmem:[#allocation2 + $0x171] sm:$0xff] %vm226_vm0, %v311_v62 }
  0x48   : > { %345 = vst.msk [vmem:[#allocation2 + $0x181] sm:$0xff] %vm226_vm0, %v312_v63  ;;  %346 = vst.msk [vmem:[#allocation2 + $0x189] sm:$0xff] %vm226_vm0, %v313_v1 }
  0x49   : > { %5190 = vrot.lane.b32.xlu1 %v6450_v5, %s6103_s26 }
  0x4a   : > { %5195 = vrot.lane.b32.xlu0 %v6322_v35, %s6102_s25 }
  0x4b   : > { %v891_v45 = vld [vmem:[#allocation2 + $0x121] sm:$0xff]  ;;  %v892_v46 = vld [vmem:[#allocation2 + $0x129] sm:$0xff] }
  0x4c   : > { %v6520_v51 = vpack.i.bf16 %v892_v46, %v891_v45  ;;  %v923_v53 = vld [vmem:[#allocation2 + $0x122] sm:$0xff]  ;;  %v924_v55 = vld [vmem:[#allocation2 + $0x12a] sm:$0xff]  ;;  %v893_v56 = vld [vmem:[#allocation2 + $0x139] sm:$0xff] }
  0x4d   : > { %5200 = vrot.lane.b32.xlu1 %v6326_v37, %s6102_s25  ;;  %v894_v57 = vld [vmem:[#allocation2 + $0x141] sm:$0xff]  ;;  %v6528_v58 = vpack.i.bf16 %v924_v55, %v923_v53  ;;  %v895_v60 = vld [vmem:[#allocation2 + $0x151] sm:$0xff]  ;;  %v896_v61 = vld [vmem:[#allocation2 + $0x159] sm:$0xff] }
  0x4e   : > { %5205 = vrot.lane.b32.xlu0 %v6458_v8, %s6103_s26  ;;  %v6532_v59 = vpack.i.bf16 %v894_v57, %v893_v56  ;;  %v925_v62 = vld [vmem:[#allocation2 + $0x13a] sm:$0xff]  ;;  %v926_v63 = vld [vmem:[#allocation2 + $0x142] sm:$0xff]  ;;  %v6536_v1 = vpack.i.bf16 %v896_v61, %v895_v60  ;;  %v927_v4 = vld [vmem:[#allocation2 + $0x152] sm:$0xff] }
  0x4f   : > { %v6540_v3 = vpack.i.bf16 %v926_v63, %v925_v62  ;;  %v928_v6 = vld [vmem:[#allocation2 + $0x15a] sm:$0xff]  ;;  %v897_v7 = vld [vmem:[#allocation2 + $0x169] sm:$0xff]  ;;  %v898_v9 = vld [vmem:[#allocation2 + $0x171] sm:$0xff] }
  0x50   : > { %v6544_v10 = vpack.i.bf16 %v928_v6, %v927_v4  ;;  %v6548_v12 = vpack.i.bf16 %v898_v9, %v897_v7  ;;  %v899_v13 = vld [vmem:[#allocation2 + $0x181] sm:$0xff]  ;;  %v900_v14 = vld [vmem:[#allocation2 + $0x189] sm:$0xff]  ;;  %v930_v16 = vld [vmem:[#allocation2 + $0x172] sm:$0xff] }
  0x51   : > { %5210 = vrot.lane.b32.xlu1 %v6462_v11, %s6103_s26  ;;  %v929_v15 = vld [vmem:[#allocation2 + $0x16a] sm:$0xff]  ;;  %v5319_v20 = vpack.i.bf16 %v900_v14, %v899_v13  ;;  %v931_v23 = vld [vmem:[#allocation2 + $0x182] sm:$0xff]  ;;  %v6654_v56 = vld [vmem:[#allocation2 + $0x38] sm:$0xff] }
  0x52   : > { %5215 = vrot.lane.b32.xlu0 %v6330_v42, %s6102_s25  ;;  %v6557_v22 = vpack.i.bf16 %v930_v16, %v929_v15  ;;  %v932_v25 = vld [vmem:[#allocation2 + $0x18a] sm:$0xff] }
  0x53   : > { %v5329_v31 = vpack.i.bf16 %v932_v25, %v931_v23  ;;  %v6652_v55 = vld [vmem:[#allocation2 + $0x30] sm:$0xff]  ;;  %v6667_v14 = vld [vmem:[#allocation2 + $0x48] sm:$0xff] }
  0x54   : > { %v6669_v15 = vld [vmem:[#allocation2 + $0x50] sm:$0xff] }
  0x55   : > { %5220 = vrot.lane.b32.xlu1 %v6334_v43, %s6102_s25 }
  0x56   : > { %5225 = vrot.lane.b32.xlu0 %v6482_v18, %s6103_s26 }
  0x59   : > { %5230 = vrot.lane.b32.xlu1 %v6486_v21, %s6103_s26 }
  0x5a   : > { %5235 = vrot.lane.b32.xlu0 %v6338_v48, %s6102_s25 }
  0x5d   : > { %5240 = vrot.lane.b32.xlu1 %v6342_v49, %s6102_s25 }
  0x5e   : > { %5245 = vrot.lane.b32.xlu0 %v6494_v24, %s6103_s26 }
  0x61   : > { %5250 = vrot.lane.b32.xlu1 %v6498_v27, %s6103_s26 }
  0x62   : > { %5255 = vrot.lane.b32.xlu0 %v6420_v54, %s6102_s25 }
  0x65   : > { %5260 = vrot.lane.b32.xlu1 %v6504_v33, %s6102_s25 }
  0x66   : > { %5265 = vrot.lane.b32.xlu0 %v6508_v34, %s6103_s26 }
  0x69   : > { %5270 = vrot.lane.b32.xlu1 %v6512_v41, %s6103_s26 }
  0x6a   : > { %5275 = vrot.lane.b32.xlu0 %v6516_v44, %s6102_s25 }
  0x6d   : > { %5280 = vrot.lane.b32.xlu1 %v6520_v51, %s6102_s25 }
  0x6e   : > { %5285 = vrot.lane.b32.xlu0 %v6524_v52, %s6103_s26 }
  0x71   : > { %5290 = vrot.lane.b32.xlu1 %v6528_v58, %s6103_s26 }
  0x72   : > { %5295 = vrot.lane.b32.xlu0 %v6532_v59, %s6102_s25 }
  0x75   : > { %5300 = vrot.lane.b32.xlu1 %v6536_v1, %s6102_s25 }
  0x76   : > { %5305 = vrot.lane.b32.xlu0 %v6540_v3, %s6103_s26 }
  0x79   : > { %5310 = vrot.lane.b32.xlu1 %v6544_v10, %s6103_s26 }
  0x7a   : > { %5315 = vrot.lane.b32.xlu0 %v6548_v12, %s6102_s25 }
  0x7d   : > { %5320 = vrot.lane.b32.xlu1 %v5319_v20, %s6102_s25 }
  0x7e   : > { %5325 = vrot.lane.b32.xlu0 %v6557_v22, %s6103_s26 }
  0x81   : > { %5330 = vrot.lane.b32.xlu1 %v5329_v31, %s6103_s26 }
  0x82   : > { %5335 = vrot.lane.b32.xlu0 %v5334_v32, %s6103_s26 }
  0x85   : > { %5340 = vrot.lane.b32.xlu1 %v6446_v2, %s6103_s26 }
  0x86   : > { %5345 = vrot.lane.b32.xlu0 %v6316_v29, %s6102_s25 }
  0x89   : > { %5350 = vrot.lane.b32.xlu1 %v6322_v35, %s6102_s25  ;;  %v6594_v29 = vpop.permute.xlu0 %5125 }
  0x8a   : > { %5355 = vrot.lane.b32.xlu0 %v6450_v5, %s6103_s26 }
  0x8d   : > { %5360 = vrot.lane.b32.xlu1 %v6458_v8, %s6103_s26 }
  0x8e   : > { %5365 = vrot.lane.b32.xlu0 %v6450_v5, %s6103_s26 }
  0x91   : > { %5370 = vrot.lane.b32.xlu1 %v6458_v8, %s6103_s26 }
  0x92   : > { %5375 = vrot.lane.b32.xlu0 %v6326_v37, %s6102_s25 }
  0x95   : > { %5380 = vrot.lane.b32.xlu1 %v6330_v42, %s6102_s25 }
  0x96   : > { %5385 = vrot.lane.b32.xlu0 %v6462_v11, %s6103_s26 }
  0x99   : > { %5390 = vrot.lane.b32.xlu1 %v6482_v18, %s6103_s26 }
  0x9a   : > { %5395 = vrot.lane.b32.xlu0 %v6462_v11, %s6103_s26 }
  0x9d   : > { %5400 = vrot.lane.b32.xlu1 %v6482_v18, %s6103_s26 }
  0x9e   : > { %5405 = vrot.lane.b32.xlu0 %v6334_v43, %s6102_s25 }
  0xa1   : > { %5410 = vrot.lane.b32.xlu1 %v6338_v48, %s6102_s25 }
  0xa2   : > { %5415 = vrot.lane.b32.xlu0 %v6486_v21, %s6103_s26 }
  0xa3   : > { %v6600_v35 = vpop.permute.xlu1 %5135 }
  0xa4   : > { %v6602_v37 = vpop.permute.xlu0 %5130 }
  0xa5   : > { %5420 = vrot.lane.b32.xlu1 %v6494_v24, %s6103_s26 }
  0xa6   : > { %5425 = vrot.lane.b32.xlu0 %v6486_v21, %s6103_s26 }
  0xa7   : > { %v6608_v42 = vpop.permute.xlu1 %5140 }
  0xa8   : > { %v6610_v43 = vpop.permute.xlu0 %5145 }
  0xa9   : > { %5430 = vrot.lane.b32.xlu1 %v6494_v24, %s6103_s26  ;;  %v6640_v24 = vld [vmem:[#allocation2 + $0x20] sm:$0xff] }
  0xaa   : > { %5435 = vrot.lane.b32.xlu0 %v6342_v49, %s6102_s25 }
  0xab   : > { %v6616_v48 = vpop.permute.xlu1 %5150 }
  0xac   : > { %v6618_v2 = vpop.permute.xlu0 %5155 }
  0xad   : > { %5440 = vrot.lane.b32.xlu1 %v6420_v54, %s6102_s25  ;;  %v6638_v54 = vld [vmem:[#allocation2 + $0x18] sm:$0xff] }
  0xae   : > { %5445 = vrot.lane.b32.xlu0 %v6498_v27, %s6103_s26 }
  0xaf   : > { %v6624_v5 = vpop.permute.xlu1 %5160 }
  0xb0   : > { %v6626_v8 = vpop.permute.xlu0 %5165 }
  0xb1   : > { %5450 = vrot.lane.b32.xlu1 %v6508_v34, %s6103_s26 }
  0xb2   : > { %5455 = vrot.lane.b32.xlu0 %v6498_v27, %s6103_s26 }
  0xb3   : > { %v6632_v49 = vpop.permute.xlu1 %5170 }
  0xb4   : > { %v5176_v11 = vpop.permute.xlu0 %5175 }
  0xb5   : > { %v5178_v18 = vunpack.i.h.bf16 %v5176_v11  ;;  %v5177_v21 = vunpack.i.l.bf16 %v5176_v11  ;;  %5460 = vrot.lane.b32.xlu1 %v6508_v34, %s6103_s26 }
  0xb6   : > { %5465 = vrot.lane.b32.xlu0 %v6504_v33, %s6102_s25 }
  0xb7   : > { %v5181_v36 = vpop.permute.xlu1 %5180  ;;  %v1189_v27 = vsel %vm226_vm0, %v6638_v54, %v5177_v21  ;;  %v1190_v39 = vsel %vm226_vm0, %v6640_v24, %v5178_v18  ;;  %v6683_v18 = vld [vmem:[#allocation2 + $0x60] sm:$0xff]  ;;  %v6685_v21 = vld [vmem:[#allocation2 + $0x68] sm:$0xff] }
  0xb8   : > { %v5186_v38 = vpop.permute.xlu0 %5185  ;;  %v5183_v40 = vunpack.i.h.bf16 %v5181_v36  ;;  %v5182_v45 = vunpack.i.l.bf16 %v5181_v36 }
  0xb9   : > { %v5188_v46 = vunpack.i.h.bf16 %v5186_v38  ;;  %v5187_v47 = vunpack.i.l.bf16 %v5186_v38  ;;  %5470 = vrot.lane.b32.xlu1 %v6516_v44, %s6102_s25 }
  0xba   : > { %5475 = vrot.lane.b32.xlu0 %v6512_v41, %s6103_s26  ;;  %v1192_v63 = vsel %vm226_vm0, %v6654_v56, %v5183_v40  ;;  %v1191_v4 = vsel %vm226_vm0, %v6652_v55, %v5182_v45 }
  0xbb   : > { %v5191_v34 = vpop.permute.xlu1 %5190  ;;  %v1221_v50 = vsel %vm347_vm2, %v1189_v27, %v5187_v47  ;;  %v1222_v53 = vsel %vm347_vm2, %v1190_v39, %v5188_v46  ;;  %v6698_v47 = vld [vmem:[#allocation2 + $0x78] sm:$0xff] }
  0xbc   : > { %v5193_v57 = vunpack.i.h.bf16 %v5191_v34  ;;  %v5192_v60 = vunpack.i.l.bf16 %v5191_v34  ;;  %v5196_v61 = vpop.permute.xlu0 %5195  ;;  %v1253_v62 = vpack.c.bf16 %v1222_v53, %v1221_v50  ;;  %v6700_v34 = vld [vmem:[#allocation2 + $0x80] sm:$0xff] }
  0xbd   : > { %v5198_v6 = vunpack.i.h.bf16 %v5196_v61  ;;  %v5197_v7 = vunpack.i.l.bf16 %v5196_v61  ;;  %5480 = vrot.lane.b32.xlu1 %v6524_v52, %s6103_s26 }
  0xbe   : > { %v1223_v9 = vsel %vm347_vm2, %v1191_v4, %v5192_v60  ;;  %v1224_v13 = vsel %vm347_vm2, %v1192_v63, %v5193_v57  ;;  %4898 = vmatprep.mubr.msk.bf16.mxu0 %vm1277_vm4, %v1253_v62  ;;  %5485 = vrot.lane.b32.xlu0 %v6504_v33, %s6102_s25 }
  0xbf   : > { %v5201_v16 = vpop.permute.xlu1 %5200  ;;  %v1254_v19 = vpack.c.bf16 %v1224_v13, %v1223_v9  ;;  %v1194_v20 = vsel %vm226_vm0, %v6669_v15, %v5198_v6  ;;  %v1193_v23 = vsel %vm226_vm0, %v6667_v14, %v5197_v7  ;;  %v6713_v13 = vld [vmem:[#allocation2 + $0x90] sm:$0xff] }
  0xc0   : > { %v5206_v25 = vpop.permute.xlu0 %5205  ;;  %v5203_v26 = vunpack.i.h.bf16 %v5201_v16  ;;  %v5202_v28 = vunpack.i.l.bf16 %v5201_v16  ;;  %v6715_v16 = vld [vmem:[#allocation2 + $0x98] sm:$0xff] }
  0xc1   : > { %v5208_v30 = vunpack.i.h.bf16 %v5206_v25  ;;  %v5207_v31 = vunpack.i.l.bf16 %v5206_v25  ;;  %5490 = vrot.lane.b32.xlu1 %v6516_v44, %s6102_s25  ;;  %4899 = vmatmul.mubr.msk.bf16.vlgmr.msra.gmra.mxu0 %vm1277_vm4, %v1254_v19 }
  0xc2   : > { %5495 = vrot.lane.b32.xlu0 %v6512_v41, %s6103_s26  ;;  %4965 = vmatpush3.bf16.msra.mxu0 %v6475_v17  ;;  %v1196_v39 = vsel %vm226_vm0, %v6685_v21, %v5203_v26  ;;  %v1195_v41 = vsel %vm226_vm0, %v6683_v18, %v5202_v28 }
  0xc3   : > { %v1225_v33 = vsel %vm347_vm2, %v1193_v23, %v5207_v31  ;;  %v1226_v32 = vsel %vm347_vm2, %v1194_v20, %v5208_v30  ;;  %v5211_v11 = vpop.permute.xlu1 %5210 }
  0xc4   : > { %v5213_v36 = vunpack.i.h.bf16 %v5211_v11  ;;  %v5212_v38 = vunpack.i.l.bf16 %v5211_v11  ;;  %v5216_v27 = vpop.permute.xlu0 %5215  ;;  %v1255_v44 = vpack.c.bf16 %v1226_v32, %v1225_v33  ;;  %v6728_v11 = vld [vmem:[#allocation2 + $0xa8] sm:$0xff] }
  0xc5   : > { %v5218_v17 = vunpack.i.h.bf16 %v5216_v27  ;;  %v5217_v40 = vunpack.i.l.bf16 %v5216_v27  ;;  %5500 = vrot.lane.b32.xlu1 %v6524_v52, %s6103_s26 }
  0xc6   : > { %v1227_v45 = vsel %vm347_vm2, %v1195_v41, %v5212_v38  ;;  %v1228_v46 = vsel %vm347_vm2, %v1196_v39, %v5213_v36  ;;  %4902 = vmatprep.mubr.msk.bf16.mxu0 %vm1277_vm4, %v1255_v44  ;;  %5505 = vrot.lane.b32.xlu0 %v6520_v51, %s6102_s25  ;;  %v6730_v36 = vld [vmem:[#allocation2 + $0xb0] sm:$0xff] }
  0xc7   : > { %v5221_v50 = vpop.permute.xlu1 %5220  ;;  %v1256_v53 = vpack.c.bf16 %v1228_v46, %v1227_v45  ;;  %v1198_v57 = vsel %vm226_vm0, %v6700_v34, %v5218_v17  ;;  %v1197_v52 = vsel %vm226_vm0, %v6698_v47, %v5217_v40 }
  0xc8   : > { %v5226_v60 = vpop.permute.xlu0 %5225  ;;  %v5223_v61 = vunpack.i.h.bf16 %v5221_v50  ;;  %v5222_v62 = vunpack.i.l.bf16 %v5221_v50 }
  0xc9   : > { %v5228_v63 = vunpack.i.h.bf16 %v5226_v60  ;;  %v5227_v4 = vunpack.i.l.bf16 %v5226_v60  ;;  %5510 = vrot.lane.b32.xlu1 %v6532_v59, %s6102_s25  ;;  %4903 = vmatmul.mubr.msk.bf16.gmra.mxu0 %vm1277_vm4, %v1256_v53 }
  0xca   : > { %5515 = vrot.lane.b32.xlu0 %v6528_v58, %s6103_s26  ;;  %v1200_v26 = vsel %vm226_vm0, %v6715_v16, %v5223_v61  ;;  %v1199_v28 = vsel %vm226_vm0, %v6713_v13, %v5222_v62 }
  0xcb   : > { %v1229_v6 = vsel %vm347_vm2, %v1197_v52, %v5227_v4  ;;  %v1230_v7 = vsel %vm347_vm2, %v1198_v57, %v5228_v63  ;;  %v5231_v9 = vpop.permute.xlu1 %5230  ;;  %v6743_v57 = vld [vmem:[#allocation2 + $0xc0] sm:$0xff]  ;;  %v6745_v52 = vld [vmem:[#allocation2 + $0xc8] sm:$0xff] }
  0xcc   : > { %v5233_v19 = vunpack.i.h.bf16 %v5231_v9  ;;  %v5232_v20 = vunpack.i.l.bf16 %v5231_v9  ;;  %v5236_v23 = vpop.permute.xlu0 %5235  ;;  %v1257_v25 = vpack.c.bf16 %v1230_v7, %v1229_v6 }
  0xcd   : > { %v5238_v30 = vunpack.i.h.bf16 %v5236_v23  ;;  %v5237_v31 = vunpack.i.l.bf16 %v5236_v23  ;;  %5520 = vrot.lane.b32.xlu1 %v6540_v3, %s6103_s26 }
  0xce   : > { %v1231_v33 = vsel %vm347_vm2, %v1199_v28, %v5232_v20  ;;  %v1232_v32 = vsel %vm347_vm2, %v1200_v26, %v5233_v19  ;;  %4906 = vmatprep.mubr.msk.bf16.mxu0 %vm1277_vm4, %v1257_v25  ;;  %5525 = vrot.lane.b32.xlu0 %v6520_v51, %s6102_s25  ;;  %v6758_v19 = vld [vmem:[#allocation2 + $0xd8] sm:$0xff]  ;;  %v6760_v20 = vld [vmem:[#allocation2 + $0xe0] sm:$0xff] }
  0xcf   : > { %v5241_v38 = vpop.permute.xlu1 %5240  ;;  %v1258_v27 = vpack.c.bf16 %v1232_v32, %v1231_v33  ;;  %v1202_v44 = vsel %vm226_vm0, %v6730_v36, %v5238_v30  ;;  %v1201_v39 = vsel %vm226_vm0, %v6728_v11, %v5237_v31 }
  0xd0   : > { %v5246_v41 = vpop.permute.xlu0 %5245  ;;  %v5243_v17 = vunpack.i.h.bf16 %v5241_v38  ;;  %v5242_v40 = vunpack.i.l.bf16 %v5241_v38  ;;  %v6769_v38 = vld [vmem:[#allocation2 + $0xf0] sm:$0xff] }
  0xd1   : > { %v5248_v45 = vunpack.i.h.bf16 %v5246_v41  ;;  %v5247_v46 = vunpack.i.l.bf16 %v5246_v41  ;;  %5530 = vrot.lane.b32.xlu1 %v6532_v59, %s6102_s25  ;;  %4907 = vmatmul.mubr.msk.bf16.gmra.mxu0 %vm1277_vm4, %v1258_v27  ;;  %v6771_v27 = vld [vmem:[#allocation2 + $0xf8] sm:$0xff] }
  0xd2   : > { %5535 = vrot.lane.b32.xlu0 %v6528_v58, %s6103_s26  ;;  %v1204_v59 = vsel %vm226_vm0, %v6745_v52, %v5243_v17  ;;  %v1203_v4 = vsel %vm226_vm0, %v6743_v57, %v5242_v40 }
  0xd3   : > { %v1233_v51 = vsel %vm347_vm2, %v1201_v39, %v5247_v46  ;;  %v1234_v50 = vsel %vm347_vm2, %v1202_v44, %v5248_v45  ;;  %v5251_v53 = vpop.permute.xlu1 %5250 }
  0xd4   : > { %v5253_v60 = vunpack.i.h.bf16 %v5251_v53  ;;  %v5252_v61 = vunpack.i.l.bf16 %v5251_v53  ;;  %v5256_v62 = vpop.permute.xlu0 %5255  ;;  %v1259_v63 = vpack.c.bf16 %v1234_v50, %v1233_v51  ;;  %v6781_v53 = vld [vmem:[#allocation2 + $0x108] sm:$0xff] }
  0xd5   : > { %v5258_v58 = vunpack.i.h.bf16 %v5256_v62  ;;  %v5257_v6 = vunpack.i.l.bf16 %v5256_v62  ;;  %5540 = vrot.lane.b32.xlu1 %v6540_v3, %s6103_s26 }
  0xd6   : > { %v1235_v7 = vsel %vm347_vm2, %v1203_v4, %v5252_v61  ;;  %v1236_v9 = vsel %vm347_vm2, %v1204_v59, %v5253_v60  ;;  %4910 = vmatprep.mubr.msk.bf16.mxu0 %vm1277_vm4, %v1259_v63  ;;  %5545 = vrot.lane.b32.xlu0 %v6536_v1, %s6102_s25  ;;  %v6783_v60 = vld [vmem:[#allocation2 + $0x110] sm:$0xff] }
  0xd7   : > { %v5261_v23 = vpop.permute.xlu1 %5260  ;;  %v1260_v25 = vpack.c.bf16 %v1236_v9, %v1235_v7  ;;  %v1206_v26 = vsel %vm226_vm0, %v6760_v20, %v5258_v58  ;;  %v1205_v3 = vsel %vm226_vm0, %v6758_v19, %v5257_v6  ;;  %v1769_v6 = vld [vmem:[#allocation2 + $0x181] sm:$0xff]  ;;  %v1770_v7 = vld [vmem:[#allocation2 + $0x189] sm:$0xff] }
  0xd8   : > { %v5266_v28 = vpop.permute.xlu0 %5265  ;;  %v5263_v30 = vunpack.i.h.bf16 %v5261_v23  ;;  %v5262_v31 = vunpack.i.l.bf16 %v5261_v23 }
  0xd9   : > { %v5268_v33 = vunpack.i.h.bf16 %v5266_v28  ;;  %v5267_v32 = vunpack.i.l.bf16 %v5266_v28  ;;  %5550 = vrot.lane.b32.xlu1 %v6548_v12, %s6102_s25  ;;  %4911 = vmatmul.mubr.msk.bf16.gmra.mxu0 %vm1277_vm4, %v1260_v25 }
  0xda   : > { %5555 = vrot.lane.b32.xlu0 %v6544_v10, %s6103_s26  ;;  %v1208_v51 = vsel %vm226_vm0, %v6771_v27, %v5263_v30  ;;  %v1207_v50 = vsel %vm226_vm0, %v6769_v38, %v5262_v31  ;;  %v1772_v31 = vld [vmem:[#allocation2 + $0x1a1] sm:$0xff] }
  0xdb   : > { %v1237_v44 = vsel %vm347_vm2, %v1205_v3, %v5267_v32  ;;  %v1238_v39 = vsel %vm347_vm2, %v1206_v26, %v5268_v33  ;;  %v5271_v41 = vpop.permute.xlu1 %5270  ;;  %v6799_v33 = vld [vmem:[#allocation2 + $0x120] sm:$0xff]  ;;  %v6801_v32 = vld [vmem:[#allocation2 + $0x128] sm:$0xff] }
  0xdc   : > { %v5273_v17 = vunpack.i.h.bf16 %v5271_v41  ;;  %v5272_v40 = vunpack.i.l.bf16 %v5271_v41  ;;  %v5276_v45 = vpop.permute.xlu0 %5275  ;;  %v1261_v46 = vpack.c.bf16 %v1238_v39, %v1237_v44  ;;  %v5584_v44 = vpack.i.bf16 %v1770_v7, %v1769_v6  ;;  %v1803_v6 = vld [vmem:[#allocation2 + $0x19a] sm:$0xff]  ;;  %v1804_v7 = vld [vmem:[#allocation2 + $0x1a2] sm:$0xff] }
  0xdd   : > { %v5278_v61 = vunpack.i.h.bf16 %v5276_v45  ;;  %v5277_v62 = vunpack.i.l.bf16 %v5276_v45  ;;  %5560 = vrot.lane.b32.xlu1 %v6557_v22, %s6103_s26  ;;  %v1802_v45 = vld [vmem:[#allocation2 + $0x18a] sm:$0xff] }
  0xde   : > { %v1239_v63 = vsel %vm347_vm2, %v1207_v50, %v5272_v40  ;;  %v1240_v59 = vsel %vm347_vm2, %v1208_v51, %v5273_v17  ;;  %4914 = vmatprep.mubr.msk.bf16.mxu0 %vm1277_vm4, %v1261_v46  ;;  %5565 = vrot.lane.b32.xlu0 %v6536_v1, %s6102_s25  ;;  %v1771_v1 = vld [vmem:[#allocation2 + $0x199] sm:$0xff]  ;;  %v1801_v40 = vld [vmem:[#allocation2 + $0x182] sm:$0xff] }
  0xdf   : > { %v5281_v4 = vpop.permute.xlu1 %5280  ;;  %v1262_v58 = vpack.c.bf16 %v1240_v59, %v1239_v63  ;;  %v1210_v9 = vsel %vm226_vm0, %v6783_v60, %v5278_v61  ;;  %v1209_v23 = vsel %vm226_vm0, %v6781_v53, %v5277_v62  ;;  %v6807_v51 = vld [vmem:[#allocation2 + $0x138] sm:$0xff]  ;;  %v5589_v62 = vpack.i.bf16 %v1772_v31, %v1771_v1  ;;  %v6813_v59 = vld [vmem:[#allocation2 + $0x140] sm:$0xff] }
  0xe0   : > { %v5286_v25 = vpop.permute.xlu0 %5285  ;;  %v5283_v26 = vunpack.i.h.bf16 %v5281_v4  ;;  %v5282_v3 = vunpack.i.l.bf16 %v5281_v4  ;;  %v5599_v1 = vpack.i.bf16 %v1804_v7, %v1803_v6  ;;  %v6840_v6 = vld [vmem:[#allocation2 + $0x170] sm:$0xff] }
  0xe1   : > { %v5288_v28 = vunpack.i.h.bf16 %v5286_v25  ;;  %v5287_v30 = vunpack.i.l.bf16 %v5286_v25  ;;  %5570 = vrot.lane.b32.xlu1 %v6548_v12, %s6102_s25  ;;  %4915 = vmatmul.mubr.msk.bf16.gmra.mxu0 %vm1277_vm4, %v1262_v58  ;;  %v5594_v25 = vpack.i.bf16 %v1802_v45, %v1801_v40  ;;  %v6829_v40 = vld [vmem:[#allocation2 + $0x158] sm:$0xff] }
  0xe2   : > { %5575 = vrot.lane.b32.xlu0 %v6544_v10, %s6103_s26  ;;  %v1212_v63 = vsel %vm226_vm0, %v6801_v32, %v5283_v26  ;;  %v1211_v10 = vsel %vm226_vm0, %v6799_v33, %v5282_v3 }
  0xe3   : > { %v1241_v39 = vsel %vm347_vm2, %v1209_v23, %v5287_v30  ;;  %v1242_v41 = vsel %vm347_vm2, %v1210_v9, %v5288_v28  ;;  %v5291_v17 = vpop.permute.xlu1 %5290 }
  0xe4   : > { %v5293_v12 = vunpack.i.h.bf16 %v5291_v17  ;;  %v5292_v46 = vunpack.i.l.bf16 %v5291_v17  ;;  %v5296_v50 = vpop.permute.xlu0 %5295  ;;  %v1263_v61 = vpack.c.bf16 %v1242_v41, %v1241_v39 }
  0xe5   : > { %v5298_v4 = vunpack.i.h.bf16 %v5296_v50  ;;  %v5297_v58 = vunpack.i.l.bf16 %v5296_v50  ;;  %5580 = vrot.lane.b32.xlu1 %v6557_v22, %s6103_s26 }
  0xe6   : > { %v1243_v9 = vsel %vm347_vm2, %v1211_v10, %v5292_v46  ;;  %v1244_v23 = vsel %vm347_vm2, %v1212_v63, %v5293_v12  ;;  %4918 = vmatprep.mubr.msk.bf16.mxu0 %vm1277_vm4, %v1263_v61  ;;  %5585 = vrot.lane.b32.xlu0 %v5584_v44, %s6102_s25  ;;  %v6827_v44 = vld [vmem:[#allocation2 + $0x150] sm:$0xff] }
  0xe7   : > { %v5301_v26 = vpop.permute.xlu1 %5300  ;;  %v1264_v3 = vpack.c.bf16 %v1244_v23, %v1243_v9  ;;  %v1214_v28 = vsel %vm226_vm0, %v6813_v59, %v5298_v4  ;;  %v1213_v30 = vsel %vm226_vm0, %v6807_v51, %v5297_v58  ;;  %v6838_v58 = vld [vmem:[#allocation2 + $0x168] sm:$0xff] }
  0xe8   : > { %v5306_v22 = vpop.permute.xlu0 %5305  ;;  %v5303_v31 = vunpack.i.h.bf16 %v5301_v26  ;;  %v5302_v39 = vunpack.i.l.bf16 %v5301_v26 }
  0xe9   : > { %v5308_v41 = vunpack.i.h.bf16 %v5306_v22  ;;  %v5307_v17 = vunpack.i.l.bf16 %v5306_v22  ;;  %5590 = vrot.lane.b32.xlu1 %v5589_v62, %s6102_s25  ;;  %4919 = vmatmul.mubr.msk.bf16.gmra.mxu0 %vm1277_vm4, %v1264_v3 }
  0xea   : > { %5595 = vrot.lane.b32.xlu0 %v5594_v25, %s6103_s26  ;;  %v1216_v62 = vsel %vm226_vm0, %v6829_v40, %v5303_v31  ;;  %v1215_v4 = vsel %vm226_vm0, %v6827_v44, %v5302_v39 }
  0xeb   : > { %v1245_v45 = vsel %vm347_vm2, %v1213_v30, %v5307_v17  ;;  %v1246_v12 = vsel %vm347_vm2, %v1214_v28, %v5308_v41  ;;  %v5311_v46 = vpop.permute.xlu1 %5310 }
  0xec   : > { %v5313_v50 = vunpack.i.h.bf16 %v5311_v46  ;;  %v5312_v61 = vunpack.i.l.bf16 %v5311_v46  ;;  %v5316_v63 = vpop.permute.xlu0 %5315  ;;  %v1265_v10 = vpack.c.bf16 %v1246_v12, %v1245_v45  ;;  %v5127_v45 = vunpack.i.l.bf16 %v6594_v29  ;;  %v6853_v12 = vld [vmem:[#allocation2 + $0x180] sm:$0xff]  ;;  %v6855_v46 = vld [vmem:[#allocation2 + $0x188] sm:$0xff] }
  0xed   : > { %v5318_v7 = vunpack.i.h.bf16 %v5316_v63  ;;  %v5317_v9 = vunpack.i.l.bf16 %v5316_v63  ;;  %5600 = vrot.lane.b32.xlu1 %v5599_v1, %s6103_s26  ;;  %v5128_v1 = vunpack.i.h.bf16 %v6594_v29  ;;  %8217 = vst [vmem:[#allocation4_spill] sm:$0xff] %v6853_v12 }
  0xee   : > { %v1247_v23 = vsel %vm347_vm2, %v1215_v4, %v5312_v61  ;;  %v1248_v25 = vsel %vm347_vm2, %v1216_v62, %v5313_v50  ;;  %4922 = vmatprep.mubr.msk.bf16.mxu0 %vm1277_vm4, %v1265_v10  ;;  %v5133_v50 = vunpack.i.h.bf16 %v6602_v37  ;;  %v403_v62 = vld [vmem:[#allocation2] sm:$0xff]  ;;  %v404_v4 = vld [vmem:[#allocation2 + $0x8] sm:$0xff] }
  0xef   : > { %v5321_v26 = vpop.permute.xlu1 %5320  ;;  %v1266_v3 = vpack.c.bf16 %v1248_v25, %v1247_v23  ;;  %v1218_v28 = vsel %vm226_vm0, %v6840_v6, %v5318_v7  ;;  %v1217_v30 = vsel %vm226_vm0, %v6838_v58, %v5317_v9  ;;  %v5132_v7 = vunpack.i.l.bf16 %v6602_v37 }
  0xf0   : > { %v5326_v22 = vpop.permute.xlu0 %5325  ;;  %v5323_v31 = vunpack.i.h.bf16 %v5321_v26  ;;  %v5322_v39 = vunpack.i.l.bf16 %v5321_v26  ;;  %v755_v37 = vsel %vm226_vm0, %v403_v62, %v5127_v45 }
  0xf1   : > { %v5328_v41 = vunpack.i.h.bf16 %v5326_v22  ;;  %v5327_v17 = vunpack.i.l.bf16 %v5326_v22  ;;  %4923 = vmatmul.mubr.msk.bf16.gmra.mxu0 %vm1277_vm4, %v1266_v3 }
  0xf2   : > { %v1220_v29 = vsel %vm226_vm0, %v6855_v46, %v5323_v31  ;;  %v1219_v3 = vsel %vm226_vm0, %v6853_v12, %v5322_v39 }
  0xf3   : > { %v1249_v61 = vsel %vm347_vm2, %v1217_v30, %v5327_v17  ;;  %v1250_v63 = vsel %vm347_vm2, %v1218_v28, %v5328_v41  ;;  %v5331_v10 = vpop.permute.xlu1 %5330  ;;  %v756_v41 = vsel %vm226_vm0, %v404_v4, %v5128_v1 }
  0xf4   : > { %v5333_v9 = vunpack.i.h.bf16 %v5331_v10  ;;  %v5332_v23 = vunpack.i.l.bf16 %v5331_v10  ;;  %v5336_v25 = vpop.permute.xlu0 %5335  ;;  %v1267_v26 = vpack.c.bf16 %v1250_v63, %v1249_v61 }
  0xf5   : > { %v5338_v22 = vunpack.i.h.bf16 %v5336_v25  ;;  %v5337_v0 = vunpack.i.l.bf16 %v5336_v25 }
  0xf6   : > { %v1251_v30 = vsel %vm347_vm2, %v1219_v3, %v5332_v23  ;;  %v1252_v28 = vsel %vm347_vm2, %v1220_v29, %v5333_v9  ;;  %4926 = vmatprep.mubr.msk.bf16.mxu0 %vm1277_vm4, %v1267_v26  ;;  %v757_v23 = vsel %vm226_vm0, %v6638_v54, %v5132_v7  ;;  %v758_v9 = vsel %vm226_vm0, %v6640_v24, %v5133_v50 }
  0xf7   : > { %v5341_v17 = vpop.permute.xlu1 %5340  ;;  %v1268_v61 = vpack.c.bf16 %v1252_v28, %v1251_v30  ;;  %v787_v63 = vsel %vm347_vm2, %v755_v37, %v5337_v0  ;;  %v788_v31 = vsel %vm347_vm2, %v756_v41, %v5338_v22  ;;  %v5138_v22 = vunpack.i.h.bf16 %v6600_v35 }
  0xf8   : > { %v5343_v10 = vunpack.i.h.bf16 %v5341_v17  ;;  %v5342_v39 = vunpack.i.l.bf16 %v5341_v17  ;;  %v5346_v12 = vpop.permute.xlu0 %5345  ;;  %v819_v25 = vpack.c.bf16 %v788_v31, %v787_v63  ;;  %v5137_v30 = vunpack.i.l.bf16 %v6600_v35 }
  0xf9   : > { %v5348_v26 = vunpack.i.h.bf16 %v5346_v12  ;;  %v5347_v45 = vunpack.i.l.bf16 %v5346_v12  ;;  %4927 = vmatmul.mubr.msk.bf16.gmra.mxu0 %vm1277_vm4, %v1268_v61  ;;  %v5143_v28 = vunpack.i.h.bf16 %v6608_v42  ;;  %v5142_v61 = vunpack.i.l.bf16 %v6608_v42 }
  0xfa   : > { %v789_v1 = vsel %vm347_vm2, %v757_v23, %v5342_v39  ;;  %v790_v0 = vsel %vm347_vm2, %v758_v9, %v5343_v10  ;;  %4932 = vmatprep.mubr.msk.bf16.mxu1 %vm1277_vm4, %v819_v25 }
  0xfb   : > { %v5351_v62 = vpop.permute.xlu1 %5350  ;;  %v820_v4 = vpack.c.bf16 %v790_v0, %v789_v1  ;;  %v2062_v29 = vsel %vm226_vm0, %v6654_v56, %v5348_v26  ;;  %v2061_v54 = vsel %vm226_vm0, %v6652_v55, %v5347_v45  ;;  %v759_v26 = vsel %vm226_vm0, %v6652_v55, %v5137_v30 }
  0xfc   : > { %v5356_v7 = vpop.permute.xlu0 %5355  ;;  %v5353_v24 = vunpack.i.h.bf16 %v5351_v62  ;;  %v5352_v50 = vunpack.i.l.bf16 %v5351_v62  ;;  %v760_v45 = vsel %vm226_vm0, %v6654_v56, %v5138_v22  ;;  %v762_v55 = vsel %vm226_vm0, %v6669_v15, %v5143_v28  ;;  %v1715_v28 = vld [vmem:[#allocation2 + $0x78] sm:$0xff] }
  0xfd   : > { %v5358_v12 = vunpack.i.h.bf16 %v5356_v7  ;;  %v5357_v3 = vunpack.i.l.bf16 %v5356_v7  ;;  %4933 = vmatmul.mubr.msk.bf16.vlgmr.msra.gmra.mxu1 %vm1277_vm4, %v820_v4  ;;  %v761_v56 = vsel %vm226_vm0, %v6667_v14, %v5142_v61 }
  0xfe   : > { %v2064_v25 = vsel %vm226_vm0, %v6669_v15, %v5353_v24  ;;  %v2063_v23 = vsel %vm226_vm0, %v6667_v14, %v5352_v50  ;;  %v1716_v14 = vld [vmem:[#allocation2 + $0x80] sm:$0xff] }
  0xff   : > { %v2093_v37 = vsel %vm347_vm2, %v2061_v54, %v5357_v3  ;;  %v2094_v41 = vsel %vm347_vm2, %v2062_v29, %v5358_v12  ;;  %v5361_v17 = vpop.permute.xlu1 %5360  ;;  %v1713_v12 = vld [vmem:[#allocation2 + $0x60] sm:$0xff]  ;;  %v1714_v3 = vld [vmem:[#allocation2 + $0x68] sm:$0xff] }
 0x100   : > { %v5363_v63 = vunpack.i.h.bf16 %v5361_v17  ;;  %v5362_v31 = vunpack.i.l.bf16 %v5361_v17  ;;  %v5366_v10 = vpop.permute.xlu0 %5365  ;;  %v2125_v39 = vpack.c.bf16 %v2094_v41, %v2093_v37 }
 0x101   : > { %v5368_v35 = vunpack.i.h.bf16 %v5366_v10  ;;  %v5367_v9 = vunpack.i.l.bf16 %v5366_v10 }
 0x102   : > { %v2095_v42 = vsel %vm347_vm2, %v2063_v23, %v5362_v31  ;;  %v2096_v1 = vsel %vm347_vm2, %v2064_v25, %v5363_v63  ;;  %4966 = vmatprep.mubr.msk.bf16.mxu0 %vm1277_vm4, %v2125_v39 }
 0x103   : > { %v2126_v0 = vpack.c.bf16 %v2096_v1, %v2095_v42  ;;  %v792_v62 = vsel %vm347_vm2, %v760_v45, %v5368_v35  ;;  %v791_v4 = vsel %vm347_vm2, %v759_v26, %v5367_v9  ;;  %v5371_v29 = vpop.permute.xlu1 %5370  ;;  %v5148_v35 = vunpack.i.h.bf16 %v6610_v43 }
 0x104   : > { %v5373_v54 = vunpack.i.h.bf16 %v5371_v29  ;;  %v5372_v7 = vunpack.i.l.bf16 %v5371_v29  ;;  %v5376_v24 = vpop.permute.xlu0 %5375  ;;  %v821_v50 = vpack.c.bf16 %v792_v62, %v791_v4  ;;  %v5147_v9 = vunpack.i.l.bf16 %v6610_v43 }
 0x105   : > { %v5378_v22 = vunpack.i.h.bf16 %v5376_v24  ;;  %v5377_v30 = vunpack.i.l.bf16 %v5376_v24  ;;  %4967 = vmatmul.mubr.msk.bf16.vlgmr.msra.gmra.mxu0 %vm1277_vm4, %v2126_v0  ;;  %v5152_v24 = vunpack.i.l.bf16 %v6616_v48  ;;  %v764_v43 = vsel %vm226_vm0, %v6685_v21, %v5148_v35 }
 0x106   : > { %v794_v37 = vsel %vm347_vm2, %v762_v55, %v5373_v54  ;;  %v793_v41 = vsel %vm347_vm2, %v761_v56, %v5372_v7  ;;  %4936 = vmatprep.mubr.msk.bf16.mxu1 %vm1277_vm4, %v821_v50  ;;  %v5153_v7 = vunpack.i.h.bf16 %v6616_v48  ;;  %v763_v56 = vsel %vm226_vm0, %v6683_v18, %v5147_v9  ;;  %v1719_v9 = vld [vmem:[#allocation2 + $0xa8] sm:$0xff] }
 0x107   : > { %v5381_v17 = vpop.permute.xlu1 %5380  ;;  %v822_v63 = vpack.c.bf16 %v794_v37, %v793_v41  ;;  %v2066_v31 = vsel %vm226_vm0, %v1714_v3, %v5378_v22  ;;  %v2065_v15 = vsel %vm226_vm0, %v1713_v12, %v5377_v30  ;;  %v765_v18 = vsel %vm226_vm0, %v6698_v47, %v5152_v24  ;;  %v1720_v47 = vld [vmem:[#allocation2 + $0xb0] sm:$0xff] }
 0x108   : > { %v5383_v61 = vunpack.i.h.bf16 %v5381_v17  ;;  %v5382_v10 = vunpack.i.l.bf16 %v5381_v17  ;;  %v5386_v39 = vpop.permute.xlu0 %5385  ;;  %v766_v21 = vsel %vm226_vm0, %v6700_v34, %v5153_v7 }
 0x109   : > { %v5388_v25 = vunpack.i.h.bf16 %v5386_v39  ;;  %v5387_v23 = vunpack.i.l.bf16 %v5386_v39  ;;  %4937 = vmatmul.mubr.msk.bf16.gmra.mxu1 %vm1277_vm4, %v822_v63 }
 0x10a   : > { %v2068_v26 = vsel %vm226_vm0, %v1716_v14, %v5383_v61  ;;  %v2067_v45 = vsel %vm226_vm0, %v1715_v28, %v5382_v10  ;;  %v1718_v28 = vld [vmem:[#allocation2 + $0x98] sm:$0xff] }
 0x10b   : > { %v2097_v42 = vsel %vm347_vm2, %v2065_v15, %v5387_v23  ;;  %v2098_v1 = vsel %vm347_vm2, %v2066_v31, %v5388_v25  ;;  %v5391_v0 = vpop.permute.xlu1 %5390  ;;  %v1717_v15 = vld [vmem:[#allocation2 + $0x90] sm:$0xff] }
 0x10c   : > { %v5393_v62 = vunpack.i.h.bf16 %v5391_v0  ;;  %v5392_v4 = vunpack.i.l.bf16 %v5391_v0  ;;  %v5396_v29 = vpop.permute.xlu0 %5395  ;;  %v2127_v54 = vpack.c.bf16 %v2098_v1, %v2097_v42 }
 0x10d   : > { %v5398_v50 = vunpack.i.h.bf16 %v5396_v29  ;;  %v5397_v55 = vunpack.i.l.bf16 %v5396_v29 }
 0x10e   : > { %v2099_v12 = vsel %vm347_vm2, %v2067_v45, %v5392_v4  ;;  %v2100_v3 = vsel %vm347_vm2, %v2068_v26, %v5393_v62  ;;  %4970 = vmatprep.mubr.msk.bf16.mxu0 %vm1277_vm4, %v2127_v54  ;;  %v5158_v62 = vunpack.i.h.bf16 %v6618_v2  ;;  %v5157_v4 = vunpack.i.l.bf16 %v6618_v2 }
 0x10f   : > { %v795_v22 = vsel %vm347_vm2, %v763_v56, %v5397_v55  ;;  %v796_v30 = vsel %vm347_vm2, %v764_v43, %v5398_v50  ;;  %v5401_v37 = vpop.permute.xlu1 %5400  ;;  %v2128_v48 = vpack.c.bf16 %v2100_v3, %v2099_v12  ;;  %v5163_v3 = vunpack.i.h.bf16 %v6624_v5 }
 0x110   : > { %v5403_v41 = vunpack.i.h.bf16 %v5401_v37  ;;  %v5402_v17 = vunpack.i.l.bf16 %v5401_v37  ;;  %v5406_v63 = vpop.permute.xlu0 %5405  ;;  %v823_v31 = vpack.c.bf16 %v796_v30, %v795_v22  ;;  %v5162_v22 = vunpack.i.l.bf16 %v6624_v5 }
 0x111   : > { %v5408_v14 = vunpack.i.h.bf16 %v5406_v63  ;;  %v5407_v61 = vunpack.i.l.bf16 %v5406_v63  ;;  %4971 = vmatmul.mubr.msk.bf16.gmra.mxu0 %vm1277_vm4, %v2128_v48  ;;  %v768_v2 = vsel %vm226_vm0, %v6715_v16, %v5158_v62  ;;  %v767_v48 = vsel %vm226_vm0, %v6713_v13, %v5157_v4 }
 0x112   : > { %v798_v10 = vsel %vm347_vm2, %v766_v21, %v5403_v41  ;;  %v797_v39 = vsel %vm347_vm2, %v765_v18, %v5402_v17  ;;  %4940 = vmatprep.mubr.msk.bf16.mxu1 %vm1277_vm4, %v823_v31  ;;  %v770_v16 = vsel %vm226_vm0, %v6730_v36, %v5163_v3  ;;  %v769_v13 = vsel %vm226_vm0, %v6728_v11, %v5162_v22  ;;  %v1724_v11 = vld [vmem:[#allocation2 + $0xe0] sm:$0xff] }
 0x113   : > { %v5411_v25 = vpop.permute.xlu1 %5410  ;;  %v824_v23 = vpack.c.bf16 %v798_v10, %v797_v39  ;;  %v2070_v35 = vsel %vm226_vm0, %v1718_v28, %v5408_v14  ;;  %v2069_v34 = vsel %vm226_vm0, %v1717_v15, %v5407_v61  ;;  %v1721_v61 = vld [vmem:[#allocation2 + $0xc0] sm:$0xff]  ;;  %v1722_v10 = vld [vmem:[#allocation2 + $0xc8] sm:$0xff]  ;;  %v5168_v4 = vunpack.i.h.bf16 %v6626_v8 }
 0x114   : > { %v5413_v26 = vunpack.i.h.bf16 %v5411_v25  ;;  %v5412_v45 = vunpack.i.l.bf16 %v5411_v25  ;;  %v5416_v42 = vpop.permute.xlu0 %5415  ;;  %v5173_v22 = vunpack.i.h.bf16 %v6632_v49 }
 0x115   : > { %v5418_v1 = vunpack.i.h.bf16 %v5416_v42  ;;  %v5417_v0 = vunpack.i.l.bf16 %v5416_v42  ;;  %4941 = vmatmul.mubr.msk.bf16.gmra.mxu1 %vm1277_vm4, %v824_v23 }
 0x116   : > { %v2072_v29 = vsel %vm226_vm0, %v1720_v47, %v5413_v26  ;;  %v2071_v54 = vsel %vm226_vm0, %v1719_v9, %v5412_v45  ;;  %v1723_v26 = vld [vmem:[#allocation2 + $0xd8] sm:$0xff] }
 0x117   : > { %v2101_v7 = vsel %vm347_vm2, %v2069_v34, %v5417_v0  ;;  %v2102_v24 = vsel %vm347_vm2, %v2070_v35, %v5418_v1  ;;  %v5421_v50 = vpop.permute.xlu1 %5420 }
 0x118   : > { %v5423_v55 = vunpack.i.h.bf16 %v5421_v50  ;;  %v5422_v43 = vunpack.i.l.bf16 %v5421_v50  ;;  %v5426_v56 = vpop.permute.xlu0 %5425  ;;  %v2129_v12 = vpack.c.bf16 %v2102_v24, %v2101_v7 }
 0x119   : > { %v5428_v30 = vunpack.i.h.bf16 %v5426_v56  ;;  %v5427_v37 = vunpack.i.l.bf16 %v5426_v56 }
 0x11a   : > { %v2103_v41 = vsel %vm347_vm2, %v2071_v54, %v5422_v43  ;;  %v2104_v17 = vsel %vm347_vm2, %v2072_v29, %v5423_v55  ;;  %4974 = vmatprep.mubr.msk.bf16.mxu0 %vm1277_vm4, %v2129_v12  ;;  %v5167_v29 = vunpack.i.l.bf16 %v6626_v8  ;;  %v772_v8 = vsel %vm226_vm0, %v6745_v52, %v5168_v4 }
 0x11b   : > { %v799_v63 = vsel %vm347_vm2, %v767_v48, %v5427_v37  ;;  %v800_v31 = vsel %vm347_vm2, %v768_v2, %v5428_v30  ;;  %v5431_v21 = vpop.permute.xlu1 %5430  ;;  %v2130_v5 = vpack.c.bf16 %v2104_v17, %v2103_v41  ;;  %v5172_v30 = vunpack.i.l.bf16 %v6632_v49 }
 0x11c   : > { %v5433_v18 = vunpack.i.h.bf16 %v5431_v21  ;;  %v5432_v15 = vunpack.i.l.bf16 %v5431_v21  ;;  %v5436_v28 = vpop.permute.xlu0 %5435  ;;  %v825_v14 = vpack.c.bf16 %v800_v31, %v799_v63  ;;  %v771_v48 = vsel %vm226_vm0, %v6743_v57, %v5167_v29 }
 0x11d   : > { %v5438_v39 = vunpack.i.h.bf16 %v5436_v28  ;;  %v5437_v25 = vunpack.i.l.bf16 %v5436_v28  ;;  %4975 = vmatmul.mubr.msk.bf16.gmra.mxu0 %vm1277_vm4, %v2130_v5  ;;  %v774_v52 = vsel %vm226_vm0, %v6760_v20, %v5173_v22  ;;  %v773_v57 = vsel %vm226_vm0, %v6758_v19, %v5172_v30 }
 0x11e   : > { %v802_v23 = vsel %vm347_vm2, %v770_v16, %v5433_v18  ;;  %v801_v35 = vsel %vm347_vm2, %v769_v13, %v5432_v15  ;;  %4944 = vmatprep.mubr.msk.bf16.mxu1 %vm1277_vm4, %v825_v14 }
 0x11f   : > { %v5441_v34 = vpop.permute.xlu1 %5440  ;;  %v826_v9 = vpack.c.bf16 %v802_v23, %v801_v35  ;;  %v2074_v47 = vsel %vm226_vm0, %v1722_v10, %v5438_v39  ;;  %v2073_v36 = vsel %vm226_vm0, %v1721_v61, %v5437_v25 }
 0x120   : > { %v5443_v45 = vunpack.i.h.bf16 %v5441_v34  ;;  %v5442_v42 = vunpack.i.l.bf16 %v5441_v34  ;;  %v5446_v1 = vpop.permute.xlu0 %5445 }
 0x121   : > { %v5448_v0 = vunpack.i.h.bf16 %v5446_v1  ;;  %v5447_v62 = vunpack.i.l.bf16 %v5446_v1  ;;  %4945 = vmatmul.mubr.msk.bf16.gmra.mxu1 %vm1277_vm4, %v826_v9 }
 0x122   : > { %v2076_v54 = vsel %vm226_vm0, %v1724_v11, %v5443_v45  ;;  %v2075_v7 = vsel %vm226_vm0, %v1723_v26, %v5442_v42 }
 0x123   : > { %v2105_v24 = vsel %vm347_vm2, %v2073_v36, %v5447_v62  ;;  %v2106_v50 = vsel %vm347_vm2, %v2074_v47, %v5448_v0  ;;  %v5451_v55 = vpop.permute.xlu1 %5450 }
 0x124   : > { %v5453_v43 = vunpack.i.h.bf16 %v5451_v55  ;;  %v5452_v56 = vunpack.i.l.bf16 %v5451_v55  ;;  %v5456_v12 = vpop.permute.xlu0 %5455  ;;  %v2131_v3 = vpack.c.bf16 %v2106_v50, %v2105_v24 }
 0x125   : > { %v5458_v37 = vunpack.i.h.bf16 %v5456_v12  ;;  %v5457_v2 = vunpack.i.l.bf16 %v5456_v12 }
 0x126   : > { %v2107_v41 = vsel %vm347_vm2, %v2075_v7, %v5452_v56  ;;  %v2108_v17 = vsel %vm347_vm2, %v2076_v54, %v5453_v43  ;;  %4978 = vmatprep.mubr.msk.bf16.mxu0 %vm1277_vm4, %v2131_v3 }
 0x127   : > { %v803_v63 = vsel %vm347_vm2, %v771_v48, %v5457_v2  ;;  %v804_v31 = vsel %vm347_vm2, %v772_v8, %v5458_v37  ;;  %v5461_v21 = vpop.permute.xlu1 %5460  ;;  %v2132_v49 = vpack.c.bf16 %v2108_v17, %v2107_v41 }
 0x128   : > { %v5463_v5 = vunpack.i.h.bf16 %v5461_v21  ;;  %v5462_v18 = vunpack.i.l.bf16 %v5461_v21  ;;  %v827_v15 = vpack.c.bf16 %v804_v31, %v803_v63  ;;  %v5466_v28 = vpop.permute.xlu0 %5465 }
 0x129   : > { %4979 = vmatmul.mubr.msk.bf16.gmra.mxu0 %vm1277_vm4, %v2132_v49  ;;  %v5468_v14 = vunpack.i.h.bf16 %v5466_v28  ;;  %v5467_v16 = vunpack.i.l.bf16 %v5466_v28 }
 0x12a   : > { %v806_v13 = vsel %vm347_vm2, %v774_v52, %v5463_v5  ;;  %v805_v61 = vsel %vm347_vm2, %v773_v57, %v5462_v18  ;;  %4948 = vmatprep.mubr.msk.bf16.mxu1 %vm1277_vm4, %v827_v15 }
 0x12b   : > { %v5471_v10 = vpop.permute.xlu1 %5470  ;;  %v828_v39 = vpack.c.bf16 %v806_v13, %v805_v61  ;;  %v2078_v25 = vsel %vm226_vm0, %v6771_v27, %v5468_v14  ;;  %v2077_v20 = vsel %vm226_vm0, %v6769_v38, %v5467_v16 }
 0x12c   : > { %v5473_v23 = vunpack.i.h.bf16 %v5471_v10  ;;  %v5472_v19 = vunpack.i.l.bf16 %v5471_v10  ;;  %v5476_v35 = vpop.permute.xlu0 %5475 }
 0x12d   : > { %4949 = vmatmul.mubr.msk.bf16.gmra.mxu1 %vm1277_vm4, %v828_v39  ;;  %v5478_v34 = vunpack.i.h.bf16 %v5476_v35  ;;  %v5477_v9 = vunpack.i.l.bf16 %v5476_v35 }
 0x12e   : > { %v2080_v47 = vsel %vm226_vm0, %v6783_v60, %v5473_v23  ;;  %v2079_v36 = vsel %vm226_vm0, %v6781_v53, %v5472_v19 }
 0x12f   : > { %v2109_v26 = vsel %vm347_vm2, %v2077_v20, %v5477_v9  ;;  %v2110_v11 = vsel %vm347_vm2, %v2078_v25, %v5478_v34  ;;  %v5481_v45 = vpop.permute.xlu1 %5480 }
 0x130   : > { %v5483_v42 = vunpack.i.h.bf16 %v5481_v45  ;;  %v5482_v1 = vunpack.i.l.bf16 %v5481_v45  ;;  %v5486_v0 = vpop.permute.xlu0 %5485  ;;  %v2133_v62 = vpack.c.bf16 %v2110_v11, %v2109_v26 }
 0x131   : > { %v5488_v4 = vunpack.i.h.bf16 %v5486_v0  ;;  %v5487_v29 = vunpack.i.l.bf16 %v5486_v0 }
 0x132   : > { %v2111_v54 = vsel %vm347_vm2, %v2079_v36, %v5482_v1  ;;  %v2112_v7 = vsel %vm347_vm2, %v2080_v47, %v5483_v42  ;;  %4982 = vmatprep.mubr.msk.bf16.mxu0 %vm1277_vm4, %v2133_v62 }
 0x133   : > { %v5491_v24 = vpop.permute.xlu1 %5490  ;;  %v2134_v50 = vpack.c.bf16 %v2112_v7, %v2111_v54  ;;  %v776_v55 = vsel %vm226_vm0, %v6771_v27, %v5488_v4  ;;  %v775_v43 = vsel %vm226_vm0, %v6769_v38, %v5487_v29 }
 0x134   : > { %v5493_v56 = vunpack.i.h.bf16 %v5491_v24  ;;  %v5492_v12 = vunpack.i.l.bf16 %v5491_v24  ;;  %v5496_v3 = vpop.permute.xlu0 %5495 }
 0x135   : > { %4983 = vmatmul.mubr.msk.bf16.gmra.mxu0 %vm1277_vm4, %v2134_v50  ;;  %v5498_v22 = vunpack.i.h.bf16 %v5496_v3  ;;  %v5497_v30 = vunpack.i.l.bf16 %v5496_v3 }
 0x136   : > { %v778_v37 = vsel %vm226_vm0, %v6783_v60, %v5493_v56  ;;  %v777_v2 = vsel %vm226_vm0, %v6781_v53, %v5492_v12 }
 0x137   : > { %v807_v8 = vsel %vm347_vm2, %v775_v43, %v5497_v30  ;;  %v808_v27 = vsel %vm347_vm2, %v776_v55, %v5498_v22  ;;  %v5501_v48 = vpop.permute.xlu1 %5500  ;;  %v8218_v22 = vmov 0.0  }
 0x138   : > { %v5503_v41 = vunpack.i.h.bf16 %v5501_v48  ;;  %v5502_v38 = vunpack.i.l.bf16 %v5501_v48  ;;  %v5506_v17 = vpop.permute.xlu0 %5505  ;;  %v829_v63 = vpack.c.bf16 %v808_v27, %v807_v8  ;;  %357 = vst.msk [vmem:[#allocation3 + $0x40] sm:$0x3] %vm350_vm5, %v8218_v22  ;;  %351 = vst.msk [vmem:[#allocation3 + $0x10] sm:$0x3] %vm350_vm5, %v8218_v22 }
 0x139   : > { %v5508_v31 = vunpack.i.h.bf16 %v5506_v17  ;;  %v5507_v21 = vunpack.i.l.bf16 %v5506_v17  ;;  %354 = vst.msk [vmem:[#allocation3 + $0x28] sm:$0x3] %vm350_vm5, %v8218_v22  ;;  %360 = vst.msk [vmem:[#allocation3 + $0x58] sm:$0x3] %vm350_vm5, %v8218_v22 }
 0x13a   : > { %v809_v49 = vsel %vm347_vm2, %v777_v2, %v5502_v38  ;;  %v810_v5 = vsel %vm347_vm2, %v778_v37, %v5503_v41  ;;  %4952 = vmatprep.mubr.msk.bf16.mxu1 %vm1277_vm4, %v829_v63  ;;  %363 = vst.msk [vmem:[#allocation3 + $0x70] sm:$0x3] %vm350_vm5, %v8218_v22  ;;  %366 = vst.msk [vmem:[#allocation3 + $0x88] sm:$0x3] %vm350_vm5, %v8218_v22 }
 0x13b   : > { %v5511_v60 = vpop.permute.xlu1 %5510  ;;  %v830_v18 = vpack.c.bf16 %v810_v5, %v809_v49  ;;  %v2082_v53 = vsel %vm226_vm0, %v6801_v32, %v5508_v31  ;;  %v2081_v15 = vsel %vm226_vm0, %v6799_v33, %v5507_v21  ;;  %369 = vst.msk [vmem:[#allocation3 + $0xa0] sm:$0x3] %vm350_vm5, %v8218_v22  ;;  %372 = vst.msk [vmem:[#allocation3 + $0xb8] sm:$0x3] %vm350_vm5, %v8218_v22 }
 0x13c   : > { %v5513_v28 = vunpack.i.h.bf16 %v5511_v60  ;;  %v5512_v52 = vunpack.i.l.bf16 %v5511_v60  ;;  %v5516_v57 = vpop.permute.xlu0 %5515  ;;  %375 = vst.msk [vmem:[#allocation3 + $0xd0] sm:$0x3] %vm350_vm5, %v8218_v22  ;;  %378 = vst.msk [vmem:[#allocation3 + $0xe8] sm:$0x3] %vm350_vm5, %v8218_v22 }
 0x13d   : > { %4953 = vmatmul.mubr.msk.bf16.gmra.mxu1 %vm1277_vm4, %v830_v18  ;;  %v5518_v14 = vunpack.i.h.bf16 %v5516_v57  ;;  %v5517_v16 = vunpack.i.l.bf16 %v5516_v57  ;;  %381 = vst.msk [vmem:[#allocation3 + $0x100] sm:$0x3] %vm350_vm5, %v8218_v22  ;;  %384 = vst.msk [vmem:[#allocation3 + $0x118] sm:$0x3] %vm350_vm5, %v8218_v22 }
 0x13e   : > { %v2084_v13 = vsel %vm226_vm0, %v6813_v59, %v5513_v28  ;;  %v2083_v61 = vsel %vm226_vm0, %v6807_v51, %v5512_v52  ;;  %387 = vst.msk [vmem:[#allocation3 + $0x130] sm:$0x3] %vm350_vm5, %v8218_v22  ;;  %390 = vst.msk [vmem:[#allocation3 + $0x148] sm:$0x3] %vm350_vm5, %v8218_v22  ;;  %v2529_v28 = vld [vmem:[#allocation3 + $0x1] sm:$0xff] }
 0x13f   : > { %v2113_v10 = vsel %vm347_vm2, %v2081_v15, %v5517_v16  ;;  %v2114_v39 = vsel %vm347_vm2, %v2082_v53, %v5518_v14  ;;  %v5521_v25 = vpop.permute.xlu1 %5520  ;;  %393 = vst.msk [vmem:[#allocation3 + $0x160] sm:$0x3] %vm350_vm5, %v8218_v22  ;;  %396 = vst.msk [vmem:[#allocation3 + $0x178] sm:$0x3] %vm350_vm5, %v8218_v22  ;;  %v2530_v52 = vld [vmem:[#allocation3 + $0x9] sm:$0xff] }
 0x140   : > { %v5523_v20 = vunpack.i.h.bf16 %v5521_v25  ;;  %v5522_v23 = vunpack.i.l.bf16 %v5521_v25  ;;  %v5526_v19 = vpop.permute.xlu0 %5525  ;;  %v2135_v35 = vpack.c.bf16 %v2114_v39, %v2113_v10  ;;  %399 = vst.msk [vmem:[#allocation3 + $0x190] sm:$0x3] %vm350_vm5, %v8218_v22  ;;  %402 = vst.msk [vmem:[#allocation3 + $0x1a8] sm:$0x3] %vm350_vm5, %v8218_v22  ;;  %v5604_v16 = vpack.i.bf16 %v2530_v52, %v2529_v28 }
 0x141   : > { %v5528_v34 = vunpack.i.h.bf16 %v5526_v19  ;;  %v5527_v9 = vunpack.i.l.bf16 %v5526_v19 }
 0x142   : > { %v2115_v47 = vsel %vm347_vm2, %v2083_v61, %v5522_v23  ;;  %v2116_v36 = vsel %vm347_vm2, %v2084_v13, %v5523_v20  ;;  %4986 = vmatprep.mubr.msk.bf16.mxu0 %vm1277_vm4, %v2135_v35  ;;  %5605 = vrot.lane.b32.xlu0 %v5604_v16, %s6103_s26 }
 0x143   : > { %v5531_v26 = vpop.permute.xlu1 %5530  ;;  %v2136_v11 = vpack.c.bf16 %v2116_v36, %v2115_v47  ;;  %v780_v45 = vsel %vm226_vm0, %v6801_v32, %v5528_v34  ;;  %v779_v42 = vsel %vm226_vm0, %v6799_v33, %v5527_v9  ;;  %v2561_v34 = vld [vmem:[#allocation3 + $0x2] sm:$0xff]  ;;  %v2562_v9 = vld [vmem:[#allocation3 + $0xa] sm:$0xff] }
 0x144   : > { %v5533_v1 = vunpack.i.h.bf16 %v5531_v26  ;;  %v5532_v0 = vunpack.i.l.bf16 %v5531_v26  ;;  %v5536_v62 = vpop.permute.xlu0 %5535  ;;  %v5609_v26 = vpack.i.bf16 %v2562_v9, %v2561_v34 }
 0x145   : > { %4987 = vmatmul.mubr.msk.bf16.gmra.mxu0 %vm1277_vm4, %v2136_v11  ;;  %v5538_v4 = vunpack.i.h.bf16 %v5536_v62  ;;  %v5537_v29 = vunpack.i.l.bf16 %v5536_v62 }
 0x146   : > { %v782_v54 = vsel %vm226_vm0, %v6813_v59, %v5533_v1  ;;  %v781_v7 = vsel %vm226_vm0, %v6807_v51, %v5532_v0  ;;  %5610 = vrot.lane.b32.xlu0 %v5609_v26, %s6104_s8 }
 0x147   : > { %v811_v24 = vsel %vm347_vm2, %v779_v42, %v5537_v29  ;;  %v812_v32 = vsel %vm347_vm2, %v780_v45, %v5538_v4  ;;  %v5541_v50 = vpop.permute.xlu1 %5540 }
 0x148   : > { %v5543_v55 = vunpack.i.h.bf16 %v5541_v50  ;;  %v5542_v33 = vunpack.i.l.bf16 %v5541_v50  ;;  %v5546_v43 = vpop.permute.xlu0 %5545  ;;  %v831_v56 = vpack.c.bf16 %v812_v32, %v811_v24  ;;  %v8219_v50 = vld [vmem:[#allocation4_spill] sm:$0xff] }
 0x149   : > { %v5548_v12 = vunpack.i.h.bf16 %v5546_v43  ;;  %v5547_v3 = vunpack.i.l.bf16 %v5546_v43  ;;  %v1740_v43 = vld [vmem:[#allocation2 + $0x1a0] sm:$0xff] }
 0x14a   : > { %v813_v51 = vsel %vm347_vm2, %v781_v7, %v5542_v33  ;;  %v814_v59 = vsel %vm347_vm2, %v782_v54, %v5543_v55  ;;  %4956 = vmatprep.mubr.msk.bf16.mxu1 %vm1277_vm4, %v831_v56  ;;  %v1739_v33 = vld [vmem:[#allocation2 + $0x198] sm:$0xff] }
 0x14b   : > { %v5551_v30 = vpop.permute.xlu1 %5550  ;;  %v832_v37 = vpack.c.bf16 %v814_v59, %v813_v51  ;;  %v2086_v2 = vsel %vm226_vm0, %v6829_v40, %v5548_v12  ;;  %v2085_v8 = vsel %vm226_vm0, %v6827_v44, %v5547_v3 }
 0x14c   : > { %v5553_v27 = vunpack.i.h.bf16 %v5551_v30  ;;  %v5552_v48 = vunpack.i.l.bf16 %v5551_v30  ;;  %v5556_v41 = vpop.permute.xlu0 %5555 }
 0x14d   : > { %4957 = vmatmul.mubr.msk.bf16.gmra.mxu1 %vm1277_vm4, %v832_v37  ;;  %v5558_v38 = vunpack.i.h.bf16 %v5556_v41  ;;  %v5557_v17 = vunpack.i.l.bf16 %v5556_v41 }
 0x14e   : > { %v2088_v63 = vsel %vm226_vm0, %v6840_v6, %v5553_v27  ;;  %v2087_v31 = vsel %vm226_vm0, %v6838_v58, %v5552_v48 }
 0x14f   : > { %v2117_v21 = vsel %vm347_vm2, %v2085_v8, %v5557_v17  ;;  %v2118_v49 = vsel %vm347_vm2, %v2086_v2, %v5558_v38  ;;  %v5561_v5 = vpop.permute.xlu1 %5560 }
 0x150   : > { %v5563_v60 = vunpack.i.h.bf16 %v5561_v5  ;;  %v5562_v18 = vunpack.i.l.bf16 %v5561_v5  ;;  %v5566_v53 = vpop.permute.xlu0 %5565  ;;  %v2137_v15 = vpack.c.bf16 %v2118_v49, %v2117_v21 }
 0x151   : > { %v5568_v57 = vunpack.i.h.bf16 %v5566_v53  ;;  %v5567_v14 = vunpack.i.l.bf16 %v5566_v53 }
 0x152   : > { %v2119_v13 = vsel %vm347_vm2, %v2087_v31, %v5562_v18  ;;  %v2120_v61 = vsel %vm347_vm2, %v2088_v63, %v5563_v60  ;;  %4990 = vmatprep.mubr.msk.bf16.mxu0 %vm1277_vm4, %v2137_v15 }
 0x153   : > { %v5571_v10 = vpop.permute.xlu1 %5570  ;;  %v2138_v39 = vpack.c.bf16 %v2120_v61, %v2119_v13  ;;  %v784_v25 = vsel %vm226_vm0, %v6829_v40, %v5568_v57  ;;  %v783_v20 = vsel %vm226_vm0, %v6827_v44, %v5567_v14 }
 0x154   : > { %v5573_v23 = vunpack.i.h.bf16 %v5571_v10  ;;  %v5572_v19 = vunpack.i.l.bf16 %v5571_v10  ;;  %v5576_v35 = vpop.permute.xlu0 %5575 }
 0x155   : > { %4991 = vmatmul.mubr.msk.bf16.gmra.mxu0 %vm1277_vm4, %v2138_v39  ;;  %v5578_v47 = vunpack.i.h.bf16 %v5576_v35  ;;  %v5577_v36 = vunpack.i.l.bf16 %v5576_v35 }
 0x156   : > { %v786_v11 = vsel %vm226_vm0, %v6840_v6, %v5573_v23  ;;  %v785_v45 = vsel %vm226_vm0, %v6838_v58, %v5572_v19 }
 0x157   : > { %v815_v40 = vsel %vm347_vm2, %v783_v20, %v5577_v36  ;;  %v816_v44 = vsel %vm347_vm2, %v784_v25, %v5578_v47  ;;  %v5581_v42 = vpop.permute.xlu1 %5580 }
 0x158   : > { %v5583_v1 = vunpack.i.h.bf16 %v5581_v42  ;;  %v5582_v0 = vunpack.i.l.bf16 %v5581_v42  ;;  %v5586_v62 = vpop.permute.xlu0 %5585  ;;  %v833_v4 = vpack.c.bf16 %v816_v44, %v815_v40 }
 0x159   : > { %v5588_v29 = vunpack.i.h.bf16 %v5586_v62  ;;  %v5587_v54 = vunpack.i.l.bf16 %v5586_v62 }
 0x15a   : > { %v817_v7 = vsel %vm347_vm2, %v785_v45, %v5582_v0  ;;  %v818_v6 = vsel %vm347_vm2, %v786_v11, %v5583_v1  ;;  %4960 = vmatprep.mubr.msk.bf16.mxu1 %vm1277_vm4, %v833_v4 }
 0x15b   : > { %v5591_v58 = vpop.permute.xlu1 %5590  ;;  %v834_v24 = vpack.c.bf16 %v818_v6, %v817_v7  ;;  %v2090_v32 = vsel %vm226_vm0, %v6855_v46, %v5588_v29  ;;  %v2089_v55 = vsel %vm226_vm0, %v8219_v50, %v5587_v54  ;;  %v7190_v29 = vld [vmem:[%s8209_s2] ss:$0 sm:$0xff] }
 0x15c   : > { %v5593_v56 = vunpack.i.h.bf16 %v5591_v58  ;;  %v5592_v12 = vunpack.i.l.bf16 %v5591_v58  ;;  %v5596_v3 = vpop.permute.xlu0 %5595 }
 0x15d   : > { %4961 = vmatmul.mubr.msk.bf16.gmra.mxu1 %vm1277_vm4, %v834_v24  ;;  %v5598_v22 = vunpack.i.h.bf16 %v5596_v3  ;;  %v5597_v51 = vunpack.i.l.bf16 %v5596_v3  ;;  %v2498_v24 = vld [vmem:[#allocation3 + $0x8] sm:$0xff] }
 0x15e   : > { %v2092_v59 = vsel %vm226_vm0, %v1740_v43, %v5593_v56  ;;  %v2091_v30 = vsel %vm226_vm0, %v1739_v33, %v5592_v12  ;;  %v2497_v33 = vld [vmem:[#allocation3] sm:$0xff] }
 0x15f   : > { %v2121_v37 = vsel %vm347_vm2, %v2089_v55, %v5597_v51  ;;  %v2122_v46 = vsel %vm347_vm2, %v2090_v32, %v5598_v22  ;;  %v5601_v2 = vpop.permute.xlu1 %5600 }
 0x160   : > { %v2139_v8 = vpack.c.bf16 %v2122_v46, %v2121_v37  ;;  %v5603_v27 = vunpack.i.h.bf16 %v5601_v2  ;;  %v5602_v48 = vunpack.i.l.bf16 %v5601_v2 }
 0x162   : > { %v2123_v41 = vsel %vm347_vm2, %v2091_v30, %v5602_v48  ;;  %v2124_v38 = vsel %vm347_vm2, %v2092_v59, %v5603_v27  ;;  %4994 = vmatprep.mubr.msk.bf16.mxu0 %vm1277_vm4, %v2139_v8 }
 0x163   : > { %v2140_v17 = vpack.c.bf16 %v2124_v38, %v2123_v41 }
 0x165   : > { %4995 = vmatmul.mubr.msk.bf16.gmra.mxu0 %vm1277_vm4, %v2140_v17 }
 0x181   : > { %v4900_v63 = vpop.f32.mrf.mxu0 }
 0x183   : > { %v1364_v31 = vpop.f32.mrf.mxu0 }
 0x185   : > { %v4901_v21 = vpop.f32.mrf.mxu0 }
 0x187   : > { %v1367_v49 = vpop.f32.mrf.mxu0 }
 0x189   : > { %v7131_v5 = vpop.f32.mrf.mxu0 }
 0x18b   : > { %v7133_v60 = vpop.f32.mrf.mxu0 }
 0x18d   : > { %v7135_v18 = vpop.f32.mrf.mxu0 }
 0x18f   : > { %v7137_v53 = vpop.f32.mrf.mxu0 }
 0x191   : > { %v7139_v15 = vpop.f32.mrf.mxu0 }
 0x193   : > { %v7141_v28 = vpop.f32.mrf.mxu0 }
 0x195   : > { %v7143_v52 = vpop.f32.mrf.mxu0 }
 0x197   : > { %v7145_v57 = vpop.f32.mrf.mxu0 }
 0x199   : > { %v7147_v14 = vpop.f32.mrf.mxu0 }
 0x19b   : > { %v7149_v16 = vpop.f32.mrf.mxu0 }
 0x19d   : > { %v7151_v13 = vpop.f32.mrf.mxu0 }
 0x19f   : > { %v7153_v61 = vpop.f32.mrf.mxu0 }
 0x1a1   : > { %v7155_v10 = vpop.f32.mrf.mxu0 }
 0x1a3   : > { %v7157_v39 = vpop.f32.mrf.mxu0 }
 0x1a5   : > { %v7159_v25 = vpop.f32.mrf.mxu0 }
 0x1a7   : > { %v7161_v20 = vpop.f32.mrf.mxu0 }
 0x1a9   : > { %v7163_v23 = vpop.f32.mrf.mxu0 }
 0x1ab   : > { %v7165_v19 = vpop.f32.mrf.mxu0 }
 0x1ad   : > { %v7167_v35 = vpop.f32.mrf.mxu0 }
 0x1af   : > { %v7169_v34 = vpop.f32.mrf.mxu0 }
 0x1b1   : > { %v7171_v9 = vpop.f32.mrf.mxu0 }
 0x1b3   : > { %v7173_v47 = vpop.f32.mrf.mxu0 }
 0x1b4   : > { %v5606_v54 = vpop.permute.xlu0 %5605 }
 0x1b5   : > { %v7175_v36 = vpop.f32.mrf.mxu0  ;;  %v5608_v32 = vunpack.i.h.bf16 %v5606_v54  ;;  %v5607_v50 = vunpack.i.l.bf16 %v5606_v54 }
 0x1b7   : > { %v7177_v26 = vpop.f32.mrf.mxu0  ;;  %v2850_v59 = vsel %vm347_vm2, %v2498_v24, %v5608_v32  ;;  %v2849_v2 = vsel %vm347_vm2, %v2497_v33, %v5607_v50 }
 0x1b8   : > { %v5611_v8 = vpop.permute.xlu0 %5610 }
 0x1b9   : > { %v7179_v11 = vpop.f32.mrf.mxu0  ;;  %v5613_v41 = vunpack.i.h.bf16 %v5611_v8  ;;  %v5612_v38 = vunpack.i.l.bf16 %v5611_v8  ;;  %v6087_v8 = vld [vmem:[%s8210_s3 + $0x14] ss:$0 sps:$4 sm:$0xff]  }
 0x1ba   : > { %5109 = vmatprep.subr.msk.bf16.mxu1 %vm3427_vm8, %v6087_v8 }
 0x1bb   : > { %v7181_v45 = vpop.f32.mrf.mxu0 }
 0x1bd   : > { %v4934_v40 = vpop.f32.mrf.mxu1  ;;  %v7183_v44 = vpop.f32.mrf.mxu0 }
 0x1be   : > { %v1590_v62 = vadd.f32 %v4934_v40, %v4900_v63 }
 0x1bf   : > { %v1581_v42 = vpop.f32.mrf.mxu1  ;;  %v7185_v0 = vpop.f32.mrf.mxu0 }
 0x1c0   : > { %v1582_v7 = vadd.f32 %v1581_v42, %v1364_v31 }
 0x1c1   : > { %v4935_v1 = vpop.f32.mrf.mxu1 }
 0x1c2   : > { %v1593_v43 = vadd.f32 %v4935_v1, %v4901_v21  ;;  %v2882_v21 = vsel %vm2881_vm6, %v2849_v2, %v5612_v38 }
 0x1c3   : > { %v1584_v6 = vpop.f32.mrf.mxu1 }
 0x1c4   : > { %v1585_v3 = vadd.f32 %v1584_v6, %v1367_v49  ;;  %v2883_v49 = vsel %vm2881_vm6, %v2850_v59, %v5613_v41 }
 0x1c5   : > { %v4968_v4 = vpop.f32.mrf.mxu0 }
 0x1c6   : > { %v2363_v58 = vadd.f32 %v4968_v4, %v1590_v62  ;;  %v2914_v62 = vpack.c.bf16 %v2883_v49, %v2882_v21  ;;  %v3429_v21 = vsel %vm3427_vm8, %v6087_v8, 0 }
 0x1c7   : > { %v2234_v55 = vpop.f32.mrf.mxu0  ;;  %4999 = vmatpush3.bf16.msra.mxu1 %v3429_v21 }
 0x1c8   : > { %v2402_v56 = vadd.f32 %v7190_v29, %v2363_v58  ;;  %v2361_v12 = vadd.f32 %v2234_v55, %v1582_v7  ;;  %5038 = vmatprep.mubr.msk.bf16.mxu0 %vm3378_vm7, %v2914_v62 }
 0x1c9   : > { %v4938_v22 = vpop.f32.mrf.mxu1  ;;  %v4969_v51 = vpop.f32.mrf.mxu0 }
 0x1ca   : > { %v2434_v30 = vmax.f32 %v2402_v56, 0.0  ;;  %v2400_v37 = vadd.f32 %v7190_v29, %v2361_v12  ;;  %v2364_v46 = vadd.f32 %v4969_v51, %v1593_v43  ;;  %v1606_v4 = vadd.f32 %v4938_v22, %v7131_v5  ;;  %v6088_v56 = vld [vmem:[%s8210_s3 + $0x8] ss:$0 sps:$4 sm:$0xff]  }
 0x1cb   : > { %v1597_v27 = vpop.f32.mrf.mxu1  ;;  %v2237_v48 = vpop.f32.mrf.mxu0  ;;  %5110 = vmatprep.subr.msk.bf16.mxu0 %vm3427_vm8, %v6088_v56 }
 0x1cc   : > { %2467 = vst.msk [vmem:[#allocation3 + $0x31] sm:$0xff] %vm347_vm2, %v2434_v30  ;;  %v2432_v17 = vmax.f32 %v2400_v37, 0.0  ;;  %v2403_v63 = vadd.f32 %v7190_v29, %v2364_v46  ;;  %v2362_v31 = vadd.f32 %v2237_v48, %v1585_v3  ;;  %v1598_v6 = vadd.f32 %v1597_v27, %v7133_v60 }
 0x1cd   : > { %v4939_v1 = vpop.f32.mrf.mxu1  ;;  %v3650_v27 = vsel %vm3427_vm8, %v6088_v56, 0 }
 0x1ce   : > { %2465 = vst.msk [vmem:[#allocation3 + $0x19] sm:$0xff] %vm347_vm2, %v2432_v17  ;;  %v2435_v40 = vmax.f32 %v2403_v63, 0.0  ;;  %v2401_v42 = vadd.f32 %v7190_v29, %v2362_v31  ;;  %v1609_v50 = vadd.f32 %v4939_v1, %v7135_v18  ;;  %5035 = vmatpush3.bf16.msra.mxu0 %v3650_v27  ;;  %v6089_v63 = vld [vmem:[%s8210_s3] sm:$0xff]  }
 0x1cf   : > { %v1600_v24 = vpop.f32.mrf.mxu1  ;;  %5036 = vmatprep.subr.bf16.mxu0 %v6089_v63 }
 0x1d0   : > { %2468 = vst.msk [vmem:[#allocation3 + $0x39] sm:$0xff] %vm347_vm2, %v2435_v40  ;;  %v2433_v54 = vmax.f32 %v2401_v42, 0.0  ;;  %v1601_v60 = vadd.f32 %v1600_v24, %v7137_v53 }
 0x1d1   : > { %v4972_v7 = vpop.f32.mrf.mxu0 }
 0x1d2   : > { %2466 = vst.msk [vmem:[#allocation3 + $0x21] sm:$0xff] %vm347_vm2, %v2433_v54  ;;  %v2367_v58 = vadd.f32 %v4972_v7, %v1606_v4  ;;  %5037 = vmatpush3.bf16.msra.mxu0 %v6089_v63 }
 0x1d3   : > { %v2250_v32 = vpop.f32.mrf.mxu0  ;;  %v3846_v2 = vld [vmem:[#allocation3 + $0x31] sm:$0xff] }
 0x1d4   : > { %v2406_v55 = vadd.f32 %v7190_v29, %v2367_v58  ;;  %v2365_v33 = vadd.f32 %v2250_v32, %v1598_v6 }
 0x1d5   : > { %v4942_v5 = vpop.f32.mrf.mxu1  ;;  %v4973_v43 = vpop.f32.mrf.mxu0  ;;  %v2531_v32 = vld [vmem:[#allocation3 + $0x19] sm:$0xff] }
 0x1d6   : > { %v2438_v12 = vmax.f32 %v2406_v55, 0.0  ;;  %v2404_v3 = vadd.f32 %v7190_v29, %v2365_v33  ;;  %v2368_v22 = vadd.f32 %v4973_v43, %v1609_v50  ;;  %v1622_v49 = vadd.f32 %v4942_v5, %v7139_v15 }
 0x1d7   : > { %v1613_v51 = vpop.f32.mrf.mxu1  ;;  %v2253_v59 = vpop.f32.mrf.mxu0  ;;  %v3847_v30 = vld [vmem:[#allocation3 + $0x39] sm:$0xff] }
 0x1d8   : > { %2471 = vst.msk [vmem:[#allocation3 + $0x61] sm:$0xff] %vm347_vm2, %v2438_v12  ;;  %v2436_v18 = vmax.f32 %v2404_v3, 0.0  ;;  %v2407_v37 = vadd.f32 %v7190_v29, %v2368_v22  ;;  %v2366_v46 = vadd.f32 %v2253_v59, %v1601_v60  ;;  %v5624_v53 = vpack.i.bf16 %v3847_v30, %v3846_v2  ;;  %v3878_v38 = vld [vmem:[#allocation3 + $0x32] sm:$0xff]  ;;  %v3879_v17 = vld [vmem:[#allocation3 + $0x3a] sm:$0xff] }
 0x1d9   : > { %v4943_v31 = vpop.f32.mrf.mxu1  ;;  %v5629_v1 = vpack.i.bf16 %v3879_v17, %v3878_v38  ;;  %v1614_v62 = vadd.f32 %v1613_v51, %v7141_v28  ;;  %v2532_v54 = vld [vmem:[#allocation3 + $0x21] sm:$0xff] }
 0x1da   : > { %2469 = vst.msk [vmem:[#allocation3 + $0x49] sm:$0xff] %vm347_vm2, %v2436_v18  ;;  %v2439_v48 = vmax.f32 %v2407_v37, 0.0  ;;  %v2405_v41 = vadd.f32 %v7190_v29, %v2366_v46  ;;  %5625 = vrot.lane.b32.xlu0 %v5624_v53, %s6103_s26  ;;  %5615 = vrot.lane.b32.xlu1 %v5624_v53, %s6103_s26  ;;  %v1625_v6 = vadd.f32 %v4943_v31, %v7143_v52  ;;  %v2563_v60 = vld [vmem:[#allocation3 + $0x1a] sm:$0xff]  ;;  %v2564_v12 = vld [vmem:[#allocation3 + $0x22] sm:$0xff] }
 0x1db   : > { %v1616_v7 = vpop.f32.mrf.mxu1  ;;  %v5654_v28 = vpack.i.bf16 %v2532_v54, %v2531_v32  ;;  %v5659_v30 = vpack.i.bf16 %v2564_v12, %v2563_v60 }
 0x1dc   : > { %2472 = vst.msk [vmem:[#allocation3 + $0x69] sm:$0xff] %vm347_vm2, %v2439_v48  ;;  %v2437_v40 = vmax.f32 %v2405_v41, 0.0  ;;  %v1617_v33 = vadd.f32 %v1616_v7, %v7145_v57  ;;  %v6090_v57 = vld [vmem:[%s8210_s3 + $0xc] sm:$0xff]  }
 0x1dd   : > { %v4976_v42 = vpop.f32.mrf.mxu0  ;;  %5000 = vmatprep.subr.bf16.mxu1 %v6090_v57 }
 0x1de   : > { %2470 = vst.msk [vmem:[#allocation3 + $0x51] sm:$0xff] %vm347_vm2, %v2437_v40  ;;  %v2371_v4 = vadd.f32 %v4976_v42, %v1622_v49  ;;  %5630 = vrot.lane.b32.xlu0 %v5629_v1, %s6104_s8  ;;  %5620 = vrot.lane.b32.xlu1 %v5629_v1, %s6104_s8 }
 0x1df   : > { %v2266_v15 = vpop.f32.mrf.mxu0  ;;  %v2971_v27 = vld [vmem:[#allocation3 + $0x61] sm:$0xff]  ;;  %5001 = vmatpush3.bf16.msra.mxu1 %v6090_v57 }
 0x1e0   : > { %v2410_v58 = vadd.f32 %v7190_v29, %v2371_v4  ;;  %v2369_v24 = vadd.f32 %v2266_v15, %v1614_v62 }
 0x1e1   : > { %v4946_v50 = vpop.f32.mrf.mxu1  ;;  %v4977_v55 = vpop.f32.mrf.mxu0 }
 0x1e2   : > { %v2442_v5 = vmax.f32 %v2410_v58, 0.0  ;;  %v2408_v43 = vadd.f32 %v7190_v29, %v2369_v24  ;;  %v2372_v56 = vadd.f32 %v4977_v55, %v1625_v6  ;;  %5635 = vrot.lane.b32.xlu0 %v5624_v53, %s6103_s26  ;;  %5655 = vrot.lane.b32.xlu1 %v5654_v28, %s6103_s26  ;;  %v1638_v8 = vadd.f32 %v4946_v50, %v7147_v14  ;;  %v3848_v55 = vld [vmem:[#allocation3 + $0x49] sm:$0xff] }
 0x1e3   : > { %v1629_v52 = vpop.f32.mrf.mxu1  ;;  %v2269_v3 = vpop.f32.mrf.mxu0  ;;  %v2972_v46 = vld [vmem:[#allocation3 + $0x69] sm:$0xff] }
 0x1e4   : > { %2475 = vst.msk [vmem:[#allocation3 + $0x91] sm:$0xff] %vm347_vm2, %v2442_v5  ;;  %v2440_v22 = vmax.f32 %v2408_v43, 0.0  ;;  %v2411_v51 = vadd.f32 %v7190_v29, %v2372_v56  ;;  %v2370_v59 = vadd.f32 %v2269_v3, %v1617_v33  ;;  %v5664_v41 = vpack.i.bf16 %v2972_v46, %v2971_v27  ;;  %v3003_v63 = vld [vmem:[#allocation3 + $0x62] sm:$0xff]  ;;  %v3004_v31 = vld [vmem:[#allocation3 + $0x6a] sm:$0xff] }
 0x1e5   : > { %v4947_v2 = vpop.f32.mrf.mxu1  ;;  %v1630_v38 = vadd.f32 %v1629_v52, %v7149_v16  ;;  %v5669_v4 = vpack.i.bf16 %v3004_v31, %v3003_v63  ;;  %v3849_v6 = vld [vmem:[#allocation3 + $0x51] sm:$0xff] }
 0x1e6   : > { %2473 = vst.msk [vmem:[#allocation3 + $0x79] sm:$0xff] %vm347_vm2, %v2440_v22  ;;  %v2443_v18 = vmax.f32 %v2411_v51, 0.0  ;;  %v2409_v37 = vadd.f32 %v7190_v29, %v2370_v59  ;;  %5640 = vrot.lane.b32.xlu0 %v5629_v1, %s6104_s8  ;;  %5660 = vrot.lane.b32.xlu1 %v5659_v30, %s6104_s8  ;;  %v1641_v49 = vadd.f32 %v4947_v2, %v7151_v13  ;;  %v3880_v5 = vld [vmem:[#allocation3 + $0x4a] sm:$0xff]  ;;  %v3881_v43 = vld [vmem:[#allocation3 + $0x52] sm:$0xff] }
 0x1e7   : > { %v1632_v21 = vpop.f32.mrf.mxu1  ;;  %v5709_v3 = vpack.i.bf16 %v3881_v43, %v3880_v5 }
 0x1e8   : > { %2476 = vst.msk [vmem:[#allocation3 + $0x99] sm:$0xff] %vm347_vm2, %v2443_v18  ;;  %v2441_v53 = vmax.f32 %v2409_v37, 0.0  ;;  %v1633_v16 = vadd.f32 %v1632_v21, %v7153_v61 }
 0x1e9   : > { %v4980_v48 = vpop.f32.mrf.mxu0 }
 0x1ea   : > { %2474 = vst.msk [vmem:[#allocation3 + $0x81] sm:$0xff] %vm347_vm2, %v2441_v53  ;;  %v2375_v17 = vadd.f32 %v4980_v48, %v1638_v8  ;;  %5645 = vrot.lane.b32.xlu0 %v5654_v28, %s6103_s26  ;;  %5665 = vrot.lane.b32.xlu1 %v5664_v41, %s6103_s26  ;;  %v5704_v28 = vpack.i.bf16 %v3849_v6, %v3848_v55 }
 0x1eb   : > { %v2282_v14 = vpop.f32.mrf.mxu0  ;;  %v2975_v21 = vld [vmem:[#allocation3 + $0x91] sm:$0xff] }
 0x1ec   : > { %v2414_v40 = vadd.f32 %v7190_v29, %v2375_v17  ;;  %v2373_v42 = vadd.f32 %v2282_v14, %v1630_v38 }
 0x1ed   : > { %v4950_v1 = vpop.f32.mrf.mxu1  ;;  %v4981_v62 = vpop.f32.mrf.mxu0 }
 0x1ee   : > { %v2446_v54 = vmax.f32 %v2414_v40, 0.0  ;;  %v2412_v7 = vadd.f32 %v7190_v29, %v2373_v42  ;;  %v2376_v15 = vadd.f32 %v4981_v62, %v1641_v49  ;;  %5650 = vrot.lane.b32.xlu0 %v5659_v30, %s6104_s8  ;;  %5670 = vrot.lane.b32.xlu1 %v5669_v4, %s6104_s8  ;;  %v1654_v60 = vadd.f32 %v4950_v1, %v7155_v10 }
 0x1ef   : > { %v1645_v58 = vpop.f32.mrf.mxu1  ;;  %v2285_v24 = vpop.f32.mrf.mxu0  ;;  %v2976_v63 = vld [vmem:[#allocation3 + $0x99] sm:$0xff] }
 0x1f0   : > { %2479 = vst.msk [vmem:[#allocation3 + $0xc1] sm:$0xff] %vm347_vm2, %v2446_v54  ;;  %v2444_v13 = vmax.f32 %v2412_v7, 0.0  ;;  %v2415_v32 = vadd.f32 %v7190_v29, %v2376_v15  ;;  %v2374_v50 = vadd.f32 %v2285_v24, %v1633_v16  ;;  %v1646_v22 = vadd.f32 %v1645_v58, %v7157_v39  ;;  %v3007_v49 = vld [vmem:[#allocation3 + $0x92] sm:$0xff]  ;;  %v3008_v40 = vld [vmem:[#allocation3 + $0x9a] sm:$0xff] }
 0x1f1   : > { %v4951_v56 = vpop.f32.mrf.mxu1  ;;  %v5724_v14 = vpack.i.bf16 %v2976_v63, %v2975_v21  ;;  %v3853_v7 = vld [vmem:[#allocation3 + $0x81] sm:$0xff] }
 0x1f2   : > { %2477 = vst.msk [vmem:[#allocation3 + $0xa9] sm:$0xff] %vm347_vm2, %v2444_v13  ;;  %v2447_v61 = vmax.f32 %v2415_v32, 0.0  ;;  %v2413_v33 = vadd.f32 %v7190_v29, %v2374_v50  ;;  %5675 = vrot.lane.b32.xlu0 %v5664_v41, %s6103_s26  ;;  %5705 = vrot.lane.b32.xlu1 %v5704_v28, %s6103_s26  ;;  %v1657_v30 = vadd.f32 %v4951_v56, %v7159_v25  ;;  %v3852_v32 = vld [vmem:[#allocation3 + $0x79] sm:$0xff]  ;;  %v3885_v5 = vld [vmem:[#allocation3 + $0x82] sm:$0xff] }
 0x1f3   : > { %v1648_v59 = vpop.f32.mrf.mxu1 }
 0x1f4   : > { %2480 = vst.msk [vmem:[#allocation3 + $0xc9] sm:$0xff] %vm347_vm2, %v2447_v61  ;;  %v2445_v12 = vmax.f32 %v2413_v33, 0.0  ;;  %v1649_v46 = vadd.f32 %v1648_v59, %v7161_v20  ;;  %v3884_v33 = vld [vmem:[#allocation3 + $0x7a] sm:$0xff] }
 0x1f5   : > { %v4984_v52 = vpop.f32.mrf.mxu0 }
 0x1f6   : > { %2478 = vst.msk [vmem:[#allocation3 + $0xb1] sm:$0xff] %vm347_vm2, %v2445_v12  ;;  %v2379_v51 = vadd.f32 %v4984_v52, %v1654_v60  ;;  %5680 = vrot.lane.b32.xlu0 %v5669_v4, %s6104_s8  ;;  %5710 = vrot.lane.b32.xlu1 %v5709_v3, %s6104_s8  ;;  %v5769_v52 = vpack.i.bf16 %v3885_v5, %v3884_v33 }
 0x1f7   : > { %v2298_v57 = vpop.f32.mrf.mxu0 }
 0x1f8   : > { %v2418_v10 = vadd.f32 %v7190_v29, %v2379_v51  ;;  %v2377_v18 = vadd.f32 %v2298_v57, %v1646_v22 }
 0x1f9   : > { %v4985_v37 = vpop.f32.mrf.mxu0 }
 0x1fa   : > { %v2450_v2 = vmax.f32 %v2418_v10, 0.0  ;;  %v2416_v39 = vadd.f32 %v7190_v29, %v2377_v18  ;;  %v2380_v8 = vadd.f32 %v4985_v37, %v1657_v30  ;;  %5685 = vrot.lane.b32.xlu0 %v5664_v41, %s6103_s26  ;;  %5715 = vrot.lane.b32.xlu1 %v5704_v28, %s6103_s26 }
 0x1fb   : > { %v2301_v53 = vpop.f32.mrf.mxu0  ;;  %v2980_v37 = vld [vmem:[#allocation3 + $0xc9] sm:$0xff] }
 0x1fc   : > { %2483 = vst.msk [vmem:[#allocation3 + $0xf1] sm:$0xff] %vm347_vm2, %v2450_v2  ;;  %v2448_v27 = vmax.f32 %v2416_v39, 0.0  ;;  %v2419_v25 = vadd.f32 %v7190_v29, %v2380_v8  ;;  %v2378_v48 = vadd.f32 %v2301_v53, %v1649_v46  ;;  %v3011_v63 = vld [vmem:[#allocation3 + $0xc2] sm:$0xff] }
 0x1fd   : > { %v4954_v38 = vpop.f32.mrf.mxu1 }
 0x1fe   : > { %2481 = vst.msk [vmem:[#allocation3 + $0xd9] sm:$0xff] %vm347_vm2, %v2448_v27  ;;  %v2451_v17 = vmax.f32 %v2419_v25, 0.0  ;;  %v2417_v20 = vadd.f32 %v7190_v29, %v2378_v48  ;;  %5690 = vrot.lane.b32.xlu0 %v5669_v4, %s6104_s8  ;;  %5720 = vrot.lane.b32.xlu1 %v5709_v3, %s6104_s8  ;;  %v1670_v1 = vadd.f32 %v4954_v38, %v7163_v23  ;;  %v2979_v27 = vld [vmem:[#allocation3 + $0xc1] sm:$0xff] }
 0x1ff   : > { %v1661_v41 = vpop.f32.mrf.mxu1  ;;  %v5729_v4 = vpack.i.bf16 %v3008_v40, %v3007_v49  ;;  %v5764_v23 = vpack.i.bf16 %v3853_v7, %v3852_v32  ;;  %v7322_v25 = vpack.i.bf16 %v2980_v37, %v2979_v27  ;;  %v3888_v7 = vld [vmem:[#allocation3 + $0xaa] sm:$0xff] }
 0x200   : > { %2484 = vst.msk [vmem:[#allocation3 + $0xf9] sm:$0xff] %vm347_vm2, %v2451_v17  ;;  %v2449_v31 = vmax.f32 %v2417_v20, 0.0  ;;  %v1662_v16 = vadd.f32 %v1661_v41, %v7165_v19 }
 0x201   : > { %v4955_v42 = vpop.f32.mrf.mxu1 }
 0x202   : > { %2482 = vst.msk [vmem:[#allocation3 + $0xe1] sm:$0xff] %vm347_vm2, %v2449_v31  ;;  %5695 = vrot.lane.b32.xlu0 %v5704_v28, %s6103_s26  ;;  %5725 = vrot.lane.b32.xlu1 %v5724_v14, %s6103_s26  ;;  %v1673_v58 = vadd.f32 %v4955_v42, %v7167_v35 }
 0x203   : > { %v1664_v15 = vpop.f32.mrf.mxu1 }
 0x204   : > { %v1665_v55 = vadd.f32 %v1664_v15, %v7169_v34  ;;  %v3889_v15 = vld [vmem:[#allocation3 + $0xb2] sm:$0xff] }
 0x205   : > { %v4988_v62 = vpop.f32.mrf.mxu0 }
 0x206   : > { %v2383_v54 = vadd.f32 %v4988_v62, %v1670_v1  ;;  %5700 = vrot.lane.b32.xlu0 %v5709_v3, %s6104_s8  ;;  %5730 = vrot.lane.b32.xlu1 %v5729_v4, %s6104_s8  ;;  %v3857_v1 = vld [vmem:[#allocation3 + $0xb1] sm:$0xff] }
 0x207   : > { %v2314_v6 = vpop.f32.mrf.mxu0 }
 0x208   : > { %v2422_v24 = vadd.f32 %v7190_v29, %v2383_v54  ;;  %v2381_v13 = vadd.f32 %v2314_v6, %v1662_v16  ;;  %v3856_v16 = vld [vmem:[#allocation3 + $0xa9] sm:$0xff] }
 0x209   : > { %v4989_v50 = vpop.f32.mrf.mxu0  ;;  %v5814_v54 = vpack.i.bf16 %v3857_v1, %v3856_v16 }
 0x20a   : > { %v2454_v28 = vmax.f32 %v2422_v24, 0.0  ;;  %v2420_v19 = vadd.f32 %v7190_v29, %v2381_v13  ;;  %v2384_v61 = vadd.f32 %v4989_v50, %v1673_v58  ;;  %5735 = vrot.lane.b32.xlu0 %v5724_v14, %s6103_s26  ;;  %5765 = vrot.lane.b32.xlu1 %v5764_v23, %s6103_s26  ;;  %v5819_v13 = vpack.i.bf16 %v3889_v15, %v3888_v7 }
 0x20b   : > { %v2317_v43 = vpop.f32.mrf.mxu0 }
 0x20c   : > { %2487 = vst.msk [vmem:[#allocation3 + $0x121] sm:$0xff] %vm347_vm2, %v2454_v28  ;;  %v2452_v35 = vmax.f32 %v2420_v19, 0.0  ;;  %v2423_v56 = vadd.f32 %v7190_v29, %v2384_v61  ;;  %v2382_v60 = vadd.f32 %v2317_v43, %v1665_v55 }
 0x20d   : > { %v4958_v12 = vpop.f32.mrf.mxu1 }
 0x20e   : > { %2485 = vst.msk [vmem:[#allocation3 + $0x109] sm:$0xff] %vm347_vm2, %v2452_v35  ;;  %v2455_v34 = vmax.f32 %v2423_v56, 0.0  ;;  %v2421_v3 = vadd.f32 %v7190_v29, %v2382_v60  ;;  %5740 = vrot.lane.b32.xlu0 %v5729_v4, %s6104_s8  ;;  %5770 = vrot.lane.b32.xlu1 %v5769_v52, %s6104_s8  ;;  %v1686_v57 = vadd.f32 %v4958_v12, %v7171_v9  ;;  %v7320_v9 = vld [vmem:[%s8210_s3 + $0x20] ss:$0 sps:$4 sm:$0xff]  }
 0x20f   : > { %v1677_v22 = vpop.f32.mrf.mxu1  ;;  %5111 = vmatprep.subr.msk.bf16.mxu1 %vm3427_vm8, %v7320_v9 }
 0x210   : > { %2488 = vst.msk [vmem:[#allocation3 + $0x129] sm:$0xff] %vm347_vm2, %v2455_v34  ;;  %v2453_v51 = vmax.f32 %v2421_v3, 0.0  ;;  %v1678_v10 = vadd.f32 %v1677_v22, %v7173_v47  ;;  %v2984_v34 = vld [vmem:[#allocation3 + $0xf9] sm:$0xff] }
 0x211   : > { %v4959_v59 = vpop.f32.mrf.mxu1  ;;  %v2981_v22 = vld [vmem:[#allocation3 + $0xd9] sm:$0xff] }
 0x212   : > { %2486 = vst.msk [vmem:[#allocation3 + $0x111] sm:$0xff] %vm347_vm2, %v2453_v51  ;;  %5745 = vrot.lane.b32.xlu0 %v5724_v14, %s6103_s26  ;;  %5775 = vrot.lane.b32.xlu1 %v5764_v23, %s6103_s26  ;;  %v1689_v39 = vadd.f32 %v4959_v59, %v7175_v36  ;;  %v3012_v36 = vld [vmem:[#allocation3 + $0xca] sm:$0xff] }
 0x213   : > { %v1680_v46 = vpop.f32.mrf.mxu1  ;;  %v7333_v49 = vpack.i.bf16 %v3012_v36, %v3011_v63  ;;  %v2983_v51 = vld [vmem:[#allocation3 + $0xf1] sm:$0xff] }
 0x214   : > { %v1681_v48 = vadd.f32 %v1680_v46, %v7177_v26 }
 0x215   : > { %v4992_v30 = vpop.f32.mrf.mxu0 }
 0x216   : > { %v2387_v18 = vadd.f32 %v4992_v30, %v1686_v57  ;;  %5750 = vrot.lane.b32.xlu0 %v5729_v4, %s6104_s8  ;;  %5780 = vrot.lane.b32.xlu1 %v5769_v52, %s6104_s8  ;;  %v7365_v57 = vpack.i.bf16 %v2984_v34, %v2983_v51  ;;  %v3015_v30 = vld [vmem:[#allocation3 + $0xf2] sm:$0xff] }
 0x217   : > { %v2330_v2 = vpop.f32.mrf.mxu0 }
 0x218   : > { %v2426_v8 = vadd.f32 %v7190_v29, %v2387_v18  ;;  %v2385_v53 = vadd.f32 %v2330_v2, %v1678_v10  ;;  %v3013_v10 = vld [vmem:[#allocation3 + $0xda] sm:$0xff] }
 0x219   : > { %v4993_v47 = vpop.f32.mrf.mxu0  ;;  %v3016_v18 = vld [vmem:[#allocation3 + $0xfa] sm:$0xff]  ;;  %v2986_v2 = vld [vmem:[#allocation3 + $0x111] sm:$0xff] }
 0x21a   : > { %v2458_v38 = vmax.f32 %v2426_v8, 0.0  ;;  %v2424_v17 = vadd.f32 %v7190_v29, %v2385_v53  ;;  %v2388_v20 = vadd.f32 %v4993_v47, %v1689_v39  ;;  %5755 = vrot.lane.b32.xlu0 %v5764_v23, %s6103_s26  ;;  %5785 = vrot.lane.b32.xlu1 %v7322_v25, %s6103_s26  ;;  %v7374_v46 = vpack.i.bf16 %v3016_v18, %v3015_v30  ;;  %v2985_v39 = vld [vmem:[#allocation3 + $0x109] sm:$0xff]  ;;  %v3018_v27 = vld [vmem:[#allocation3 + $0x112] sm:$0xff] }
 0x21b   : > { %v2333_v41 = vpop.f32.mrf.mxu0  ;;  %v7380_v8 = vpack.i.bf16 %v2986_v2, %v2985_v39  ;;  %v3017_v53 = vld [vmem:[#allocation3 + $0x10a] sm:$0xff] }
 0x21c   : > { %2491 = vst.msk [vmem:[#allocation3 + $0x151] sm:$0xff] %vm347_vm2, %v2458_v38  ;;  %v2456_v31 = vmax.f32 %v2424_v17, 0.0  ;;  %v2427_v26 = vadd.f32 %v7190_v29, %v2388_v20  ;;  %v2386_v21 = vadd.f32 %v2333_v41, %v1681_v48  ;;  %v7386_v47 = vpack.i.bf16 %v3018_v27, %v3017_v53  ;;  %v2988_v38 = vld [vmem:[#allocation3 + $0x129] sm:$0xff]  ;;  %v2987_v20 = vld [vmem:[#allocation3 + $0x121] sm:$0xff]  ;;  %v2499_v53 = vld [vmem:[#allocation3 + $0x18] sm:$0xff] }
 0x21d   : > { %v4962_v14 = vpop.f32.mrf.mxu1  ;;  %v7394_v36 = vpack.i.bf16 %v2988_v38, %v2987_v20  ;;  %v3019_v41 = vld [vmem:[#allocation3 + $0x122] sm:$0xff] }
 0x21e   : > { %2489 = vst.msk [vmem:[#allocation3 + $0x139] sm:$0xff] %vm347_vm2, %v2456_v31  ;;  %v2459_v40 = vmax.f32 %v2427_v26, 0.0  ;;  %v2425_v42 = vadd.f32 %v7190_v29, %v2386_v21  ;;  %5760 = vrot.lane.b32.xlu0 %v5769_v52, %s6104_s8  ;;  %5790 = vrot.lane.b32.xlu1 %v7333_v49, %s6104_s8  ;;  %v1702_v58 = vadd.f32 %v4962_v14, %v7179_v11  ;;  %v2982_v52 = vld [vmem:[#allocation3 + $0xe1] sm:$0xff]  ;;  %v3020_v21 = vld [vmem:[#allocation3 + $0x12a] sm:$0xff] }
 0x21f   : > { %v1693_v62 = vpop.f32.mrf.mxu1  ;;  %v7363_v59 = vpack.i.bf16 %v2982_v52, %v2981_v22  ;;  %v2500_v27 = vld [vmem:[#allocation3 + $0x20] sm:$0xff] }
 0x220   : > { %2492 = vst.msk [vmem:[#allocation3 + $0x159] sm:$0xff] %vm347_vm2, %v2459_v40  ;;  %v2457_v4 = vmax.f32 %v2425_v42, 0.0  ;;  %v1694_v32 = vadd.f32 %v1693_v62, %v7181_v45  ;;  %v7402_v40 = vpack.i.bf16 %v3020_v21, %v3019_v41 }
 0x221   : > { %v4963_v6 = vpop.f32.mrf.mxu1 }
 0x222   : > { %2490 = vst.msk [vmem:[#allocation3 + $0x141] sm:$0xff] %vm347_vm2, %v2457_v4  ;;  %5795 = vrot.lane.b32.xlu0 %v7322_v25, %s6103_s26  ;;  %5815 = vrot.lane.b32.xlu1 %v5814_v54, %s6103_s26  ;;  %v1705_v28 = vadd.f32 %v4963_v6, %v7183_v44 }
 0x223   : > { %v1696_v23 = vpop.f32.mrf.mxu1  ;;  %v2991_v4 = vld [vmem:[#allocation3 + $0x151] sm:$0xff] }
 0x224   : > { %v1697_v11 = vadd.f32 %v1696_v23, %v7185_v0 }
 0x225   : > { %v4996_v24 = vpop.f32.mrf.mxu0  ;;  %v2989_v17 = vld [vmem:[#allocation3 + $0x139] sm:$0xff] }
 0x226   : > { %v2391_v50 = vadd.f32 %v4996_v24, %v1702_v58  ;;  %5800 = vrot.lane.b32.xlu0 %v7333_v49, %s6104_s8  ;;  %5820 = vrot.lane.b32.xlu1 %v5819_v13, %s6104_s8 }
 0x227   : > { %v2346_v55 = vpop.f32.mrf.mxu0  ;;  %v2992_v1 = vld [vmem:[#allocation3 + $0x159] sm:$0xff] }
 0x228   : > { %v2430_v19 = vadd.f32 %v7190_v29, %v2391_v50  ;;  %v2389_v61 = vadd.f32 %v2346_v55, %v1694_v32  ;;  %v3023_v7 = vld [vmem:[#allocation3 + $0x152] sm:$0xff]  ;;  %v3024_v58 = vld [vmem:[#allocation3 + $0x15a] sm:$0xff] }
 0x229   : > { %v4997_v33 = vpop.f32.mrf.mxu0  ;;  %v2990_v48 = vld [vmem:[#allocation3 + $0x141] sm:$0xff]  ;;  %v7420_v50 = vpack.i.bf16 %v3024_v58, %v3023_v7 }
 0x22a   : > { %v2462_v5 = vmax.f32 %v2430_v19, 0.0  ;;  %v2428_v43 = vadd.f32 %v7190_v29, %v2389_v61  ;;  %v2392_v45 = vadd.f32 %v4997_v33, %v1705_v28  ;;  %5805 = vrot.lane.b32.xlu0 %v5814_v54, %s6103_s26  ;;  %5825 = vrot.lane.b32.xlu1 %v5814_v54, %s6103_s26  ;;  %v7392_v63 = vpack.i.bf16 %v2990_v48, %v2989_v17  ;;  %v3021_v31 = vld [vmem:[#allocation3 + $0x13a] sm:$0xff]  ;;  %v3022_v26 = vld [vmem:[#allocation3 + $0x142] sm:$0xff]  ;;  %v7422_v19 = vld [vmem:[#allocation3 + $0x30] sm:$0xff] }
 0x22b   : > { %v2349_v35 = vpop.f32.mrf.mxu0  ;;  %v7400_v14 = vpack.i.bf16 %v3022_v26, %v3021_v31  ;;  %v7410_v54 = vpack.i.bf16 %v2992_v1, %v2991_v4  ;;  %v7424_v61 = vld [vmem:[#allocation3 + $0x38] sm:$0xff] }
 0x22c   : > { %2495 = vst.msk [vmem:[#allocation3 + $0x181] sm:$0xff] %vm347_vm2, %v2462_v5  ;;  %v2460_v56 = vmax.f32 %v2428_v43, 0.0  ;;  %v2431_v44 = vadd.f32 %v7190_v29, %v2392_v45  ;;  %v2390_v60 = vadd.f32 %v2349_v35, %v1697_v11 }
 0x22e   : > { %2493 = vst.msk [vmem:[#allocation3 + $0x169] sm:$0xff] %vm347_vm2, %v2460_v56  ;;  %v2463_v12 = vmax.f32 %v2431_v44, 0.0  ;;  %v2429_v0 = vadd.f32 %v7190_v29, %v2390_v60  ;;  %5810 = vrot.lane.b32.xlu0 %v5819_v13, %s6104_s8  ;;  %5830 = vrot.lane.b32.xlu1 %v5819_v13, %s6104_s8  ;;  %v3014_v29 = vld [vmem:[#allocation3 + $0xe2] sm:$0xff] }
 0x22f   : > { %v7372_v37 = vpack.i.bf16 %v3014_v29, %v3013_v10 }
 0x230   : > { %2496 = vst.msk [vmem:[#allocation3 + $0x189] sm:$0xff] %vm347_vm2, %v2463_v12  ;;  %v2461_v3 = vmax.f32 %v2429_v0, 0.0 }
 0x232   : > { %2494 = vst.msk [vmem:[#allocation3 + $0x171] sm:$0xff] %vm347_vm2, %v2461_v3  ;;  %5845 = vrot.lane.b32.xlu0 %v7363_v59, %s6103_s26  ;;  %5835 = vrot.lane.b32.xlu1 %v7365_v57, %s6103_s26 }
 0x233   : > { %v2995_v5 = vld [vmem:[#allocation3 + $0x181] sm:$0xff] }
 0x235   : > { %v2993_v62 = vld [vmem:[#allocation3 + $0x169] sm:$0xff] }
 0x236   : > { %5850 = vrot.lane.b32.xlu0 %v7372_v37, %s6104_s8  ;;  %5840 = vrot.lane.b32.xlu1 %v7374_v46, %s6104_s8 }
 0x237   : > { %v2996_v28 = vld [vmem:[#allocation3 + $0x189] sm:$0xff] }
 0x238   : > { %v7436_v35 = vpack.i.bf16 %v2996_v28, %v2995_v5  ;;  %v3027_v60 = vld [vmem:[#allocation3 + $0x182] sm:$0xff]  ;;  %v3028_v12 = vld [vmem:[#allocation3 + $0x18a] sm:$0xff] }
 0x239   : > { %v2994_v42 = vld [vmem:[#allocation3 + $0x171] sm:$0xff]  ;;  %v7450_v51 = vpack.i.bf16 %v3028_v12, %v3027_v60 }
 0x23a   : > { %5875 = vrot.lane.b32.xlu0 %v7380_v8, %s6103_s26  ;;  %5855 = vrot.lane.b32.xlu1 %v7363_v59, %s6103_s26  ;;  %v7408_v16 = vpack.i.bf16 %v2994_v42, %v2993_v62  ;;  %v3025_v15 = vld [vmem:[#allocation3 + $0x16a] sm:$0xff]  ;;  %v3026_v6 = vld [vmem:[#allocation3 + $0x172] sm:$0xff] }
 0x23b   : > { %v7418_v32 = vpack.i.bf16 %v3026_v6, %v3025_v15 }
 0x23e   : > { %5880 = vrot.lane.b32.xlu0 %v7386_v47, %s6104_s8  ;;  %5860 = vrot.lane.b32.xlu1 %v7372_v37, %s6104_s8 }
 0x242   : > { %5895 = vrot.lane.b32.xlu0 %v7392_v63, %s6103_s26  ;;  %5865 = vrot.lane.b32.xlu1 %v7394_v36, %s6103_s26 }
 0x246   : > { %5900 = vrot.lane.b32.xlu0 %v7400_v14, %s6104_s8  ;;  %5870 = vrot.lane.b32.xlu1 %v7402_v40, %s6104_s8 }
 0x24a   : > { %5915 = vrot.lane.b32.xlu0 %v7408_v16, %s6103_s26  ;;  %5885 = vrot.lane.b32.xlu1 %v7410_v54, %s6103_s26 }
 0x24c   : > { %v5626_v24 = vpop.permute.xlu0 %5625  ;;  %v7416_v13 = vpop.permute.xlu1 %5615 }
 0x24d   : > { %v5628_v23 = vunpack.i.h.bf16 %v5626_v24  ;;  %v5627_v55 = vunpack.i.l.bf16 %v5626_v24  ;;  %v5617_v6 = vunpack.i.l.bf16 %v7416_v13  ;;  %v5618_v58 = vunpack.i.h.bf16 %v7416_v13 }
 0x24e   : > { %5920 = vrot.lane.b32.xlu0 %v7418_v32, %s6104_s8  ;;  %5890 = vrot.lane.b32.xlu1 %v7420_v50, %s6104_s8 }
 0x24f   : > { %v4166_v33 = vsel %vm347_vm2, %v7422_v19, %v5627_v55  ;;  %v4167_v11 = vsel %vm347_vm2, %v7424_v61, %v5628_v23  ;;  %v3287_v13 = vsel %vm347_vm2, %v7422_v19, %v5617_v6 }
 0x250   : > { %v5631_v43 = vpop.permute.xlu0 %5630  ;;  %v7434_v45 = vpop.permute.xlu1 %5620 }
 0x251   : > { %v5633_v56 = vunpack.i.h.bf16 %v5631_v43  ;;  %v5632_v44 = vunpack.i.l.bf16 %v5631_v43  ;;  %v5622_v55 = vunpack.i.l.bf16 %v7434_v45  ;;  %v3288_v43 = vsel %vm347_vm2, %v7424_v61, %v5618_v58 }
 0x252   : > { %5925 = vrot.lane.b32.xlu0 %v7322_v25, %s6103_s26  ;;  %5905 = vrot.lane.b32.xlu1 %v7436_v35, %s6103_s26 }
 0x253   : > { %v7443_v0 = vsel %vm2881_vm6, %v4166_v33, %v5632_v44  ;;  %v7446_v52 = vsel %vm2881_vm6, %v4167_v11, %v5633_v56 }
 0x254   : > { %v4230_v34 = vpack.c.bf16 %v7446_v52, %v7443_v0  ;;  %v5636_v3 = vpop.permute.xlu0 %5635  ;;  %v5656_v22 = vpop.permute.xlu1 %5655 }
 0x255   : > { %v5637_v30 = vunpack.i.l.bf16 %v5636_v3  ;;  %v5638_v10 = vunpack.i.h.bf16 %v5636_v3  ;;  %v5658_v29 = vunpack.i.h.bf16 %v5656_v22  ;;  %v5657_v25 = vunpack.i.l.bf16 %v5656_v22  ;;  %v7498_v22 = vld [vmem:[#allocation3 + $0x60] sm:$0xff] }
 0x256   : > { %5935 = vrot.lane.b32.xlu0 %v7333_v49, %s6104_s8  ;;  %5910 = vrot.lane.b32.xlu1 %v7450_v51, %s6104_s8 }
 0x257   : > { %v2853_v18 = vsel %vm347_vm2, %v7422_v19, %v5637_v30  ;;  %v2854_v41 = vsel %vm347_vm2, %v7424_v61, %v5638_v10  ;;  %v2851_v31 = vsel %vm347_vm2, %v2499_v53, %v5657_v25  ;;  %v2852_v49 = vsel %vm347_vm2, %v2500_v27, %v5658_v29  ;;  %v7500_v29 = vld [vmem:[#allocation3 + $0x48] sm:$0xff] }
 0x258   : > { %v5641_v2 = vpop.permute.xlu0 %5640  ;;  %v5661_v39 = vpop.permute.xlu1 %5660 }
 0x259   : > { %v5643_v48 = vunpack.i.h.bf16 %v5641_v2  ;;  %v5642_v38 = vunpack.i.l.bf16 %v5641_v2  ;;  %v5663_v17 = vunpack.i.h.bf16 %v5661_v39  ;;  %v5662_v20 = vunpack.i.l.bf16 %v5661_v39  ;;  %v7502_v2 = vld [vmem:[#allocation3 + $0x68] sm:$0xff]  ;;  %v7504_v39 = vld [vmem:[#allocation3 + $0x50] sm:$0xff] }
 0x25a   : > { %5945 = vrot.lane.b32.xlu0 %v7365_v57, %s6103_s26  ;;  %5930 = vrot.lane.b32.xlu1 %v7363_v59, %s6103_s26  ;;  %v5623_v59 = vunpack.i.h.bf16 %v7434_v45  ;;  %v3319_v45 = vsel %vm2881_vm6, %v3287_v13, %v5622_v55 }
 0x25b   : > { %v2886_v26 = vsel %vm2881_vm6, %v2853_v18, %v5642_v38  ;;  %v2887_v21 = vsel %vm2881_vm6, %v2854_v41, %v5643_v48  ;;  %v2884_v42 = vsel %vm2881_vm6, %v2851_v31, %v5662_v20  ;;  %v2885_v1 = vsel %vm2881_vm6, %v2852_v49, %v5663_v17 }
 0x25c   : > { %v2916_v62 = vpack.c.bf16 %v2887_v21, %v2886_v26  ;;  %v2915_v4 = vpack.c.bf16 %v2885_v1, %v2884_v42  ;;  %v5646_v7 = vpop.permute.xlu0 %5645  ;;  %v7470_v15 = vpop.permute.xlu1 %5665  ;;  %v3320_v44 = vsel %vm2881_vm6, %v3288_v43, %v5623_v59 }
 0x25d   : > { %v5648_v24 = vunpack.i.h.bf16 %v5646_v7  ;;  %v5647_v23 = vunpack.i.l.bf16 %v5646_v7  ;;  %v3350_v18 = vpack.c.bf16 %v3320_v44, %v3319_v45 }
 0x25e   : > { %5955 = vrot.lane.b32.xlu0 %v7374_v46, %s6104_s8  ;;  %5940 = vrot.lane.b32.xlu1 %v7372_v37, %s6104_s8 }
 0x25f   : > { %5039 = vmatmul.mubr.msk.bf16.vlgmr.msra.gmra.mxu0 %vm3378_vm7, %v2915_v4  ;;  %v3285_v37 = vsel %vm347_vm2, %v2499_v53, %v5647_v23  ;;  %v3286_v56 = vsel %vm347_vm2, %v2500_v27, %v5648_v24  ;;  %v4308_v53 = vsel %vm3427_vm8, %v7320_v9, 0  ;;  %v6092_v27 = vld [vmem:[%s8210_s3 + $0x18] sm:$0xff]  }
 0x260   : > { %5042 = vmatprep.mubr.msk.bf16.mxu0 %vm3378_vm7, %v2916_v62  ;;  %v5651_v28 = vpop.permute.xlu0 %5650  ;;  %v7482_v33 = vpop.permute.xlu1 %5670 }
 0x261   : > { %v5653_v11 = vunpack.i.h.bf16 %v5651_v28  ;;  %v5652_v5 = vunpack.i.l.bf16 %v5651_v28 }
 0x262   : > { %5965 = vrot.lane.b32.xlu0 %v7365_v57, %s6103_s26  ;;  %5950 = vrot.lane.b32.xlu1 %v7380_v8, %s6103_s26 }
 0x263   : > { %v3317_v19 = vsel %vm2881_vm6, %v3285_v37, %v5652_v5  ;;  %v3318_v60 = vsel %vm2881_vm6, %v3286_v56, %v5653_v11 }
 0x264   : > { %v3349_v12 = vpack.c.bf16 %v3318_v60, %v3317_v19  ;;  %v5676_v61 = vpop.permute.xlu0 %5675  ;;  %v5706_v3 = vpop.permute.xlu1 %5705 }
 0x265   : > { %v5678_v30 = vunpack.i.h.bf16 %v5676_v61  ;;  %v5677_v10 = vunpack.i.l.bf16 %v5676_v61  ;;  %v5708_v57 = vunpack.i.h.bf16 %v5706_v3  ;;  %v5707_v25 = vunpack.i.l.bf16 %v5706_v3 }
 0x266   : > { %5975 = vrot.lane.b32.xlu0 %v7374_v46, %s6104_s8  ;;  %5002 = vmatprep.mubr.msk.bf16.mxu1 %vm3378_vm7, %v3349_v12 }
 0x267   : > { %v4171_v48 = vsel %vm347_vm2, %v7502_v2, %v5678_v30  ;;  %v4170_v38 = vsel %vm347_vm2, %v7498_v22, %v5677_v10  ;;  %v4169_v17 = vsel %vm347_vm2, %v7504_v39, %v5708_v57  ;;  %v4168_v46 = vsel %vm347_vm2, %v7500_v29, %v5707_v25  ;;  %5960 = vrot.lane.b32.xlu1 %v7386_v47, %s6104_s8 }
 0x268   : > { %5003 = vmatmul.mubr.msk.bf16.vlgmr.msra.gmra.mxu1 %vm3378_vm7, %v3350_v18  ;;  %v5681_v9 = vpop.permute.xlu0 %5680  ;;  %v5711_v20 = vpop.permute.xlu1 %5710  ;;  %v5668_v57 = vunpack.i.h.bf16 %v7470_v15 }
 0x269   : > { %v5683_v41 = vunpack.i.h.bf16 %v5681_v9  ;;  %v5682_v31 = vunpack.i.l.bf16 %v5681_v9  ;;  %v5713_v49 = vunpack.i.h.bf16 %v5711_v20  ;;  %v5712_v26 = vunpack.i.l.bf16 %v5711_v20  ;;  %5071 = vmatpush3.bf16.msra.mxu1 %v4308_v53 }
 0x26a   : > { %5985 = vrot.lane.b32.xlu0 %v7394_v36, %s6103_s26  ;;  %5072 = vmatprep.subr.bf16.mxu1 %v6092_v27  ;;  %v5673_v53 = vunpack.i.h.bf16 %v7482_v33 }
 0x26b   : > { %v7528_v21 = vsel %vm2881_vm6, %v4170_v38, %v5682_v31  ;;  %v7531_v42 = vsel %vm2881_vm6, %v4171_v48, %v5683_v41  ;;  %v7534_v1 = vsel %vm2881_vm6, %v4168_v46, %v5712_v26  ;;  %v7537_v62 = vsel %vm2881_vm6, %v4169_v17, %v5713_v49  ;;  %5970 = vrot.lane.b32.xlu1 %v7380_v8, %s6103_s26  ;;  %v3877_v49 = vld [vmem:[#allocation3 + $0x1a1] sm:$0xff] }
 0x26c   : > { %v4232_v4 = vpack.c.bf16 %v7531_v42, %v7528_v21  ;;  %v4231_v7 = vpack.c.bf16 %v7537_v62, %v7534_v1  ;;  %v5686_v6 = vpop.permute.xlu0 %5685  ;;  %v5716_v58 = vpop.permute.xlu1 %5715  ;;  %v3292_v46 = vsel %vm347_vm2, %v7502_v2, %v5668_v57 }
 0x26d   : > { %5073 = vmatpush3.bf16.msra.mxu1 %v6092_v27  ;;  %v5688_v24 = vunpack.i.h.bf16 %v5686_v6  ;;  %v5687_v23 = vunpack.i.l.bf16 %v5686_v6  ;;  %v5718_v59 = vunpack.i.h.bf16 %v5716_v58  ;;  %v5717_v55 = vunpack.i.l.bf16 %v5716_v58 }
 0x26e   : > { %5995 = vrot.lane.b32.xlu0 %v7402_v40, %s6104_s8  ;;  %v5672_v27 = vunpack.i.l.bf16 %v7482_v33  ;;  %v3324_v41 = vsel %vm2881_vm6, %v3292_v46, %v5673_v53 }
 0x26f   : > { %5980 = vrot.lane.b32.xlu1 %v7386_v47, %s6104_s8  ;;  %v2858_v37 = vsel %vm347_vm2, %v7502_v2, %v5688_v24  ;;  %v2857_v56 = vsel %vm347_vm2, %v7498_v22, %v5687_v23  ;;  %v2856_v45 = vsel %vm347_vm2, %v7504_v39, %v5718_v59  ;;  %v2855_v44 = vsel %vm347_vm2, %v7500_v29, %v5717_v55 }
 0x270   : > { %v5691_v8 = vpop.permute.xlu0 %5690  ;;  %v5721_v28 = vpop.permute.xlu1 %5720 }
 0x271   : > { %v5693_v13 = vunpack.i.h.bf16 %v5691_v8  ;;  %v5692_v11 = vunpack.i.l.bf16 %v5691_v8  ;;  %v5723_v5 = vunpack.i.h.bf16 %v5721_v28  ;;  %v5722_v43 = vunpack.i.l.bf16 %v5721_v28  ;;  %v7597_v8 = vld [vmem:[#allocation3 + $0x98] sm:$0xff] }
 0x272   : > { %6005 = vrot.lane.b32.xlu0 %v7394_v36, %s6103_s26  ;;  %v5667_v36 = vunpack.i.l.bf16 %v7470_v15  ;;  %v7599_v28 = vld [vmem:[#allocation3 + $0x78] sm:$0xff] }
 0x273   : > { %v2890_v47 = vsel %vm2881_vm6, %v2857_v56, %v5692_v11  ;;  %v2891_v19 = vsel %vm2881_vm6, %v2858_v37, %v5693_v13  ;;  %v2888_v60 = vsel %vm2881_vm6, %v2855_v44, %v5722_v43  ;;  %v2889_v12 = vsel %vm2881_vm6, %v2856_v45, %v5723_v5  ;;  %5990 = vrot.lane.b32.xlu1 %v7392_v63, %s6103_s26  ;;  %v7601_v13 = vld [vmem:[#allocation3 + $0x80] sm:$0xff] }
 0x274   : > { %v2918_v61 = vpack.c.bf16 %v2891_v19, %v2890_v47  ;;  %v2917_v3 = vpack.c.bf16 %v2889_v12, %v2888_v60  ;;  %v5696_v30 = vpop.permute.xlu0 %5695  ;;  %v7565_v10 = vpop.permute.xlu1 %5725 }
 0x275   : > { %v5698_v25 = vunpack.i.h.bf16 %v5696_v30  ;;  %v5697_v18 = vunpack.i.l.bf16 %v5696_v30 }
 0x276   : > { %6015 = vrot.lane.b32.xlu0 %v7402_v40, %s6104_s8  ;;  %5043 = vmatmul.mubr.msk.bf16.gmra.mxu0 %vm3378_vm7, %v2917_v3  ;;  %v3291_v40 = vsel %vm347_vm2, %v7498_v22, %v5667_v36  ;;  %v3876_v22 = vld [vmem:[#allocation3 + $0x199] sm:$0xff] }
 0x277   : > { %6000 = vrot.lane.b32.xlu1 %v7400_v14, %s6104_s8  ;;  %5046 = vmatprep.mubr.msk.bf16.mxu0 %vm3378_vm7, %v2918_v61  ;;  %v3290_v9 = vsel %vm347_vm2, %v7504_v39, %v5698_v25  ;;  %v3289_v33 = vsel %vm347_vm2, %v7500_v29, %v5697_v18  ;;  %v3323_v20 = vsel %vm2881_vm6, %v3291_v40, %v5672_v27  ;;  %v7595_v29 = vld [vmem:[#allocation3 + $0x90] sm:$0xff] }
 0x278   : > { %v5701_v48 = vpop.permute.xlu0 %5700  ;;  %v7577_v38 = vpop.permute.xlu1 %5730  ;;  %v3352_v55 = vpack.c.bf16 %v3324_v41, %v3323_v20 }
 0x279   : > { %v5703_v15 = vunpack.i.h.bf16 %v5701_v48  ;;  %v5702_v17 = vunpack.i.l.bf16 %v5701_v48 }
 0x27a   : > { %6025 = vrot.lane.b32.xlu0 %v7410_v54, %s6103_s26 }
 0x27b   : > { %v3321_v31 = vsel %vm2881_vm6, %v3289_v33, %v5702_v17  ;;  %v3322_v2 = vsel %vm2881_vm6, %v3290_v9, %v5703_v15  ;;  %6010 = vrot.lane.b32.xlu1 %v7392_v63, %s6103_s26  ;;  %v6049_v63 = vpack.i.bf16 %v3877_v49, %v3876_v22 }
 0x27c   : > { %v3351_v39 = vpack.c.bf16 %v3322_v2, %v3321_v31  ;;  %v5736_v26 = vpop.permute.xlu0 %5735  ;;  %v5766_v6 = vpop.permute.xlu1 %5765 }
 0x27d   : > { %v5738_v58 = vunpack.i.h.bf16 %v5736_v26  ;;  %v5737_v24 = vunpack.i.l.bf16 %v5736_v26  ;;  %v5768_v23 = vunpack.i.h.bf16 %v5766_v6  ;;  %v5767_v59 = vunpack.i.l.bf16 %v5766_v6 }
 0x27e   : > { %6030 = vrot.lane.b32.xlu0 %v7420_v50, %s6104_s8  ;;  %5006 = vmatprep.mubr.msk.bf16.mxu1 %vm3378_vm7, %v3351_v39 }
 0x27f   : > { %v4175_v11 = vsel %vm347_vm2, %v7597_v8, %v5738_v58  ;;  %v4174_v5 = vsel %vm347_vm2, %v7595_v29, %v5737_v24  ;;  %v4173_v43 = vsel %vm347_vm2, %v7601_v13, %v5768_v23  ;;  %v4172_v37 = vsel %vm347_vm2, %v7599_v28, %v5767_v59  ;;  %6020 = vrot.lane.b32.xlu1 %v7400_v14, %s6104_s8 }
 0x280   : > { %5007 = vmatmul.mubr.msk.bf16.gmra.mxu1 %vm3378_vm7, %v3352_v55  ;;  %v5741_v56 = vpop.permute.xlu0 %5740  ;;  %v5771_v45 = vpop.permute.xlu1 %5770  ;;  %v5728_v24 = vunpack.i.h.bf16 %v7565_v10  ;;  %v3908_v55 = vld [vmem:[#allocation3 + $0x19a] sm:$0xff] }
 0x281   : > { %v5743_v44 = vunpack.i.h.bf16 %v5741_v56  ;;  %v5742_v47 = vunpack.i.l.bf16 %v5741_v56  ;;  %v5773_v19 = vunpack.i.h.bf16 %v5771_v45  ;;  %v5772_v60 = vunpack.i.l.bf16 %v5771_v45 }
 0x282   : > { %6035 = vrot.lane.b32.xlu0 %v7410_v54, %s6103_s26 }
 0x283   : > { %v7620_v12 = vsel %vm2881_vm6, %v4174_v5, %v5742_v47  ;;  %v7623_v61 = vsel %vm2881_vm6, %v4175_v11, %v5743_v44  ;;  %v7626_v3 = vsel %vm2881_vm6, %v4172_v37, %v5772_v60  ;;  %v7629_v14 = vsel %vm2881_vm6, %v4173_v43, %v5773_v19  ;;  %6050 = vrot.lane.b32.xlu1 %v6049_v63, %s6103_s26  ;;  %v3909_v63 = vld [vmem:[#allocation3 + $0x1a2] sm:$0xff] }
 0x284   : > { %v4234_v30 = vpack.c.bf16 %v7623_v61, %v7620_v12  ;;  %v4233_v54 = vpack.c.bf16 %v7629_v14, %v7626_v3  ;;  %v5746_v57 = vpop.permute.xlu0 %5745  ;;  %v5776_v36 = vpop.permute.xlu1 %5775  ;;  %v5733_v11 = vunpack.i.h.bf16 %v7577_v38  ;;  %v5732_v5 = vunpack.i.l.bf16 %v7577_v38 }
 0x285   : > { %v5748_v25 = vunpack.i.h.bf16 %v5746_v57  ;;  %v5747_v18 = vunpack.i.l.bf16 %v5746_v57  ;;  %v5778_v53 = vunpack.i.h.bf16 %v5776_v36  ;;  %v5777_v27 = vunpack.i.l.bf16 %v5776_v36 }
 0x286   : > { %6040 = vrot.lane.b32.xlu0 %v7420_v50, %s6104_s8  ;;  %v6079_v45 = vpack.i.bf16 %v3909_v63, %v3908_v55 }
 0x287   : > { %6055 = vrot.lane.b32.xlu1 %v7408_v16, %s6103_s26  ;;  %v2862_v33 = vsel %vm347_vm2, %v7597_v8, %v5748_v25  ;;  %v2861_v20 = vsel %vm347_vm2, %v7595_v29, %v5747_v18  ;;  %v2860_v41 = vsel %vm347_vm2, %v7601_v13, %v5778_v53  ;;  %v2859_v50 = vsel %vm347_vm2, %v7599_v28, %v5777_v27  ;;  %v7682_v25 = vld [vmem:[#allocation3 + $0xc0] sm:$0xff] }
 0x288   : > { %v5751_v48 = vpop.permute.xlu0 %5750  ;;  %v5781_v15 = vpop.permute.xlu1 %5780 }
 0x289   : > { %v5753_v17 = vunpack.i.h.bf16 %v5751_v48  ;;  %v5752_v46 = vunpack.i.l.bf16 %v5751_v48  ;;  %v5783_v40 = vunpack.i.h.bf16 %v5781_v15  ;;  %v5782_v9 = vunpack.i.l.bf16 %v5781_v15  ;;  %v7684_v48 = vld [vmem:[#allocation3 + $0xc8] sm:$0xff] }
 0x28a   : > { %6045 = vrot.lane.b32.xlu0 %v7436_v35, %s6103_s26  ;;  %v5727_v35 = vunpack.i.l.bf16 %v7565_v10  ;;  %v3824_v15 = vld [vmem:[#allocation3 + $0xa8] sm:$0xff] }
 0x28b   : > { %v2894_v31 = vsel %vm2881_vm6, %v2861_v20, %v5752_v46  ;;  %v2895_v2 = vsel %vm2881_vm6, %v2862_v33, %v5753_v17  ;;  %v2892_v22 = vsel %vm2881_vm6, %v2859_v50, %v5782_v9  ;;  %v2893_v49 = vsel %vm2881_vm6, %v2860_v41, %v5783_v40  ;;  %6060 = vrot.lane.b32.xlu1 %v7418_v32, %s6104_s8  ;;  %v3825_v17 = vld [vmem:[#allocation3 + $0xb0] sm:$0xff] }
 0x28c   : > { %v2920_v39 = vpack.c.bf16 %v2895_v2, %v2894_v31  ;;  %v2919_v26 = vpack.c.bf16 %v2893_v49, %v2892_v22  ;;  %v5756_v6 = vpop.permute.xlu0 %5755  ;;  %v7656_v58 = vpop.permute.xlu1 %5785  ;;  %v3295_v44 = vsel %vm347_vm2, %v7595_v29, %v5727_v35 }
 0x28d   : > { %v5758_v23 = vunpack.i.h.bf16 %v5756_v6  ;;  %v5757_v59 = vunpack.i.l.bf16 %v5756_v6  ;;  %v5788_v22 = vunpack.i.h.bf16 %v7656_v58  ;;  %v5787_v49 = vunpack.i.l.bf16 %v7656_v58 }
 0x28e   : > { %6075 = vrot.lane.b32.xlu0 %v7450_v51, %s6104_s8  ;;  %5047 = vmatmul.mubr.msk.bf16.gmra.mxu0 %vm3378_vm7, %v2919_v26  ;;  %v3296_v51 = vsel %vm347_vm2, %v7597_v8, %v5728_v24 }
 0x28f   : > { %6065 = vrot.lane.b32.xlu1 %v7408_v16, %s6103_s26  ;;  %5050 = vmatprep.mubr.msk.bf16.mxu0 %vm3378_vm7, %v2920_v39  ;;  %v3294_v47 = vsel %vm347_vm2, %v7601_v13, %v5758_v23  ;;  %v3293_v38 = vsel %vm347_vm2, %v7599_v28, %v5757_v59  ;;  %v3327_v16 = vsel %vm2881_vm6, %v3295_v44, %v5732_v5 }
 0x290   : > { %v5761_v43 = vpop.permute.xlu0 %5760  ;;  %v5791_v10 = vpop.permute.xlu1 %5790  ;;  %v3328_v19 = vsel %vm2881_vm6, %v3296_v51, %v5733_v11 }
 0x291   : > { %v5763_v37 = vunpack.i.h.bf16 %v5761_v43  ;;  %v5762_v56 = vunpack.i.l.bf16 %v5761_v43  ;;  %v3354_v27 = vpack.c.bf16 %v3328_v19, %v3327_v16  ;;  %v5793_v35 = vunpack.i.h.bf16 %v5791_v10 }
 0x292   : > { %v5792_v23 = vunpack.i.l.bf16 %v5791_v10 }
 0x293   : > { %v3325_v60 = vsel %vm2881_vm6, %v3293_v38, %v5762_v56  ;;  %v3326_v57 = vsel %vm2881_vm6, %v3294_v47, %v5763_v37  ;;  %6070 = vrot.lane.b32.xlu1 %v7418_v32, %s6104_s8  ;;  %v3300_v56 = vsel %vm347_vm2, %v7684_v48, %v5788_v22  ;;  %v7734_v22 = vld [vmem:[#allocation3 + $0xe0] sm:$0xff] }
 0x294   : > { %v3353_v8 = vpack.c.bf16 %v3326_v57, %v3325_v60  ;;  %v5796_v36 = vpop.permute.xlu0 %5795  ;;  %v5816_v29 = vpop.permute.xlu1 %5815  ;;  %v3332_v51 = vsel %vm2881_vm6, %v3300_v56, %v5793_v35 }
 0x295   : > { %v5798_v13 = vunpack.i.h.bf16 %v5796_v36  ;;  %v5797_v18 = vunpack.i.l.bf16 %v5796_v36  ;;  %v5818_v53 = vunpack.i.h.bf16 %v5816_v29  ;;  %v5817_v28 = vunpack.i.l.bf16 %v5816_v29 }
 0x296   : > { %5010 = vmatprep.mubr.msk.bf16.mxu1 %vm3378_vm7, %v3353_v8 }
 0x297   : > { %v4179_v46 = vsel %vm347_vm2, %v7684_v48, %v5798_v13  ;;  %v4178_v32 = vsel %vm347_vm2, %v7682_v25, %v5797_v18  ;;  %v4177_v40 = vsel %vm347_vm2, %v3825_v17, %v5818_v53  ;;  %v4176_v9 = vsel %vm347_vm2, %v3824_v15, %v5817_v28  ;;  %6080 = vrot.lane.b32.xlu1 %v6079_v45, %s6104_s8 }
 0x298   : > { %5011 = vmatmul.mubr.msk.bf16.gmra.mxu1 %vm3378_vm7, %v3354_v27  ;;  %v5801_v33 = vpop.permute.xlu0 %5800  ;;  %v5821_v20 = vpop.permute.xlu1 %5820  ;;  %v3299_v45 = vsel %vm347_vm2, %v7682_v25, %v5787_v49  ;;  %v7736_v49 = vld [vmem:[#allocation3 + $0xf8] sm:$0xff] }
 0x299   : > { %v5803_v41 = vunpack.i.h.bf16 %v5801_v33  ;;  %v5802_v50 = vunpack.i.l.bf16 %v5801_v33  ;;  %v5823_v31 = vunpack.i.h.bf16 %v5821_v20  ;;  %v5822_v2 = vunpack.i.l.bf16 %v5821_v20 }
 0x29a   : > { %v3331_v10 = vsel %vm2881_vm6, %v3299_v45, %v5792_v23 }
 0x29b   : > { %v7698_v39 = vsel %vm2881_vm6, %v4178_v32, %v5802_v50  ;;  %v7701_v26 = vsel %vm2881_vm6, %v4179_v46, %v5803_v41  ;;  %v7704_v6 = vsel %vm2881_vm6, %v4176_v9, %v5822_v2  ;;  %v7707_v24 = vsel %vm2881_vm6, %v4177_v40, %v5823_v31  ;;  %v7732_v2 = vld [vmem:[#allocation3 + $0xd8] sm:$0xff] }
 0x29c   : > { %v4236_v59 = vpack.c.bf16 %v7701_v26, %v7698_v39  ;;  %v4235_v58 = vpack.c.bf16 %v7707_v24, %v7704_v6  ;;  %v5806_v55 = vpop.permute.xlu0 %5805  ;;  %v5826_v63 = vpop.permute.xlu1 %5825  ;;  %v3356_v9 = vpack.c.bf16 %v3332_v51, %v3331_v10 }
 0x29d   : > { %v5808_v11 = vunpack.i.h.bf16 %v5806_v55  ;;  %v5807_v5 = vunpack.i.l.bf16 %v5806_v55  ;;  %v5828_v43 = vunpack.i.h.bf16 %v5826_v63  ;;  %v5827_v37 = vunpack.i.l.bf16 %v5826_v63 }
 0x29f   : > { %v3298_v57 = vsel %vm347_vm2, %v3825_v17, %v5808_v11  ;;  %v3297_v8 = vsel %vm347_vm2, %v3824_v15, %v5807_v5  ;;  %v2864_v36 = vsel %vm347_vm2, %v3825_v17, %v5828_v43  ;;  %v2863_v29 = vsel %vm347_vm2, %v3824_v15, %v5827_v37  ;;  %v7730_v15 = vld [vmem:[#allocation3 + $0xf0] sm:$0xff] }
 0x2a0   : > { %v5811_v44 = vpop.permute.xlu0 %5810  ;;  %v5831_v47 = vpop.permute.xlu1 %5830 }
 0x2a1   : > { %v5813_v38 = vunpack.i.h.bf16 %v5811_v44  ;;  %v5812_v16 = vunpack.i.l.bf16 %v5811_v44  ;;  %v5833_v19 = vunpack.i.h.bf16 %v5831_v47  ;;  %v5832_v60 = vunpack.i.l.bf16 %v5831_v47 }
 0x2a3   : > { %v3329_v13 = vsel %vm2881_vm6, %v3297_v8, %v5812_v16  ;;  %v3330_v18 = vsel %vm2881_vm6, %v3298_v57, %v5813_v38  ;;  %v2896_v53 = vsel %vm2881_vm6, %v2863_v29, %v5832_v60  ;;  %v2897_v28 = vsel %vm2881_vm6, %v2864_v36, %v5833_v19 }
 0x2a4   : > { %v3355_v27 = vpack.c.bf16 %v3330_v18, %v3329_v13  ;;  %v2921_v46 = vpack.c.bf16 %v2897_v28, %v2896_v53  ;;  %v5846_v32 = vpop.permute.xlu0 %5845  ;;  %v5836_v40 = vpop.permute.xlu1 %5835  ;;  %v7752_v13 = vld [vmem:[#allocation3 + $0x108] sm:$0xff]  ;;  %v7754_v18 = vld [vmem:[#allocation3 + $0x110] sm:$0xff] }
 0x2a5   : > { %v5848_v33 = vunpack.i.h.bf16 %v5846_v32  ;;  %v5847_v20 = vunpack.i.l.bf16 %v5846_v32  ;;  %v5838_v41 = vunpack.i.h.bf16 %v5836_v40  ;;  %v5837_v50 = vunpack.i.l.bf16 %v5836_v40 }
 0x2a6   : > { %5014 = vmatprep.mubr.msk.bf16.mxu1 %vm3378_vm7, %v3355_v27  ;;  %5051 = vmatmul.mubr.msk.bf16.gmra.mxu0 %vm3378_vm7, %v2921_v46 }
 0x2a7   : > { %5015 = vmatmul.mubr.msk.bf16.gmra.mxu1 %vm3378_vm7, %v3356_v9  ;;  %v3302_v11 = vsel %vm347_vm2, %v7734_v22, %v5848_v33  ;;  %v3301_v5 = vsel %vm347_vm2, %v7732_v2, %v5847_v20  ;;  %v3304_v43 = vsel %vm347_vm2, %v7736_v49, %v5838_v41  ;;  %v3303_v37 = vsel %vm347_vm2, %v7730_v15, %v5837_v50 }
 0x2a8   : > { %v5851_v17 = vpop.permute.xlu0 %5850  ;;  %v5841_v31 = vpop.permute.xlu1 %5840 }
 0x2a9   : > { %v5853_v35 = vunpack.i.h.bf16 %v5851_v17  ;;  %v5852_v23 = vunpack.i.l.bf16 %v5851_v17  ;;  %v5843_v55 = vunpack.i.h.bf16 %v5841_v31  ;;  %v5842_v63 = vunpack.i.l.bf16 %v5841_v31 }
 0x2ab   : > { %v3333_v56 = vsel %vm2881_vm6, %v3301_v5, %v5852_v23  ;;  %v3334_v45 = vsel %vm2881_vm6, %v3302_v11, %v5853_v35  ;;  %v3335_v10 = vsel %vm2881_vm6, %v3303_v37, %v5842_v63  ;;  %v3336_v51 = vsel %vm2881_vm6, %v3304_v43, %v5843_v55  ;;  %v7775_v37 = vld [vmem:[#allocation3 + $0x120] sm:$0xff] }
 0x2ac   : > { %v3357_v44 = vpack.c.bf16 %v3334_v45, %v3333_v56  ;;  %v3358_v47 = vpack.c.bf16 %v3336_v51, %v3335_v10  ;;  %v5876_v38 = vpop.permute.xlu0 %5875  ;;  %v5856_v16 = vpop.permute.xlu1 %5855  ;;  %v7777_v10 = vld [vmem:[#allocation3 + $0x138] sm:$0xff]  ;;  %v7779_v51 = vld [vmem:[#allocation3 + $0x140] sm:$0xff] }
 0x2ad   : > { %v5878_v19 = vunpack.i.h.bf16 %v5876_v38  ;;  %v5877_v60 = vunpack.i.l.bf16 %v5876_v38  ;;  %v5858_v57 = vunpack.i.h.bf16 %v5856_v16  ;;  %v5857_v8 = vunpack.i.l.bf16 %v5856_v16 }
 0x2ae   : > { %5018 = vmatprep.mubr.msk.bf16.mxu1 %vm3378_vm7, %v3357_v44  ;;  %v7781_v44 = vld [vmem:[#allocation3 + $0x128] sm:$0xff] }
 0x2af   : > { %5019 = vmatmul.mubr.msk.bf16.gmra.mxu1 %vm3378_vm7, %v3358_v47  ;;  %v3306_v32 = vsel %vm347_vm2, %v7754_v18, %v5878_v19  ;;  %v3305_v40 = vsel %vm347_vm2, %v7752_v13, %v5877_v60  ;;  %v4181_v9 = vsel %vm347_vm2, %v7734_v22, %v5858_v57  ;;  %v4180_v33 = vsel %vm347_vm2, %v7732_v2, %v5857_v8 }
 0x2b0   : > { %v5881_v36 = vpop.permute.xlu0 %5880  ;;  %v5861_v29 = vpop.permute.xlu1 %5860 }
 0x2b1   : > { %v5883_v53 = vunpack.i.h.bf16 %v5881_v36  ;;  %v5882_v28 = vunpack.i.l.bf16 %v5881_v36  ;;  %v5863_v27 = vunpack.i.h.bf16 %v5861_v29  ;;  %v5862_v46 = vunpack.i.l.bf16 %v5861_v29 }
 0x2b3   : > { %v3337_v20 = vsel %vm2881_vm6, %v3305_v40, %v5882_v28  ;;  %v3338_v41 = vsel %vm2881_vm6, %v3306_v32, %v5883_v53  ;;  %v7767_v50 = vsel %vm2881_vm6, %v4180_v33, %v5862_v46  ;;  %v7770_v17 = vsel %vm2881_vm6, %v4181_v9, %v5863_v27 }
 0x2b4   : > { %v3359_v31 = vpack.c.bf16 %v3338_v41, %v3337_v20  ;;  %v4237_v35 = vpack.c.bf16 %v7770_v17, %v7767_v50  ;;  %v5896_v23 = vpop.permute.xlu0 %5895  ;;  %v5866_v55 = vpop.permute.xlu1 %5865 }
 0x2b5   : > { %v5898_v63 = vunpack.i.h.bf16 %v5896_v23  ;;  %v5897_v11 = vunpack.i.l.bf16 %v5896_v23  ;;  %v5868_v5 = vunpack.i.h.bf16 %v5866_v55  ;;  %v5867_v43 = vunpack.i.l.bf16 %v5866_v55  ;;  %v7797_v23 = vld [vmem:[#allocation3 + $0x150] sm:$0xff] }
 0x2b6   : > { %5022 = vmatprep.mubr.msk.bf16.mxu1 %vm3378_vm7, %v3359_v31 }
 0x2b7   : > { %v3310_v60 = vsel %vm347_vm2, %v7779_v51, %v5898_v63  ;;  %v3309_v57 = vsel %vm347_vm2, %v7777_v10, %v5897_v11  ;;  %v3308_v8 = vsel %vm347_vm2, %v7781_v44, %v5868_v5  ;;  %v3307_v36 = vsel %vm347_vm2, %v7775_v37, %v5867_v43  ;;  %v7799_v11 = vld [vmem:[#allocation3 + $0x168] sm:$0xff]  ;;  %v7801_v5 = vld [vmem:[#allocation3 + $0x170] sm:$0xff]  ;;  %v7803_v43 = vld [vmem:[#allocation3 + $0x158] sm:$0xff] }
 0x2b8   : > { %v5901_v56 = vpop.permute.xlu0 %5900  ;;  %v5871_v45 = vpop.permute.xlu1 %5870 }
 0x2b9   : > { %v5903_v47 = vunpack.i.h.bf16 %v5901_v56  ;;  %v5902_v38 = vunpack.i.l.bf16 %v5901_v56  ;;  %v5873_v16 = vunpack.i.h.bf16 %v5871_v45  ;;  %v5872_v19 = vunpack.i.l.bf16 %v5871_v45 }
 0x2bb   : > { %v3341_v29 = vsel %vm2881_vm6, %v3309_v57, %v5902_v38  ;;  %v3342_v53 = vsel %vm2881_vm6, %v3310_v60, %v5903_v47  ;;  %v3339_v28 = vsel %vm2881_vm6, %v3307_v36, %v5872_v19  ;;  %v3340_v27 = vsel %vm2881_vm6, %v3308_v8, %v5873_v16 }
 0x2bc   : > { %v3361_v46 = vpack.c.bf16 %v3342_v53, %v3341_v29  ;;  %v3360_v32 = vpack.c.bf16 %v3340_v27, %v3339_v28  ;;  %v5916_v40 = vpop.permute.xlu0 %5915  ;;  %v5886_v9 = vpop.permute.xlu1 %5885 }
 0x2bd   : > { %v5918_v33 = vunpack.i.h.bf16 %v5916_v40  ;;  %v5917_v20 = vunpack.i.l.bf16 %v5916_v40  ;;  %v5888_v41 = vunpack.i.h.bf16 %v5886_v9  ;;  %v5887_v31 = vunpack.i.l.bf16 %v5886_v9 }
 0x2be   : > { %5023 = vmatmul.mubr.msk.bf16.gmra.mxu1 %vm3378_vm7, %v3360_v32 }
 0x2bf   : > { %5026 = vmatprep.mubr.msk.bf16.mxu1 %vm3378_vm7, %v3361_v46  ;;  %v3314_v16 = vsel %vm347_vm2, %v7801_v5, %v5918_v33  ;;  %v3313_v19 = vsel %vm347_vm2, %v7799_v11, %v5917_v20  ;;  %v3312_v60 = vsel %vm347_vm2, %v7803_v43, %v5888_v41  ;;  %v3311_v57 = vsel %vm347_vm2, %v7797_v23, %v5887_v31 }
 0x2c0   : > { %v5921_v55 = vpop.permute.xlu0 %5920  ;;  %v5891_v63 = vpop.permute.xlu1 %5890 }
 0x2c1   : > { %v5923_v56 = vunpack.i.h.bf16 %v5921_v55  ;;  %v5922_v45 = vunpack.i.l.bf16 %v5921_v55  ;;  %v5893_v47 = vunpack.i.h.bf16 %v5891_v63  ;;  %v5892_v38 = vunpack.i.l.bf16 %v5891_v63  ;;  %v7819_v55 = vld [vmem:[#allocation3 + $0x180] sm:$0xff]  ;;  %v7821_v63 = vld [vmem:[#allocation3 + $0x188] sm:$0xff] }
 0x2c3   : > { %v3345_v8 = vsel %vm2881_vm6, %v3313_v19, %v5922_v45  ;;  %v3346_v36 = vsel %vm2881_vm6, %v3314_v16, %v5923_v56  ;;  %v3343_v29 = vsel %vm2881_vm6, %v3311_v57, %v5892_v38  ;;  %v3344_v53 = vsel %vm2881_vm6, %v3312_v60, %v5893_v47 }
 0x2c4   : > { %v3363_v28 = vpack.c.bf16 %v3346_v36, %v3345_v8  ;;  %v3362_v27 = vpack.c.bf16 %v3344_v53, %v3343_v29  ;;  %v5926_v46 = vpop.permute.xlu0 %5925  ;;  %v5906_v32 = vpop.permute.xlu1 %5905 }
 0x2c5   : > { %v5928_v40 = vunpack.i.h.bf16 %v5926_v46  ;;  %v5927_v9 = vunpack.i.l.bf16 %v5926_v46  ;;  %v5908_v33 = vunpack.i.h.bf16 %v5906_v32  ;;  %v5907_v20 = vunpack.i.l.bf16 %v5906_v32 }
 0x2c6   : > { %5027 = vmatmul.mubr.msk.bf16.gmra.mxu1 %vm3378_vm7, %v3362_v27 }
 0x2c7   : > { %5030 = vmatprep.mubr.msk.bf16.mxu1 %vm3378_vm7, %v3363_v28  ;;  %v2866_v16 = vsel %vm347_vm2, %v7684_v48, %v5928_v40  ;;  %v2865_v19 = vsel %vm347_vm2, %v7682_v25, %v5927_v9  ;;  %v3316_v60 = vsel %vm347_vm2, %v7821_v63, %v5908_v33  ;;  %v3315_v57 = vsel %vm347_vm2, %v7819_v55, %v5907_v20 }
 0x2c8   : > { %v5936_v41 = vpop.permute.xlu0 %5935  ;;  %v5911_v31 = vpop.permute.xlu1 %5910 }
 0x2c9   : > { %v5938_v56 = vunpack.i.h.bf16 %v5936_v41  ;;  %v5937_v45 = vunpack.i.l.bf16 %v5936_v41  ;;  %v5913_v47 = vunpack.i.h.bf16 %v5911_v31  ;;  %v5912_v38 = vunpack.i.l.bf16 %v5911_v31 }
 0x2cb   : > { %v2898_v8 = vsel %vm2881_vm6, %v2865_v19, %v5937_v45  ;;  %v2899_v36 = vsel %vm2881_vm6, %v2866_v16, %v5938_v56  ;;  %v3347_v29 = vsel %vm2881_vm6, %v3315_v57, %v5912_v38  ;;  %v3348_v53 = vsel %vm2881_vm6, %v3316_v60, %v5913_v47 }
 0x2cc   : > { %v2922_v28 = vpack.c.bf16 %v2899_v36, %v2898_v8  ;;  %v3364_v27 = vpack.c.bf16 %v3348_v53, %v3347_v29  ;;  %v5946_v48 = vpop.permute.xlu0 %5945  ;;  %v5931_v46 = vpop.permute.xlu1 %5930 }
 0x2cd   : > { %v5948_v32 = vunpack.i.h.bf16 %v5946_v48  ;;  %v5947_v25 = vunpack.i.l.bf16 %v5946_v48  ;;  %v5933_v40 = vunpack.i.h.bf16 %v5931_v46  ;;  %v5932_v9 = vunpack.i.l.bf16 %v5931_v46 }
 0x2ce   : > { %5031 = vmatmul.mubr.msk.bf16.gmra.mxu1 %vm3378_vm7, %v3364_v27  ;;  %5054 = vmatprep.mubr.msk.bf16.mxu0 %vm3378_vm7, %v2922_v28 }
 0x2cf   : > { %5074 = vmatprep.mubr.msk.bf16.mxu1 %vm3378_vm7, %v4230_v34  ;;  %v4183_v47 = vsel %vm347_vm2, %v7736_v49, %v5948_v32  ;;  %v4182_v38 = vsel %vm347_vm2, %v7730_v15, %v5947_v25  ;;  %v2868_v16 = vsel %vm347_vm2, %v7734_v22, %v5933_v40  ;;  %v2867_v0 = vsel %vm347_vm2, %v7732_v2, %v5932_v9 }
 0x2d0   : > { %v5956_v33 = vpop.permute.xlu0 %5955  ;;  %v5941_v20 = vpop.permute.xlu1 %5940 }
 0x2d1   : > { %v5958_v41 = vunpack.i.h.bf16 %v5956_v33  ;;  %v5957_v31 = vunpack.i.l.bf16 %v5956_v33  ;;  %v5943_v56 = vunpack.i.h.bf16 %v5941_v20  ;;  %v5942_v45 = vunpack.i.l.bf16 %v5941_v20 }
 0x2d3   : > { %v7850_v52 = vsel %vm2881_vm6, %v4182_v38, %v5957_v31  ;;  %v7853_v34 = vsel %vm2881_vm6, %v4183_v47, %v5958_v41  ;;  %v2900_v19 = vsel %vm2881_vm6, %v2867_v0, %v5942_v45  ;;  %v2901_v60 = vsel %vm2881_vm6, %v2868_v16, %v5943_v56 }
 0x2d4   : > { %v4238_v57 = vpack.c.bf16 %v7853_v34, %v7850_v52  ;;  %v2923_v8 = vpack.c.bf16 %v2901_v60, %v2900_v19  ;;  %v5966_v36 = vpop.permute.xlu0 %5965  ;;  %v5951_v29 = vpop.permute.xlu1 %5950 }
 0x2d5   : > { %v5968_v22 = vunpack.i.h.bf16 %v5966_v36  ;;  %v5967_v53 = vunpack.i.l.bf16 %v5966_v36  ;;  %v5953_v2 = vunpack.i.h.bf16 %v5951_v29  ;;  %v5952_v28 = vunpack.i.l.bf16 %v5951_v29 }
 0x2d6   : > { %5055 = vmatmul.mubr.msk.bf16.gmra.mxu0 %vm3378_vm7, %v2923_v8  ;;  %5075 = vmatmul.mubr.msk.bf16.vlgmr.msra.gmra.mxu1 %vm3378_vm7, %v4231_v7 }
 0x2d7   : > { %5078 = vmatprep.mubr.msk.bf16.mxu1 %vm3378_vm7, %v4232_v4  ;;  %v2870_v25 = vsel %vm347_vm2, %v7736_v49, %v5968_v22  ;;  %v2869_v40 = vsel %vm347_vm2, %v7730_v15, %v5967_v53  ;;  %v4185_v7 = vsel %vm347_vm2, %v7754_v18, %v5953_v2  ;;  %v4184_v21 = vsel %vm347_vm2, %v7752_v13, %v5952_v28 }
 0x2d8   : > { %v5976_v27 = vpop.permute.xlu0 %5975 }
 0x2d9   : > { %v5978_v48 = vunpack.i.h.bf16 %v5976_v27  ;;  %v5977_v46 = vunpack.i.l.bf16 %v5976_v27  ;;  %v5961_v32 = vpop.permute.xlu1 %5960 }
 0x2da   : > { %v5963_v1 = vunpack.i.h.bf16 %v5961_v32  ;;  %v5962_v62 = vunpack.i.l.bf16 %v5961_v32 }
 0x2db   : > { %v2902_v42 = vsel %vm2881_vm6, %v2869_v40, %v5977_v46  ;;  %v2903_v4 = vsel %vm2881_vm6, %v2870_v25, %v5978_v48 }
 0x2dc   : > { %v2924_v9 = vpack.c.bf16 %v2903_v4, %v2902_v42  ;;  %v7879_v33 = vsel %vm2881_vm6, %v4184_v21, %v5962_v62  ;;  %v7882_v49 = vsel %vm2881_vm6, %v4185_v7, %v5963_v1  ;;  %v5986_v15 = vpop.permute.xlu0 %5985 }
 0x2dd   : > { %v4239_v20 = vpack.c.bf16 %v7882_v49, %v7879_v33  ;;  %v5971_v41 = vpop.permute.xlu1 %5970  ;;  %v5988_v2 = vunpack.i.h.bf16 %v5986_v15  ;;  %v5987_v39 = vunpack.i.l.bf16 %v5986_v15 }
 0x2de   : > { %5058 = vmatprep.mubr.msk.bf16.mxu0 %vm3378_vm7, %v2924_v9  ;;  %5079 = vmatmul.mubr.msk.bf16.gmra.mxu1 %vm3378_vm7, %v4233_v54  ;;  %v5973_v31 = vunpack.i.h.bf16 %v5971_v41  ;;  %v5972_v56 = vunpack.i.l.bf16 %v5971_v41 }
 0x2df   : > { %5082 = vmatprep.mubr.msk.bf16.mxu1 %vm3378_vm7, %v4234_v30  ;;  %v4187_v32 = vsel %vm347_vm2, %v7781_v44, %v5988_v2  ;;  %v4186_v25 = vsel %vm347_vm2, %v7775_v37, %v5987_v39 }
 0x2e0   : > { %v5996_v45 = vpop.permute.xlu0 %5995  ;;  %v2872_v0 = vsel %vm347_vm2, %v7754_v18, %v5973_v31  ;;  %v2871_v19 = vsel %vm347_vm2, %v7752_v13, %v5972_v56 }
 0x2e1   : > { %v5981_v47 = vpop.permute.xlu1 %5980  ;;  %v5997_v28 = vunpack.i.l.bf16 %v5996_v45 }
 0x2e2   : > { %v5983_v38 = vunpack.i.h.bf16 %v5981_v47  ;;  %v5982_v16 = vunpack.i.l.bf16 %v5981_v47 }
 0x2e3   : > { %v4218_v1 = vsel %vm2881_vm6, %v4186_v25, %v5997_v28 }
 0x2e4   : > { %v2904_v3 = vsel %vm2881_vm6, %v2871_v19, %v5982_v16  ;;  %v2905_v14 = vsel %vm2881_vm6, %v2872_v0, %v5983_v38  ;;  %v6006_v54 = vpop.permute.xlu0 %6005 }
 0x2e5   : > { %v2925_v60 = vpack.c.bf16 %v2905_v14, %v2904_v3  ;;  %v5991_v8 = vpop.permute.xlu1 %5990  ;;  %v6008_v12 = vunpack.i.h.bf16 %v6006_v54  ;;  %v6007_v61 = vunpack.i.l.bf16 %v6006_v54 }
 0x2e6   : > { %5083 = vmatmul.mubr.msk.bf16.gmra.mxu1 %vm3378_vm7, %v4235_v58  ;;  %v5993_v62 = vunpack.i.h.bf16 %v5991_v8  ;;  %v5992_v7 = vunpack.i.l.bf16 %v5991_v8 }
 0x2e7   : > { %5059 = vmatmul.mubr.msk.bf16.gmra.mxu0 %vm3378_vm7, %v2925_v60  ;;  %5086 = vmatprep.mubr.msk.bf16.mxu1 %vm3378_vm7, %v4236_v59  ;;  %v2874_v29 = vsel %vm347_vm2, %v7781_v44, %v6008_v12  ;;  %v2873_v22 = vsel %vm347_vm2, %v7775_v37, %v6007_v61  ;;  %v5998_v59 = vunpack.i.h.bf16 %v5996_v45 }
 0x2e8   : > { %v6016_v30 = vpop.permute.xlu0 %6015  ;;  %v4189_v16 = vsel %vm347_vm2, %v7779_v51, %v5993_v62  ;;  %v4188_v0 = vsel %vm347_vm2, %v7777_v10, %v5992_v7 }
 0x2e9   : > { %v6018_v13 = vunpack.i.h.bf16 %v6016_v30  ;;  %v6017_v18 = vunpack.i.l.bf16 %v6016_v30  ;;  %v6001_v36 = vpop.permute.xlu1 %6000  ;;  %v4219_v50 = vsel %vm2881_vm6, %v4187_v32, %v5998_v59 }
 0x2ea   : > { %v6002_v44 = vunpack.i.l.bf16 %v6001_v36  ;;  %v4240_v4 = vpack.c.bf16 %v4219_v50, %v4218_v1 }
 0x2eb   : > { %v2906_v6 = vsel %vm2881_vm6, %v2873_v22, %v6017_v18  ;;  %v2907_v24 = vsel %vm2881_vm6, %v2874_v29, %v6018_v13 }
 0x2ec   : > { %v2926_v58 = vpack.c.bf16 %v2907_v24, %v2906_v6  ;;  %v6026_v53 = vpop.permute.xlu0 %6025  ;;  %v4220_v19 = vsel %vm2881_vm6, %v4188_v0, %v6002_v44 }
 0x2ed   : > { %v6011_v26 = vpop.permute.xlu1 %6010  ;;  %v6028_v9 = vunpack.i.h.bf16 %v6026_v53  ;;  %v6027_v15 = vunpack.i.l.bf16 %v6026_v53 }
 0x2ee   : > { %5062 = vmatprep.mubr.msk.bf16.mxu0 %vm3378_vm7, %v2926_v58  ;;  %5087 = vmatmul.mubr.msk.bf16.gmra.mxu1 %vm3378_vm7, %v4237_v35  ;;  %v6013_v27 = vunpack.i.h.bf16 %v6011_v26  ;;  %v6012_v48 = vunpack.i.l.bf16 %v6011_v26 }
 0x2ef   : > { %5090 = vmatprep.mubr.msk.bf16.mxu1 %vm3378_vm7, %v4238_v57  ;;  %v6003_v57 = vunpack.i.h.bf16 %v6001_v36  ;;  %v4191_v33 = vsel %vm347_vm2, %v7803_v43, %v6028_v9  ;;  %v4190_v49 = vsel %vm347_vm2, %v7797_v23, %v6027_v15 }
 0x2f0   : > { %v6031_v46 = vpop.permute.xlu0 %6030  ;;  %v2876_v52 = vsel %vm347_vm2, %v7779_v51, %v6013_v27  ;;  %v2875_v34 = vsel %vm347_vm2, %v7777_v10, %v6012_v48 }
 0x2f1   : > { %v6021_v40 = vpop.permute.xlu1 %6020  ;;  %v6033_v56 = vunpack.i.h.bf16 %v6031_v46  ;;  %v6032_v45 = vunpack.i.l.bf16 %v6031_v46  ;;  %v4221_v3 = vsel %vm2881_vm6, %v4189_v16, %v6003_v57 }
 0x2f2   : > { %v6023_v17 = vunpack.i.h.bf16 %v6021_v40  ;;  %v6022_v35 = vunpack.i.l.bf16 %v6021_v40  ;;  %v4241_v13 = vpack.c.bf16 %v4221_v3, %v4220_v19 }
 0x2f3   : > { %v4222_v10 = vsel %vm2881_vm6, %v4190_v49, %v6032_v45  ;;  %v4223_v60 = vsel %vm2881_vm6, %v4191_v33, %v6033_v56 }
 0x2f4   : > { %v2908_v21 = vsel %vm2881_vm6, %v2875_v34, %v6022_v35  ;;  %v2909_v37 = vsel %vm2881_vm6, %v2876_v52, %v6023_v17  ;;  %v6036_v42 = vpop.permute.xlu0 %6035  ;;  %v4242_v6 = vpack.c.bf16 %v4223_v60, %v4222_v10 }
 0x2f5   : > { %v2927_v41 = vpack.c.bf16 %v2909_v37, %v2908_v21  ;;  %v7937_v31 = vpop.permute.xlu1 %6050  ;;  %v6038_v47 = vunpack.i.h.bf16 %v6036_v42  ;;  %v6037_v38 = vunpack.i.l.bf16 %v6036_v42  ;;  %v3844_v21 = vld [vmem:[#allocation3 + $0x198] sm:$0xff]  ;;  %v3845_v37 = vld [vmem:[#allocation3 + $0x1a0] sm:$0xff] }
 0x2f6   : > { %5091 = vmatmul.mubr.msk.bf16.gmra.mxu1 %vm3378_vm7, %v4239_v20  ;;  %v6053_v57 = vunpack.i.h.bf16 %v7937_v31 }
 0x2f7   : > { %5063 = vmatmul.mubr.msk.bf16.gmra.mxu0 %vm3378_vm7, %v2927_v41  ;;  %5094 = vmatprep.mubr.msk.bf16.mxu1 %vm3378_vm7, %v4240_v4  ;;  %v2878_v8 = vsel %vm347_vm2, %v7803_v43, %v6038_v47  ;;  %v2877_v12 = vsel %vm347_vm2, %v7797_v23, %v6037_v38 }
 0x2f8   : > { %v6041_v14 = vpop.permute.xlu0 %6040 }
 0x2f9   : > { %v6043_v20 = vunpack.i.h.bf16 %v6041_v14  ;;  %v6042_v51 = vunpack.i.l.bf16 %v6041_v14  ;;  %v6056_v54 = vpop.permute.xlu1 %6055 }
 0x2fa   : > { %v6058_v36 = vunpack.i.h.bf16 %v6056_v54  ;;  %v6057_v29 = vunpack.i.l.bf16 %v6056_v54 }
 0x2fb   : > { %v2910_v61 = vsel %vm2881_vm6, %v2877_v12, %v6042_v51  ;;  %v2911_v30 = vsel %vm2881_vm6, %v2878_v8, %v6043_v20 }
 0x2fc   : > { %v2928_v18 = vpack.c.bf16 %v2911_v30, %v2910_v61  ;;  %v6046_v22 = vpop.permute.xlu0 %6045  ;;  %v4193_v23 = vsel %vm347_vm2, %v7801_v5, %v6058_v36  ;;  %v4192_v43 = vsel %vm347_vm2, %v7799_v11, %v6057_v29 }
 0x2fd   : > { %v6061_v24 = vpop.permute.xlu1 %6060  ;;  %v6048_v58 = vunpack.i.h.bf16 %v6046_v22  ;;  %v6047_v53 = vunpack.i.l.bf16 %v6046_v22 }
 0x2fe   : > { %v6063_v2 = vunpack.i.h.bf16 %v6061_v24  ;;  %v6062_v39 = vunpack.i.l.bf16 %v6061_v24  ;;  %5066 = vmatprep.mubr.msk.bf16.mxu0 %vm3378_vm7, %v2928_v18  ;;  %5095 = vmatmul.mubr.msk.bf16.gmra.mxu1 %vm3378_vm7, %v4241_v13 }
 0x2ff   : > { %5098 = vmatprep.mubr.msk.bf16.mxu1 %vm3378_vm7, %v4242_v6  ;;  %v4195_v32 = vsel %vm347_vm2, %v7821_v63, %v6048_v58  ;;  %v4194_v25 = vsel %vm347_vm2, %v7819_v55, %v6047_v53  ;;  %v6052_v63 = vunpack.i.l.bf16 %v7937_v31  ;;  %v4197_v31 = vsel %vm347_vm2, %v3845_v37, %v6053_v57 }
 0x300   : > { %v6076_v26 = vpop.permute.xlu0 %6075  ;;  %v4224_v59 = vsel %vm2881_vm6, %v4192_v43, %v6062_v39  ;;  %v4225_v28 = vsel %vm2881_vm6, %v4193_v23, %v6063_v2 }
 0x301   : > { %v6078_v27 = vunpack.i.h.bf16 %v6076_v26  ;;  %v6077_v48 = vunpack.i.l.bf16 %v6076_v26  ;;  %v6066_v46 = vpop.permute.xlu1 %6065  ;;  %v4243_v35 = vpack.c.bf16 %v4225_v28, %v4224_v59  ;;  %v4196_v45 = vsel %vm347_vm2, %v3844_v21, %v6052_v63  ;;  %v8059_v63 = vld [vmem:[%s8211_s4] ss:$0 sm:$0xff] }
 0x302   : > { %v6068_v50 = vunpack.i.h.bf16 %v6066_v46  ;;  %v6067_v17 = vunpack.i.l.bf16 %v6066_v46 }
 0x303   : > { %v4226_v40 = vsel %vm2881_vm6, %v4194_v25, %v6077_v48  ;;  %v4227_v1 = vsel %vm2881_vm6, %v4195_v32, %v6078_v27 }
 0x304   : > { %v4244_v62 = vpack.c.bf16 %v4227_v1, %v4226_v40  ;;  %v2880_v55 = vsel %vm347_vm2, %v7801_v5, %v6068_v50  ;;  %v2879_v44 = vsel %vm347_vm2, %v7799_v11, %v6067_v17 }
 0x305   : > { %v6071_v7 = vpop.permute.xlu1 %6070 }
 0x306   : > { %v6073_v52 = vunpack.i.h.bf16 %v6071_v7  ;;  %v6072_v34 = vunpack.i.l.bf16 %v6071_v7  ;;  %5099 = vmatmul.mubr.msk.bf16.gmra.mxu1 %vm3378_vm7, %v4243_v35 }
 0x307   : > { %5102 = vmatprep.mubr.msk.bf16.mxu1 %vm3378_vm7, %v4244_v62 }
 0x308   : > { %v2912_v42 = vsel %vm2881_vm6, %v2879_v44, %v6072_v34  ;;  %v2913_v4 = vsel %vm2881_vm6, %v2880_v55, %v6073_v52 }
 0x309   : > { %v2929_v9 = vpack.c.bf16 %v2913_v4, %v2912_v42  ;;  %v6081_v15 = vpop.permute.xlu1 %6080 }
 0x30a   : > { %v6083_v41 = vunpack.i.h.bf16 %v6081_v15  ;;  %v6082_v56 = vunpack.i.l.bf16 %v6081_v15 }
 0x30b   : > { %5067 = vmatmul.mubr.msk.bf16.gmra.mxu0 %vm3378_vm7, %v2929_v9 }
 0x30c   : > { %v4228_v11 = vsel %vm2881_vm6, %v4196_v45, %v6082_v56  ;;  %v4229_v5 = vsel %vm2881_vm6, %v4197_v31, %v6083_v41 }
 0x30d   : > { %v4245_v47 = vpack.c.bf16 %v4229_v5, %v4228_v11 }
 0x30f   : > { %5103 = vmatmul.mubr.msk.bf16.gmra.mxu1 %vm3378_vm7, %v4245_v47 }
 0x31f   : > { %v5040_v8 = vpop.f32.mrf.mxu0 }
 0x321   : > { %v3686_v30 = vpop.f32.mrf.mxu0 }
 0x323   : > { %v5041_v18 = vpop.f32.mrf.mxu0 }
 0x325   : > { %v3689_v29 = vpop.f32.mrf.mxu0 }
 0x328   : > { %v5004_v38 = vpop.f32.mrf.mxu1 }
 0x329   : > { %v3695_v52 = vadd.f32 %v5040_v8, %v5004_v38 }
 0x32a   : > { %v3465_v16 = vpop.f32.mrf.mxu1 }
 0x32b   : > { %v3687_v55 = vadd.f32 %v3686_v30, %v3465_v16 }
 0x32c   : > { %v5005_v0 = vpop.f32.mrf.mxu1 }
 0x32d   : > { %v3698_v37 = vadd.f32 %v5041_v18, %v5005_v0 }
 0x32e   : > { %v3468_v19 = vpop.f32.mrf.mxu1 }
 0x32f   : > { %v3690_v41 = vadd.f32 %v3689_v29, %v3468_v19 }
 0x336   : > { %v5044_v6 = vpop.f32.mrf.mxu0 }
 0x338   : > { %v3702_v58 = vpop.f32.mrf.mxu0 }
 0x33a   : > { %v5045_v2 = vpop.f32.mrf.mxu0 }
 0x33c   : > { %v3705_v43 = vpop.f32.mrf.mxu0 }
 0x340   : > { %v5008_v3 = vpop.f32.mrf.mxu1 }
 0x341   : > { %v3711_v5 = vadd.f32 %v5044_v6, %v5008_v3 }
 0x342   : > { %v7994_v14 = vpop.f32.mrf.mxu1 }
 0x343   : > { %v3703_v30 = vadd.f32 %v3702_v58, %v7994_v14 }
 0x344   : > { %v7996_v33 = vpop.f32.mrf.mxu1 }
 0x345   : > { %v3714_v6 = vadd.f32 %v5045_v2, %v7996_v33 }
 0x346   : > { %v7998_v49 = vpop.f32.mrf.mxu1 }
 0x347   : > { %v3706_v58 = vadd.f32 %v3705_v43, %v7998_v49 }
 0x34e   : > { %v5048_v59 = vpop.f32.mrf.mxu0 }
 0x350   : > { %v3718_v48 = vpop.f32.mrf.mxu0 }
 0x352   : > { %v8038_v25 = vpop.f32.mrf.mxu0 }
 0x354   : > { %v8044_v50 = vpop.f32.mrf.mxu0 }
 0x358   : > { %v8000_v20 = vpop.f32.mrf.mxu1 }
 0x359   : > { %v3727_v33 = vadd.f32 %v5048_v59, %v8000_v20 }
 0x35a   : > { %v8002_v51 = vpop.f32.mrf.mxu1 }
 0x35b   : > { %v3719_v49 = vadd.f32 %v3718_v48, %v8002_v51 }
 0x35c   : > { %v8004_v54 = vpop.f32.mrf.mxu1 }
 0x35d   : > { %v3730_v20 = vadd.f32 %v8038_v25, %v8004_v54 }
 0x35e   : > { %v8006_v10 = vpop.f32.mrf.mxu1 }
 0x35f   : > { %v3722_v51 = vadd.f32 %v8044_v50, %v8006_v10 }
 0x366   : > { %v8048_v35 = vpop.f32.mrf.mxu0 }
 0x367   : > { %v8008_v60 = vpop.f32.mrf.mxu1 }
 0x368   : > { %v8054_v34 = vpop.f32.mrf.mxu0  ;;  %v3743_v25 = vadd.f32 %v8048_v35, %v8008_v60 }
 0x369   : > { %v8010_v12 = vpop.f32.mrf.mxu1 }
 0x36a   : > { %v8062_v9 = vpop.f32.mrf.mxu0  ;;  %v3735_v50 = vadd.f32 %v8054_v34, %v8010_v12 }
 0x36b   : > { %v8012_v61 = vpop.f32.mrf.mxu1 }
 0x36c   : > { %v8075_v0 = vpop.f32.mrf.mxu0  ;;  %v3746_v35 = vadd.f32 %v8062_v9, %v8012_v61 }
 0x36d   : > { %v8014_v13 = vpop.f32.mrf.mxu1 }
 0x36e   : > { %v3738_v34 = vadd.f32 %v8075_v0, %v8014_v13 }
 0x36f   : > { %v8016_v36 = vpop.f32.mrf.mxu1 }
 0x371   : > { %v8018_v22 = vpop.f32.mrf.mxu1 }
 0x373   : > { %v8020_v24 = vpop.f32.mrf.mxu1 }
 0x375   : > { %v8022_v53 = vpop.f32.mrf.mxu1 }
 0x37e   : > { %v8024_v39 = vpop.f32.mrf.mxu1 }
 0x380   : > { %v8026_v23 = vpop.f32.mrf.mxu1 }
 0x382   : > { %v8028_v26 = vpop.f32.mrf.mxu1 }
 0x384   : > { %v8030_v28 = vpop.f32.mrf.mxu1 }
 0x386   : > { %v8032_v27 = vpop.f32.mrf.mxu1 }
 0x388   : > { %v8034_v46 = vpop.f32.mrf.mxu1 }
 0x38a   : > { %v8036_v32 = vpop.f32.mrf.mxu1 }
 0x38c   : > { %v8040_v40 = vpop.f32.mrf.mxu1 }
 0x38e   : > { %v8042_v1 = vpop.f32.mrf.mxu1 }
 0x390   : > { %v8046_v17 = vpop.f32.mrf.mxu1 }
 0x392   : > { %v8050_v62 = vpop.f32.mrf.mxu1 }
 0x394   : > { %v8052_v7 = vpop.f32.mrf.mxu1 }
 0x396   : > { %v5076_v57 = vpop.f32.mrf.mxu1 }
 0x397   : > { %v4473_v44 = vadd.f32 %v5076_v57, %v3695_v52  ;;  %v8081_v52 = vpop.f32.mrf.mxu0 }
 0x398   : > { %v4344_v21 = vpop.f32.mrf.mxu1  ;;  %v3759_v9 = vadd.f32 %v8081_v52, %v8016_v36 }
 0x399   : > { %v4512_v42 = vadd.f32 %v8059_v63, %v4473_v44  ;;  %v4471_v4 = vadd.f32 %v4344_v21, %v3687_v55 }
 0x39a   : > { %v5077_v15 = vpop.f32.mrf.mxu1 }
 0x39b   : > { %v4544_v56 = vmax.f32 %v4512_v42, 0.0  ;;  %v4510_v31 = vadd.f32 %v8059_v63, %v4471_v4  ;;  %v4474_v45 = vadd.f32 %v5077_v15, %v3698_v37  ;;  %v3750_v4 = vpop.f32.mrf.mxu0 }
 0x39c   : > { %v4347_v11 = vpop.f32.mrf.mxu1  ;;  %v3751_v0 = vadd.f32 %v3750_v4, %v8018_v22 }
 0x39d   : > { %4576 = vst.msk [vmem:[%s8069_s30 + $0x10] sm:$0xff] %vm347_vm2, %v4544_v56  ;;  %v4542_v47 = vmax.f32 %v4510_v31, 0.0  ;;  %v4513_v38 = vadd.f32 %v8059_v63, %v4474_v45  ;;  %v4472_v16 = vadd.f32 %v4347_v11, %v3690_v41 }
 0x39e   : > { %v5080_v8 = vpop.f32.mrf.mxu1 }
 0x39f   : > { %4574 = vst.msk [vmem:[%s8069_s30] sm:$0xff] %vm347_vm2, %v4542_v47  ;;  %v4545_v19 = vmax.f32 %v4513_v38, 0.0  ;;  %v4511_v18 = vadd.f32 %v8059_v63, %v4472_v16  ;;  %v4477_v29 = vadd.f32 %v5080_v8, %v3711_v5  ;;  %v5057_v5 = vpop.f32.mrf.mxu0 }
 0x3a0   : > { %v4360_v3 = vpop.f32.mrf.mxu1  ;;  %v3762_v36 = vadd.f32 %v5057_v5, %v8020_v24 }
 0x3a1   : > { %4577 = vst.msk [vmem:[%s8069_s30 + $0x18] sm:$0xff] %vm347_vm2, %v4545_v19  ;;  %v4543_v57 = vmax.f32 %v4511_v18, 0.0  ;;  %v4516_v55 = vadd.f32 %v8059_v63, %v4477_v29  ;;  %v4475_v44 = vadd.f32 %v4360_v3, %v3703_v30  ;;  %v3753_v18 = vpop.f32.mrf.mxu0 }
 0x3a2   : > { %v5081_v14 = vpop.f32.mrf.mxu1  ;;  %v3754_v22 = vadd.f32 %v3753_v18, %v8022_v53 }
 0x3a3   : > { %4575 = vst.msk [vmem:[%s8069_s30 + $0x8] sm:$0xff] %vm347_vm2, %v4543_v57  ;;  %v4548_v21 = vmax.f32 %v4516_v55, 0.0  ;;  %v4514_v37 = vadd.f32 %v8059_v63, %v4475_v44  ;;  %v4478_v42 = vadd.f32 %v5081_v14, %v3714_v6 }
 0x3a4   : > { %v4363_v15 = vpop.f32.mrf.mxu1 }
 0x3a5   : > { %4580 = vst.msk [vmem:[%s8069_s30 + $0x30] sm:$0xff] %vm347_vm2, %v4548_v21  ;;  %v4546_v2 = vmax.f32 %v4514_v37, 0.0  ;;  %v4517_v41 = vadd.f32 %v8059_v63, %v4478_v42  ;;  %v4476_v56 = vadd.f32 %v4363_v15, %v3706_v58 }
 0x3a6   : > { %v5084_v31 = vpop.f32.mrf.mxu1 }
 0x3a7   : > { %4578 = vst.msk [vmem:[%s8069_s30 + $0x20] sm:$0xff] %vm347_vm2, %v4546_v2  ;;  %v4549_v43 = vmax.f32 %v4517_v41, 0.0  ;;  %v4515_v45 = vadd.f32 %v8059_v63, %v4476_v56  ;;  %v4481_v11 = vadd.f32 %v5084_v31, %v3727_v33  ;;  %v5060_v57 = vpop.f32.mrf.mxu0 }
 0x3a8   : > { %v4376_v47 = vpop.f32.mrf.mxu1  ;;  %v3775_v5 = vadd.f32 %v5060_v57, %v8024_v39 }
 0x3a9   : > { %4581 = vst.msk [vmem:[%s8069_s30 + $0x38] sm:$0xff] %vm347_vm2, %v4549_v43  ;;  %v4547_v59 = vmax.f32 %v4515_v45, 0.0  ;;  %v4520_v38 = vadd.f32 %v8059_v63, %v4481_v11  ;;  %v4479_v16 = vadd.f32 %v4376_v47, %v3719_v49  ;;  %v3766_v42 = vpop.f32.mrf.mxu0 }
 0x3aa   : > { %v5085_v8 = vpop.f32.mrf.mxu1  ;;  %v3767_v53 = vadd.f32 %v3766_v42, %v8026_v23 }
 0x3ab   : > { %4579 = vst.msk [vmem:[%s8069_s30 + $0x28] sm:$0xff] %vm347_vm2, %v4547_v59  ;;  %v4552_v48 = vmax.f32 %v4520_v38, 0.0  ;;  %v4518_v30 = vadd.f32 %v8059_v63, %v4479_v16  ;;  %v4482_v19 = vadd.f32 %v5085_v8, %v3730_v20  ;;  %v5061_v49 = vpop.f32.mrf.mxu0 }
 0x3ac   : > { %v4379_v54 = vpop.f32.mrf.mxu1  ;;  %v3778_v39 = vadd.f32 %v5061_v49, %v8028_v26 }
 0x3ad   : > { %4584 = vst.msk [vmem:[%s8069_s30 + $0x50] sm:$0xff] %vm347_vm2, %v4552_v48  ;;  %v4550_v29 = vmax.f32 %v4518_v30, 0.0  ;;  %v4521_v3 = vadd.f32 %v8059_v63, %v4482_v19  ;;  %v4480_v6 = vadd.f32 %v4379_v54, %v3722_v51  ;;  %v3769_v38 = vpop.f32.mrf.mxu0 }
 0x3ae   : > { %v5088_v10 = vpop.f32.mrf.mxu1  ;;  %v3770_v23 = vadd.f32 %v3769_v38, %v8030_v28 }
 0x3af   : > { %4582 = vst.msk [vmem:[%s8069_s30 + $0x40] sm:$0xff] %vm347_vm2, %v4550_v29  ;;  %v4553_v55 = vmax.f32 %v4521_v3, 0.0  ;;  %v4519_v44 = vadd.f32 %v8059_v63, %v4480_v6  ;;  %v4485_v14 = vadd.f32 %v5088_v10, %v3743_v25 }
 0x3b0   : > { %v4392_v60 = vpop.f32.mrf.mxu1 }
 0x3b1   : > { %4585 = vst.msk [vmem:[%s8069_s30 + $0x58] sm:$0xff] %vm347_vm2, %v4553_v55  ;;  %v4551_v58 = vmax.f32 %v4519_v44, 0.0  ;;  %v4524_v21 = vadd.f32 %v8059_v63, %v4485_v14  ;;  %v4483_v37 = vadd.f32 %v4392_v60, %v3735_v50 }
 0x3b2   : > { %v5089_v12 = vpop.f32.mrf.mxu1 }
 0x3b3   : > { %4583 = vst.msk [vmem:[%s8069_s30 + $0x48] sm:$0xff] %vm347_vm2, %v4551_v58  ;;  %v4556_v15 = vmax.f32 %v4524_v21, 0.0  ;;  %v4522_v33 = vadd.f32 %v8059_v63, %v4483_v37  ;;  %v4486_v2 = vadd.f32 %v5089_v12, %v3746_v35 }
 0x3b4   : > { %v4395_v61 = vpop.f32.mrf.mxu1 }
 0x3b5   : > { %4588 = vst.msk [vmem:[%s8069_s30 + $0x70] sm:$0xff] %vm347_vm2, %v4556_v15  ;;  %v4554_v41 = vmax.f32 %v4522_v33, 0.0  ;;  %v4525_v56 = vadd.f32 %v8059_v63, %v4486_v2  ;;  %v4484_v31 = vadd.f32 %v4395_v61, %v3738_v34 }
 0x3b6   : > { %v5092_v13 = vpop.f32.mrf.mxu1 }
 0x3b7   : > { %4586 = vst.msk [vmem:[%s8069_s30 + $0x60] sm:$0xff] %vm347_vm2, %v4554_v41  ;;  %v4557_v43 = vmax.f32 %v4525_v56, 0.0  ;;  %v4523_v45 = vadd.f32 %v8059_v63, %v4484_v31  ;;  %v4489_v11 = vadd.f32 %v5092_v13, %v3759_v9  ;;  %v5064_v48 = vpop.f32.mrf.mxu0 }
 0x3b8   : > { %v4408_v47 = vpop.f32.mrf.mxu1  ;;  %v3791_v26 = vadd.f32 %v5064_v48, %v8032_v27 }
 0x3b9   : > { %4589 = vst.msk [vmem:[%s8069_s30 + $0x78] sm:$0xff] %vm347_vm2, %v4557_v43  ;;  %v4555_v52 = vmax.f32 %v4523_v45, 0.0  ;;  %v4528_v20 = vadd.f32 %v8059_v63, %v4489_v11  ;;  %v4487_v59 = vadd.f32 %v4408_v47, %v3751_v0  ;;  %v3782_v6 = vpop.f32.mrf.mxu0 }
 0x3ba   : > { %v5093_v16 = vpop.f32.mrf.mxu1  ;;  %v3783_v28 = vadd.f32 %v3782_v6, %v8034_v46 }
 0x3bb   : > { %4587 = vst.msk [vmem:[%s8069_s30 + $0x68] sm:$0xff] %vm347_vm2, %v4555_v52  ;;  %v4560_v4 = vmax.f32 %v4528_v20, 0.0  ;;  %v4526_v8 = vadd.f32 %v8059_v63, %v4487_v59  ;;  %v4490_v51 = vadd.f32 %v5093_v16, %v3762_v36  ;;  %v5065_v58 = vpop.f32.mrf.mxu0 }
 0x3bc   : > { %v4411_v24 = vpop.f32.mrf.mxu1  ;;  %v3794_v27 = vadd.f32 %v5065_v58, %v8036_v32 }
 0x3bd   : > { %4592 = vst.msk [vmem:[%s8069_s30 + $0x90] sm:$0xff] %vm347_vm2, %v4560_v4  ;;  %v4558_v30 = vmax.f32 %v4526_v8, 0.0  ;;  %v4529_v19 = vadd.f32 %v8059_v63, %v4490_v51  ;;  %v4488_v54 = vadd.f32 %v4411_v24, %v3754_v22  ;;  %v3785_v61 = vpop.f32.mrf.mxu0 }
 0x3be   : > { %v5096_v25 = vpop.f32.mrf.mxu1  ;;  %v3786_v46 = vadd.f32 %v3785_v61, %v8040_v40 }
 0x3bf   : > { %4590 = vst.msk [vmem:[%s8069_s30 + $0x80] sm:$0xff] %vm347_vm2, %v4558_v30  ;;  %v4561_v18 = vmax.f32 %v4529_v19, 0.0  ;;  %v4527_v29 = vadd.f32 %v8059_v63, %v4488_v54  ;;  %v4493_v3 = vadd.f32 %v5096_v25, %v3775_v5 }
 0x3c0   : > { %v4424_v10 = vpop.f32.mrf.mxu1 }
 0x3c1   : > { %4593 = vst.msk [vmem:[%s8069_s30 + $0x98] sm:$0xff] %vm347_vm2, %v4561_v18  ;;  %v4559_v57 = vmax.f32 %v4527_v29, 0.0  ;;  %v4532_v50 = vadd.f32 %v8059_v63, %v4493_v3  ;;  %v4491_v55 = vadd.f32 %v4424_v10, %v3767_v53 }
 0x3c2   : > { %v5097_v44 = vpop.f32.mrf.mxu1 }
 0x3c3   : > { %4591 = vst.msk [vmem:[%s8069_s30 + $0x88] sm:$0xff] %vm347_vm2, %v4559_v57  ;;  %v4564_v14 = vmax.f32 %v4532_v50, 0.0  ;;  %v4530_v60 = vadd.f32 %v8059_v63, %v4491_v55  ;;  %v4494_v35 = vadd.f32 %v5097_v44, %v3778_v39 }
 0x3c4   : > { %v4427_v21 = vpop.f32.mrf.mxu1 }
 0x3c5   : > { %4596 = vst.msk [vmem:[%s8069_s30 + $0xb0] sm:$0xff] %vm347_vm2, %v4564_v14  ;;  %v4562_v37 = vmax.f32 %v4530_v60, 0.0  ;;  %v4533_v42 = vadd.f32 %v8059_v63, %v4494_v35  ;;  %v4492_v12 = vadd.f32 %v4427_v21, %v3770_v23 }
 0x3c6   : > { %v5100_v34 = vpop.f32.mrf.mxu1 }
 0x3c7   : > { %4594 = vst.msk [vmem:[%s8069_s30 + $0xa0] sm:$0xff] %vm347_vm2, %v4562_v37  ;;  %v4565_v15 = vmax.f32 %v4533_v42, 0.0  ;;  %v4531_v33 = vadd.f32 %v8059_v63, %v4492_v12  ;;  %v4497_v2 = vadd.f32 %v5100_v34, %v3791_v26 }
 0x3c8   : > { %v4440_v9 = vpop.f32.mrf.mxu1 }
 0x3c9   : > { %4597 = vst.msk [vmem:[%s8069_s30 + $0xb8] sm:$0xff] %vm347_vm2, %v4565_v15  ;;  %v4563_v41 = vmax.f32 %v4531_v33, 0.0  ;;  %v4536_v56 = vadd.f32 %v8059_v63, %v4497_v2  ;;  %v4495_v31 = vadd.f32 %v4440_v9, %v3783_v28 }
 0x3ca   : > { %v5101_v49 = vpop.f32.mrf.mxu1 }
 0x3cb   : > { %4595 = vst.msk [vmem:[%s8069_s30 + $0xa8] sm:$0xff] %vm347_vm2, %v4563_v41  ;;  %v4568_v13 = vmax.f32 %v4536_v56, 0.0  ;;  %v4534_v0 = vadd.f32 %v8059_v63, %v4495_v31  ;;  %v5068_v43 = vpop.f32.mrf.mxu0  ;;  %v4498_v45 = vadd.f32 %v5101_v49, %v3794_v27 }
 0x3cc   : > { %v4443_v11 = vpop.f32.mrf.mxu1  ;;  %v3807_v20 = vadd.f32 %v5068_v43, %v8042_v1 }
 0x3cd   : > { %4600 = vst.msk [vmem:[%s8069_s30 + $0xd0] sm:$0xff] %vm347_vm2, %v4568_v13  ;;  %v4566_v32 = vmax.f32 %v4534_v0, 0.0  ;;  %v4537_v47 = vadd.f32 %v8059_v63, %v4498_v45  ;;  %v3798_v36 = vpop.f32.mrf.mxu0  ;;  %v4496_v52 = vadd.f32 %v4443_v11, %v3786_v46 }
 0x3ce   : > { %v3799_v22 = vadd.f32 %v3798_v36, %v8046_v17 }
 0x3cf   : > { %4598 = vst.msk [vmem:[%s8069_s30 + $0xc0] sm:$0xff] %vm347_vm2, %v4566_v32  ;;  %v4569_v40 = vmax.f32 %v4537_v47, 0.0  ;;  %v4535_v59 = vadd.f32 %v8059_v63, %v4496_v52  ;;  %v5069_v38 = vpop.f32.mrf.mxu0  ;;  %v5104_v16 = vpop.f32.mrf.mxu1 }
 0x3d0   : > { %v4501_v4 = vadd.f32 %v5104_v16, %v3807_v20  ;;  %v3810_v24 = vadd.f32 %v5069_v38, %v8050_v62 }
 0x3d1   : > { %4601 = vst.msk [vmem:[%s8069_s30 + $0xd8] sm:$0xff] %vm347_vm2, %v4569_v40  ;;  %v4567_v8 = vmax.f32 %v4535_v59, 0.0  ;;  %v3801_v51 = vpop.f32.mrf.mxu0  ;;  %v4456_v48 = vpop.f32.mrf.mxu1 }
 0x3d2   : > { %v4540_v1 = vadd.f32 %v8059_v63, %v4501_v4  ;;  %v4499_v5 = vadd.f32 %v4456_v48, %v3799_v22  ;;  %v3802_v17 = vadd.f32 %v3801_v51, %v8052_v7 }
 0x3d3   : > { %4599 = vst.msk [vmem:[%s8069_s30 + $0xc8] sm:$0xff] %vm347_vm2, %v4567_v8  ;;  %v5105_v30 = vpop.f32.mrf.mxu1 }
 0x3d4   : > { %v4572_v19 = vmax.f32 %v4540_v1, 0.0  ;;  %v4538_v54 = vadd.f32 %v8059_v63, %v4499_v5  ;;  %v4502_v25 = vadd.f32 %v5105_v30, %v3810_v24 }
 0x3d5   : > { %v4459_v53 = vpop.f32.mrf.mxu1 }
 0x3d6   : > { %4604 = vst.msk [vmem:[%s8069_s30 + $0xf0] sm:$0xff] %vm347_vm2, %v4572_v19  ;;  %v4570_v18 = vmax.f32 %v4538_v54, 0.0  ;;  %v4541_v62 = vadd.f32 %v8059_v63, %v4502_v25  ;;  %v4500_v29 = vadd.f32 %v4459_v53, %v3802_v17 }
 0x3d8   : > { %4602 = vst.msk [vmem:[%s8069_s30 + $0xe0] sm:$0xff] %vm347_vm2, %v4570_v18  ;;  %v4573_v3 = vmax.f32 %v4541_v62, 0.0  ;;  %v4539_v6 = vadd.f32 %v8059_v63, %v4500_v29 }
 0x3da   : > { %4605 = vst.msk [vmem:[%s8069_s30 + $0xf8] sm:$0xff] %vm347_vm2, %v4573_v3  ;;  %v4571_v10 = vmax.f32 %v4539_v6, 0.0 }
 0x3dc   : > { %4603 = vst.msk [vmem:[%s8069_s30 + $0xe8] sm:$0xff] %vm347_vm2, %v4571_v10 }
 0x3dd PF: > { %s15_s18 = sadd.s32 1, %s6099_s18  }
 0x3de   : > { %p12_p4 = scmp.ge.s32.totalorder %s15_s18, 4  }
 0x3e0   :  { %14 = sbr.rel (!%p12_p4) target bundleno = 1 (0x1), region = 78 }

</bundles_post_ra>
